<compile_context>
chip_gen: v7x
topology: tpu7x:2x2x1
jax: 0.10.0
libtpu: 0.0.40
codegen_flags: <defaults>
</compile_context>

<pallas_src>
import functools

import jax
import jax.numpy as jnp
from jax.experimental import pallas as pl
from jax.experimental.pallas import tpu as pltpu

EPS = 1e-5
VMEM_LIMIT = 32 * 1024 * 1024


# --------------------------- kernels ---------------------------------------
def _conv_stats_kernel(*refs, bh, width, pre_act, add_bias):
    """One (batch, row-block) tile:
       [BN-affine + ReLU] -> reflection pad (W) -> 3x3 conv as a single
       (bh*W, 9*Cin) x (9*Cin, Cout) MXU matmul -> (+bias) -> per-block BN stats.
    """
    it = iter(refs)
    top_ref, cur_ref, bot_ref, w_ref = next(it), next(it), next(it), next(it)
    bias_ref = next(it) if add_bias else None
    scale_ref = next(it) if pre_act else None
    shift_ref = next(it) if pre_act else None
    out_ref, stats_ref = next(it), next(it)

    top = top_ref[0]                                   # (1, W, C)  reflected halo
    cur = cur_ref[0]                                   # (bh, W, C)
    bot = bot_ref[0]                                   # (1, W, C)  reflected halo
    win = jnp.concatenate([top, cur, bot], axis=0)     # (bh+2, W, C)

    if pre_act:                                        # BN1 affine + ReLU (stage 2)
        win = jnp.maximum(win * scale_ref[...] + shift_ref[...], 0.0)

    # ReflectionPad2d(1) along W (the H reflection is already in top/bot rows).
    winp = jnp.concatenate(
        [win[:, 1:2, :], win, win[:, width - 2:width - 1, :]], axis=1)

    cin = winp.shape[-1]
    cout = out_ref.shape[-1]

    # im2col: fold the 9 taps into K so the MXU sees one big matmul.
    cols = [winp[dy:dy + bh, dx:dx + width, :]
            for dy in range(3) for dx in range(3)]
    patches = jnp.concatenate(cols, axis=-1).reshape(bh * width, 9 * cin)
    acc = jnp.dot(patches, w_ref[...], preferred_element_type=jnp.float32)

    if add_bias:
        acc = acc + bias_ref[...]                      # conv bias (stage 2)

    # Per-block BN partials: sum and CENTERED sum-of-squares (Chan-combinable,
    # avoids E[x^2]-E[x]^2 cancellation).
    inv_count = 1.0 / (bh * width)
    bsum = jnp.sum(acc, axis=0, keepdims=True)         # (1, Cout)
    diff = acc - bsum * inv_count
    cssq = jnp.sum(diff * diff, axis=0, keepdims=True)  # (1, Cout)

    out_ref[...] = acc.reshape(1, bh, width, cout).astype(out_ref.dtype)
    stats_ref[...] = jnp.concatenate([bsum, cssq], axis=0).reshape(1, 1, 2, cout)


def _residual_affine_kernel(x_ref, y_ref, scale_ref, shift_ref, out_ref):
    # out = x + BN2(conv2_out), computed on a lane-dense (rows, W*C) layout.
    out_ref[...] = x_ref[...] + y_ref[...] * scale_ref[...] + shift_ref[...]


# --------------------------- wrappers ---------------------------------------
def _pick_row_block(h, width, cin, budget_bytes=6 * 1024 * 1024, max_bh=64):
    """Largest divisor of H keeping the per-tile im2col under ~budget_bytes."""
    limit = max(1, budget_bytes // max(1, width * 9 * cin * 4))
    limit = min(int(limit), max_bh, h)
    for d in range(limit, 0, -1):
        if h % d == 0:
            return d
    return 1


def _pick_flat_rows(total, lanes, budget_bytes=8 * 1024 * 1024):
    """Row-block for the finalize stage: divisor of `total`, multiple of 8 (or
    the full extent), sized so ~3 arrays x 2 buffers fit the VMEM budget."""
    cap = max(8, budget_bytes // max(1, lanes * 4 * 6))
    if total <= cap:
        return total
    for d in range(min(cap, total), 0, -1):
        if total % d == 0 and d % 8 == 0:
            return d
    return total


def _conv_stage(inp, w_mat, bias, scale, shift, *, pre_act, bh):
    """Tiled conv3x3 stage over grid (N, H//bh); returns (raw conv out, stats)."""
    n, h, width, cin = inp.shape
    cout = w_mat.shape[1]
    nblk = h // bh

    cur_map = lambda b, i: (b, i, 0, 0)
    # Reflection of ReflectionPad2d(1) encoded directly in the halo index maps:
    top_map = lambda b, i: (b, jnp.where(i == 0, 1, i * bh - 1), 0, 0)
    bot_map = lambda b, i: (b, jnp.where(i == nblk - 1, h - 2, (i + 1) * bh), 0, 0)
    const2 = lambda b, i: (0, 0)

    in_specs = [
        pl.BlockSpec((1, 1, width, cin), top_map),     # top halo row
        pl.BlockSpec((1, bh, width, cin), cur_map),    # body rows
        pl.BlockSpec((1, 1, width, cin), bot_map),     # bottom halo row
        pl.BlockSpec((9 * cin, cout), const2),         # conv weight (resident)
    ]
    args = [inp, inp, inp, w_mat]
    if bias is not None:
        in_specs.append(pl.BlockSpec((1, cout), const2))
        args.append(bias)
    if pre_act:
        in_specs += [pl.BlockSpec((1, cout), const2),  # prev-stage BN scale
                     pl.BlockSpec((1, cout), const2)]  # prev-stage BN shift
        args += [scale, shift]

    kernel = functools.partial(_conv_stats_kernel, bh=bh, width=width,
                               pre_act=pre_act, add_bias=bias is not None)

    y, stats = pl.pallas_call(
        kernel,
        grid=(n, nblk),
        in_specs=in_specs,
        out_specs=(
            pl.BlockSpec((1, bh, width, cout), cur_map),
            pl.BlockSpec((1, 1, 2, cout), lambda b, i: (b, i, 0, 0)),
        ),
        out_shape=(
            jax.ShapeDtypeStruct((n, h, width, cout), jnp.float32),
            jax.ShapeDtypeStruct((n, nblk, 2, cout), jnp.float32),
        ),
        compiler_params=pltpu.CompilerParams(
            dimension_semantics=("parallel", "parallel"),
            vmem_limit_bytes=VMEM_LIMIT),
    )(*args)
    return y, stats


def _bn_affine_from_stats(stats, gamma, beta, count):
    """Chan-combine per-block (sum, centered ssq) -> per-channel scale/shift."""
    bsum = stats[:, :, 0, :]                     # (N, nblk, C)
    cssq = stats[:, :, 1, :]
    total = stats.shape[0] * stats.shape[1] * count
    mean = jnp.sum(bsum, axis=(0, 1)) / total    # (C,)
    bmean = bsum / count
    var = (jnp.sum(cssq, axis=(0, 1)) +
           count * jnp.sum((bmean - mean) ** 2, axis=(0, 1))) / total  # biased
    scale = gamma.reshape(-1) * jax.lax.rsqrt(var + EPS)
    shift = beta.reshape(-1) - mean * scale
    return scale.reshape(1, -1), shift.reshape(1, -1)


def residule_block(x_nchw, params):
    """Forward of ResiduleBlock (training-mode BatchNorm). x: (N, C, H, W) f32."""
    x = jnp.transpose(x_nchw, (0, 2, 3, 1)).astype(jnp.float32)   # NHWC
    n, h, width, cin = x.shape
    cout = params["w1"].shape[-1]
    assert cin == cout, "residual add requires in_dim == out_dim"

    w1 = params["w1"].reshape(9 * cin, cout)      # taps folded into K
    w2 = params["w2"].reshape(9 * cout, cout)
    bh = _pick_row_block(h, width, max(cin, cout))
    count = bh * width

    # Stage 1: pad -> conv1(no bias); BN1 stats returned as per-block partials.
    y1, stats1 = _conv_stage(x, w1, bias=None, scale=None, shift=None,
                             pre_act=False, bh=bh)
    scale1, shift1 = _bn_affine_from_stats(stats1, params["gamma1"],
                                           params["beta1"], count)

    # Stage 2: BN1 affine + ReLU on the fly -> pad -> conv2(+bias); BN2 stats.
    y2, stats2 = _conv_stage(y1, w2, bias=params["bias2"], scale=scale1,
                             shift=shift1, pre_act=True, bh=bh)
    scale2, shift2 = _bn_affine_from_stats(stats2, params["gamma2"],
                                           params["beta2"], count)

    # Stage 3: lane-dense finalize  out = x + BN2(y2)  (W folded into lanes).
    rows, lanes = n * h, width * cout
    br = _pick_flat_rows(rows, lanes)
    out2d = pl.pallas_call(
        _residual_affine_kernel,
        grid=(rows // br,),
        in_specs=[
            pl.BlockSpec((br, lanes), lambda i: (i, 0)),
            pl.BlockSpec((br, lanes), lambda i: (i, 0)),
            pl.BlockSpec((1, lanes), lambda i: (0, 0)),
            pl.BlockSpec((1, lanes), lambda i: (0, 0)),
        ],
        out_specs=pl.BlockSpec((br, lanes), lambda i: (i, 0)),
        out_shape=jax.ShapeDtypeStruct((rows, lanes), jnp.float32),
        compiler_params=pltpu.CompilerParams(
            dimension_semantics=("parallel",),
            vmem_limit_bytes=VMEM_LIMIT),
    )(x.reshape(rows, lanes), y2.reshape(rows, lanes),
      jnp.tile(scale2, (1, width)), jnp.tile(shift2, (1, width)))

    out = out2d.reshape(n, h, width, cout)
    return jnp.transpose(out, (0, 3, 1, 2))               # back to NCHW


# ---------------- pure-JAX reference (for verification) ----------------
def _reflect_pad1(x_nhwc):
    return jnp.pad(x_nhwc, ((0, 0), (1, 1), (1, 1), (0, 0)), mode="reflect")


def _bn_train_ref(y, gamma, beta):
    mu = jnp.mean(y, axis=(0, 1, 2), keepdims=True)
    var = jnp.mean((y - mu) ** 2, axis=(0, 1, 2), keepdims=True)
    return (y - mu) * jax.lax.rsqrt(var + EPS) * gamma.reshape(1, 1, 1, -1) \
        + beta.reshape(1, 1, 1, -1)


def residule_block_ref(x_nchw, params):
    x = jnp.transpose(x_nchw, (0, 2, 3, 1)).astype(jnp.float32)
    cin = x.shape[-1]
    cout = params["w1"].shape[-1]
    dn = jax.lax.conv_dimension_numbers(x.shape, (3, 3, cin, cout),
                                        ("NHWC", "HWIO", "NHWC"))
    w1 = params["w1"].reshape(3, 3, cin, cout)
    w2 = params["w2"].reshape(3, 3, cout, cout)

    y = jax.lax.conv_general_dilated(_reflect_pad1(x), w1, (1, 1), "VALID",
                                     dimension_numbers=dn)
    y = jnp.maximum(_bn_train_ref(y, params["gamma1"], params["beta1"]), 0.0)
    y = jax.lax.conv_general_dilated(_reflect_pad1(y), w2, (1, 1), "VALID",
                                     dimension_numbers=dn)
    y = y + params["bias2"].reshape(1, 1, 1, -1)
    y = _bn_train_ref(y, params["gamma2"], params["beta2"])
    return jnp.transpose(x + y, (0, 3, 1, 2))


def make_params(key, in_dim, out_dim):
    ks = jax.random.split(key, 7)
    scale1 = 1.0 / jnp.sqrt(in_dim * 9.0)
    scale2 = 1.0 / jnp.sqrt(out_dim * 9.0)
    return {
        # conv weights stored tap-major: (kh*kw, Cin, Cout)
        "w1": jax.random.uniform(ks[0], (9, in_dim, out_dim), jnp.float32,
                                 -scale1, scale1),
        "gamma1": 1.0 + 0.1 * jax.random.normal(ks[1], (1, out_dim), jnp.float32),
        "beta1": 0.1 * jax.random.normal(ks[2], (1, out_dim), jnp.float32),
        "w2": jax.random.uniform(ks[3], (9, out_dim, out_dim), jnp.float32,
                                 -scale2, scale2),
        "bias2": jax.random.uniform(ks[4], (1, out_dim), jnp.float32,
                                    -scale2, scale2),
        "gamma2": 1.0 + 0.1 * jax.random.normal(ks[5], (1, out_dim), jnp.float32),
        "beta2": 0.1 * jax.random.normal(ks[6], (1, out_dim), jnp.float32),
    }


if __name__ == "__main__":
    N, C, H, W = 2, 8, 16, 16          # residual requires in_dim == out_dim
    key = jax.random.PRNGKey(0)
    kx, kp = jax.random.split(key)
    x = jax.random.normal(kx, (N, C, H, W), jnp.float32)
    params = make_params(kp, C, C)

    out = jax.block_until_ready(jax.jit(residule_block)(x, params))
    ref = jax.block_until_ready(residule_block_ref(x, params))

    assert out.shape == (N, C, H, W) and out.dtype == jnp.float32
    err = float(jnp.max(jnp.abs(out - ref)))
    assert err < 5e-3, f"mismatch vs reference: {err}"
    print("KERNEL_OK")
</pallas_src>

<mosaic_0001>
module attributes {stable_mosaic.version = 11 : i64} {
  func.func @_conv_stats_kernel(%arg0: i32, %arg1: i32, %arg2: memref<1x1x16x8xf32, #tpu.memory_space<vmem>>, %arg3: memref<1x16x16x8xf32, #tpu.memory_space<vmem>>, %arg4: memref<1x1x16x8xf32, #tpu.memory_space<vmem>>, %arg5: memref<72x8xf32, #tpu.memory_space<vmem>>, %arg6: memref<1x16x16x8xf32, #tpu.memory_space<vmem>>, %arg7: memref<1x1x2x8xf32, #tpu.memory_space<vmem>>) attributes {dimension_semantics = [#tpu.dimension_semantics<parallel>, #tpu.dimension_semantics<parallel>], iteration_bounds = array<i64: 2, 1>, scalar_prefetch = 0 : i64, scratch_operands = 0 : i64, tpu.core_type = #tpu.core_type<tc>, window_params = [{transform_indices = @transform_0, window_bounds = array<i64: 1, 1, 16, 8>}, {transform_indices = @transform_1, window_bounds = array<i64: 1, 16, 16, 8>}, {transform_indices = @transform_2, window_bounds = array<i64: 1, 1, 16, 8>}, {pipeline_mode = #tpu.pipeline_mode<synchronous>, transform_indices = @transform_3, window_bounds = array<i64: 72, 8>}, {transform_indices = @transform_4, window_bounds = array<i64: 1, 16, 16, 8>}, {transform_indices = @transform_5, window_bounds = array<i64: 1, 1, 2, 8>}]} {
    %c0 = arith.constant 0 : index
    %c0_0 = arith.constant 0 : index
    %c0_1 = arith.constant 0 : index
    %c0_2 = arith.constant 0 : index
    %0 = vector.load %arg2[%c0, %c0_0, %c0_1, %c0_2] : memref<1x1x16x8xf32, #tpu.memory_space<vmem>>, vector<1x1x16x8xf32>
    %1 = vector.shape_cast %0 : vector<1x1x16x8xf32> to vector<1x16x8xf32>
    %c0_3 = arith.constant 0 : index
    %c0_4 = arith.constant 0 : index
    %c0_5 = arith.constant 0 : index
    %c0_6 = arith.constant 0 : index
    %2 = vector.load %arg3[%c0_3, %c0_4, %c0_5, %c0_6] : memref<1x16x16x8xf32, #tpu.memory_space<vmem>>, vector<1x16x16x8xf32>
    %3 = vector.shape_cast %2 : vector<1x16x16x8xf32> to vector<16x16x8xf32>
    %c0_7 = arith.constant 0 : index
    %c0_8 = arith.constant 0 : index
    %c0_9 = arith.constant 0 : index
    %c0_10 = arith.constant 0 : index
    %4 = vector.load %arg4[%c0_7, %c0_8, %c0_9, %c0_10] : memref<1x1x16x8xf32, #tpu.memory_space<vmem>>, vector<1x1x16x8xf32>
    %5 = vector.shape_cast %4 : vector<1x1x16x8xf32> to vector<1x16x8xf32>
    %6 = tpu.concatenate %1, %3, %5 in 0 : vector<1x16x8xf32>, vector<16x16x8xf32>, vector<1x16x8xf32> -> vector<18x16x8xf32>
    %7 = vector.extract_strided_slice %6 {offsets = [0, 1, 0], sizes = [18, 1, 8], strides = [1, 1, 1]} : vector<18x16x8xf32> to vector<18x1x8xf32>
    %8 = vector.extract_strided_slice %6 {offsets = [0, 14, 0], sizes = [18, 1, 8], strides = [1, 1, 1]} : vector<18x16x8xf32> to vector<18x1x8xf32>
    %9 = tpu.concatenate %7, %6, %8 in 1 : vector<18x1x8xf32>, vector<18x16x8xf32>, vector<18x1x8xf32> -> vector<18x18x8xf32>
    %10 = vector.extract_strided_slice %9 {offsets = [0, 0, 0], sizes = [16, 16, 8], strides = [1, 1, 1]} : vector<18x18x8xf32> to vector<16x16x8xf32>
    %11 = vector.extract_strided_slice %9 {offsets = [0, 1, 0], sizes = [16, 16, 8], strides = [1, 1, 1]} : vector<18x18x8xf32> to vector<16x16x8xf32>
    %12 = vector.extract_strided_slice %9 {offsets = [0, 2, 0], sizes = [16, 16, 8], strides = [1, 1, 1]} : vector<18x18x8xf32> to vector<16x16x8xf32>
    %13 = vector.extract_strided_slice %9 {offsets = [1, 0, 0], sizes = [16, 16, 8], strides = [1, 1, 1]} : vector<18x18x8xf32> to vector<16x16x8xf32>
    %14 = vector.extract_strided_slice %9 {offsets = [1, 1, 0], sizes = [16, 16, 8], strides = [1, 1, 1]} : vector<18x18x8xf32> to vector<16x16x8xf32>
    %15 = vector.extract_strided_slice %9 {offsets = [1, 2, 0], sizes = [16, 16, 8], strides = [1, 1, 1]} : vector<18x18x8xf32> to vector<16x16x8xf32>
    %16 = vector.extract_strided_slice %9 {offsets = [2, 0, 0], sizes = [16, 16, 8], strides = [1, 1, 1]} : vector<18x18x8xf32> to vector<16x16x8xf32>
    %17 = vector.extract_strided_slice %9 {offsets = [2, 1, 0], sizes = [16, 16, 8], strides = [1, 1, 1]} : vector<18x18x8xf32> to vector<16x16x8xf32>
    %18 = vector.extract_strided_slice %9 {offsets = [2, 2, 0], sizes = [16, 16, 8], strides = [1, 1, 1]} : vector<18x18x8xf32> to vector<16x16x8xf32>
    %19 = tpu.concatenate %10, %11, %12, %13, %14, %15, %16, %17, %18 in 2 : vector<16x16x8xf32>, vector<16x16x8xf32>, vector<16x16x8xf32>, vector<16x16x8xf32>, vector<16x16x8xf32>, vector<16x16x8xf32>, vector<16x16x8xf32>, vector<16x16x8xf32>, vector<16x16x8xf32> -> vector<16x16x72xf32>
    %20 = vector.shape_cast %19 : vector<16x16x72xf32> to vector<256x72xf32>
    %c0_11 = arith.constant 0 : index
    %c0_12 = arith.constant 0 : index
    %21 = vector.load %arg5[%c0_11, %c0_12] : memref<72x8xf32, #tpu.memory_space<vmem>>, vector<72x8xf32>
    %cst = arith.constant dense<0.000000e+00> : vector<256x8xf32>
    %22 = tpu.matmul %20, %21, %cst {dimension_numbers = #tpu.dot_dimension_numbers<[1], [0], [0], [1], [0, 0, 1, 1], [], []>} : vector<256x72xf32>, vector<72x8xf32>, vector<256x8xf32> -> vector<256x8xf32>
    %cst_13 = arith.constant dense<0.000000e+00> : vector<8xf32>
    %23 = vector.multi_reduction <add>, %22, %cst_13 [0] : vector<256x8xf32> to vector<8xf32>
    %24 = vector.shape_cast %23 : vector<8xf32> to vector<1x8xf32>
    %cst_14 = arith.constant 3.906250e-03 : f32
    %25 = vector.broadcast %cst_14 : f32 to vector<1x8xf32>
    %26 = arith.mulf %24, %25 : vector<1x8xf32>
    %27 = vector.broadcast %26 : vector<1x8xf32> to vector<256x8xf32>
    %28 = arith.subf %22, %27 : vector<256x8xf32>
    %29 = arith.mulf %28, %28 : vector<256x8xf32>
    %cst_15 = arith.constant dense<0.000000e+00> : vector<8xf32>
    %30 = vector.multi_reduction <add>, %29, %cst_15 [0] : vector<256x8xf32> to vector<8xf32>
    %31 = vector.shape_cast %30 : vector<8xf32> to vector<1x8xf32>
    %32 = vector.shape_cast %22 : vector<256x8xf32> to vector<1x16x16x8xf32>
    %c0_16 = arith.constant 0 : index
    %c0_17 = arith.constant 0 : index
    %c0_18 = arith.constant 0 : index
    %c0_19 = arith.constant 0 : index
    %33 = vector.load %arg6[%c0_16, %c0_17, %c0_18, %c0_19] : memref<1x16x16x8xf32, #tpu.memory_space<vmem>>, vector<1x16x16x8xf32>
    tpu.vector_store %arg6[%c0_16, %c0_17, %c0_18, %c0_19], %32 {strides = array<i32>} : memref<1x16x16x8xf32, #tpu.memory_space<vmem>>, vector<1x16x16x8xf32>,
    %34 = tpu.concatenate %24, %31 in 0 : vector<1x8xf32>, vector<1x8xf32> -> vector<2x8xf32>
    %35 = vector.shape_cast %34 : vector<2x8xf32> to vector<1x1x2x8xf32>
    %c0_20 = arith.constant 0 : index
    %c0_21 = arith.constant 0 : index
    %c0_22 = arith.constant 0 : index
    %c0_23 = arith.constant 0 : index
    %36 = vector.load %arg7[%c0_20, %c0_21, %c0_22, %c0_23] : memref<1x1x2x8xf32, #tpu.memory_space<vmem>>, vector<1x1x2x8xf32>
    tpu.vector_store %arg7[%c0_20, %c0_21, %c0_22, %c0_23], %35 {strides = array<i32>} : memref<1x1x2x8xf32, #tpu.memory_space<vmem>>, vector<1x1x2x8xf32>,
    return
  }
  func.func @transform_0(%arg0: i32, %arg1: i32) -> (i32, i32, i32, i32) {
    %c0_i32 = arith.constant 0 : i32
    %0 = arith.cmpi eq, %arg1, %c0_i32 : i32
    %c16_i32 = arith.constant 16 : i32
    %1 = arith.muli %arg1, %c16_i32 : i32
    %c1_i32 = arith.constant 1 : i32
    %2 = arith.subi %1, %c1_i32 : i32
    %c1_i32_0 = arith.constant 1 : i32
    %3 = arith.select %0, %c1_i32_0, %2 : i32
    %c0_i32_1 = arith.constant 0 : i32
    %c0_i32_2 = arith.constant 0 : i32
    %c0_i32_3 = arith.constant 0 : i32
    return %arg0, %3, %c0_i32_1, %c0_i32_2 : i32, i32, i32, i32
  }
  func.func @transform_1(%arg0: i32, %arg1: i32) -> (i32, i32, i32, i32) {
    %c0_i32 = arith.constant 0 : i32
    %c0_i32_0 = arith.constant 0 : i32
    %c0_i32_1 = arith.constant 0 : i32
    return %arg0, %arg1, %c0_i32, %c0_i32_0 : i32, i32, i32, i32
  }
  func.func @transform_2(%arg0: i32, %arg1: i32) -> (i32, i32, i32, i32) {
    %c0_i32 = arith.constant 0 : i32
    %0 = arith.cmpi eq, %arg1, %c0_i32 : i32
    %c1_i32 = arith.constant 1 : i32
    %1 = arith.addi %arg1, %c1_i32 : i32
    %c16_i32 = arith.constant 16 : i32
    %2 = arith.muli %1, %c16_i32 : i32
    %c14_i32 = arith.constant 14 : i32
    %3 = arith.select %0, %c14_i32, %2 : i32
    %c0_i32_0 = arith.constant 0 : i32
    %c0_i32_1 = arith.constant 0 : i32
    %c0_i32_2 = arith.constant 0 : i32
    return %arg0, %3, %c0_i32_0, %c0_i32_1 : i32, i32, i32, i32
  }
  func.func @transform_3(%arg0: i32, %arg1: i32) -> (i32, i32) {
    %c0_i32 = arith.constant 0 : i32
    %c0_i32_0 = arith.constant 0 : i32
    %c0_i32_1 = arith.constant 0 : i32
    return %c0_i32, %c0_i32_0 : i32, i32
  }
  func.func @transform_4(%arg0: i32, %arg1: i32) -> (i32, i32, i32, i32) {
    %c0_i32 = arith.constant 0 : i32
    %c0_i32_0 = arith.constant 0 : i32
    %c0_i32_1 = arith.constant 0 : i32
    return %arg0, %arg1, %c0_i32, %c0_i32_0 : i32, i32, i32, i32
  }
  func.func @transform_5(%arg0: i32, %arg1: i32) -> (i32, i32, i32, i32) {
    %c0_i32 = arith.constant 0 : i32
    %c0_i32_0 = arith.constant 0 : i32
    %c0_i32_1 = arith.constant 0 : i32
    return %arg0, %arg1, %c0_i32, %c0_i32_0 : i32, i32, i32, i32
  }
}

module attributes {stable_mosaic.version = 11 : i64} {
  func.func @_conv_stats_kernel(%arg0: i32, %arg1: i32, %arg2: memref<1x1x16x8xf32, #tpu.memory_space<vmem>>, %arg3: memref<1x16x16x8xf32, #tpu.memory_space<vmem>>, %arg4: memref<1x1x16x8xf32, #tpu.memory_space<vmem>>, %arg5: memref<72x8xf32, #tpu.memory_space<vmem>>, %arg6: memref<1x8xf32, #tpu.memory_space<vmem>>, %arg7: memref<1x8xf32, #tpu.memory_space<vmem>>, %arg8: memref<1x8xf32, #tpu.memory_space<vmem>>, %arg9: memref<1x16x16x8xf32, #tpu.memory_space<vmem>>, %arg10: memref<1x1x2x8xf32, #tpu.memory_space<vmem>>) attributes {dimension_semantics = [#tpu.dimension_semantics<parallel>, #tpu.dimension_semantics<parallel>], iteration_bounds = array<i64: 2, 1>, scalar_prefetch = 0 : i64, scratch_operands = 0 : i64, tpu.core_type = #tpu.core_type<tc>, window_params = [{transform_indices = @transform_0, window_bounds = array<i64: 1, 1, 16, 8>}, {transform_indices = @transform_1, window_bounds = array<i64: 1, 16, 16, 8>}, {transform_indices = @transform_2, window_bounds = array<i64: 1, 1, 16, 8>}, {pipeline_mode = #tpu.pipeline_mode<synchronous>, transform_indices = @transform_3, window_bounds = array<i64: 72, 8>}, {pipeline_mode = #tpu.pipeline_mode<synchronous>, transform_indices = @transform_4, window_bounds = array<i64: 1, 8>}, {pipeline_mode = #tpu.pipeline_mode<synchronous>, transform_indices = @transform_5, window_bounds = array<i64: 1, 8>}, {pipeline_mode = #tpu.pipeline_mode<synchronous>, transform_indices = @transform_6, window_bounds = array<i64: 1, 8>}, {transform_indices = @transform_7, window_bounds = array<i64: 1, 16, 16, 8>}, {transform_indices = @transform_8, window_bounds = array<i64: 1, 1, 2, 8>}]} {
    %c0 = arith.constant 0 : index
    %c0_0 = arith.constant 0 : index
    %c0_1 = arith.constant 0 : index
    %c0_2 = arith.constant 0 : index
    %0 = vector.load %arg2[%c0, %c0_0, %c0_1, %c0_2] : memref<1x1x16x8xf32, #tpu.memory_space<vmem>>, vector<1x1x16x8xf32>
    %1 = vector.shape_cast %0 : vector<1x1x16x8xf32> to vector<1x16x8xf32>
    %c0_3 = arith.constant 0 : index
    %c0_4 = arith.constant 0 : index
    %c0_5 = arith.constant 0 : index
    %c0_6 = arith.constant 0 : index
    %2 = vector.load %arg3[%c0_3, %c0_4, %c0_5, %c0_6] : memref<1x16x16x8xf32, #tpu.memory_space<vmem>>, vector<1x16x16x8xf32>
    %3 = vector.shape_cast %2 : vector<1x16x16x8xf32> to vector<16x16x8xf32>
    %c0_7 = arith.constant 0 : index
    %c0_8 = arith.constant 0 : index
    %c0_9 = arith.constant 0 : index
    %c0_10 = arith.constant 0 : index
    %4 = vector.load %arg4[%c0_7, %c0_8, %c0_9, %c0_10] : memref<1x1x16x8xf32, #tpu.memory_space<vmem>>, vector<1x1x16x8xf32>
    %5 = vector.shape_cast %4 : vector<1x1x16x8xf32> to vector<1x16x8xf32>
    %6 = tpu.concatenate %1, %3, %5 in 0 : vector<1x16x8xf32>, vector<16x16x8xf32>, vector<1x16x8xf32> -> vector<18x16x8xf32>
    %c0_11 = arith.constant 0 : index
    %c0_12 = arith.constant 0 : index
    %7 = vector.load %arg7[%c0_11, %c0_12] : memref<1x8xf32, #tpu.memory_space<vmem>>, vector<1x8xf32>
    %8 = vector.shape_cast %7 : vector<1x8xf32> to vector<1x1x8xf32>
    %9 = vector.broadcast %8 : vector<1x1x8xf32> to vector<18x16x8xf32>
    %10 = arith.mulf %6, %9 : vector<18x16x8xf32>
    %c0_13 = arith.constant 0 : index
    %c0_14 = arith.constant 0 : index
    %11 = vector.load %arg8[%c0_13, %c0_14] : memref<1x8xf32, #tpu.memory_space<vmem>>, vector<1x8xf32>
    %12 = vector.shape_cast %11 : vector<1x8xf32> to vector<1x1x8xf32>
    %13 = vector.broadcast %12 : vector<1x1x8xf32> to vector<18x16x8xf32>
    %14 = arith.addf %10, %13 : vector<18x16x8xf32>
    %cst = arith.constant 0.000000e+00 : f32
    %15 = vector.broadcast %cst : f32 to vector<18x16x8xf32>
    %16 = arith.maximumf %14, %15 : vector<18x16x8xf32>
    %17 = vector.extract_strided_slice %16 {offsets = [0, 1, 0], sizes = [18, 1, 8], strides = [1, 1, 1]} : vector<18x16x8xf32> to vector<18x1x8xf32>
    %18 = vector.extract_strided_slice %16 {offsets = [0, 14, 0], sizes = [18, 1, 8], strides = [1, 1, 1]} : vector<18x16x8xf32> to vector<18x1x8xf32>
    %19 = tpu.concatenate %17, %16, %18 in 1 : vector<18x1x8xf32>, vector<18x16x8xf32>, vector<18x1x8xf32> -> vector<18x18x8xf32>
    %20 = vector.extract_strided_slice %19 {offsets = [0, 0, 0], sizes = [16, 16, 8], strides = [1, 1, 1]} : vector<18x18x8xf32> to vector<16x16x8xf32>
    %21 = vector.extract_strided_slice %19 {offsets = [0, 1, 0], sizes = [16, 16, 8], strides = [1, 1, 1]} : vector<18x18x8xf32> to vector<16x16x8xf32>
    %22 = vector.extract_strided_slice %19 {offsets = [0, 2, 0], sizes = [16, 16, 8], strides = [1, 1, 1]} : vector<18x18x8xf32> to vector<16x16x8xf32>
    %23 = vector.extract_strided_slice %19 {offsets = [1, 0, 0], sizes = [16, 16, 8], strides = [1, 1, 1]} : vector<18x18x8xf32> to vector<16x16x8xf32>
    %24 = vector.extract_strided_slice %19 {offsets = [1, 1, 0], sizes = [16, 16, 8], strides = [1, 1, 1]} : vector<18x18x8xf32> to vector<16x16x8xf32>
    %25 = vector.extract_strided_slice %19 {offsets = [1, 2, 0], sizes = [16, 16, 8], strides = [1, 1, 1]} : vector<18x18x8xf32> to vector<16x16x8xf32>
    %26 = vector.extract_strided_slice %19 {offsets = [2, 0, 0], sizes = [16, 16, 8], strides = [1, 1, 1]} : vector<18x18x8xf32> to vector<16x16x8xf32>
    %27 = vector.extract_strided_slice %19 {offsets = [2, 1, 0], sizes = [16, 16, 8], strides = [1, 1, 1]} : vector<18x18x8xf32> to vector<16x16x8xf32>
    %28 = vector.extract_strided_slice %19 {offsets = [2, 2, 0], sizes = [16, 16, 8], strides = [1, 1, 1]} : vector<18x18x8xf32> to vector<16x16x8xf32>
    %29 = tpu.concatenate %20, %21, %22, %23, %24, %25, %26, %27, %28 in 2 : vector<16x16x8xf32>, vector<16x16x8xf32>, vector<16x16x8xf32>, vector<16x16x8xf32>, vector<16x16x8xf32>, vector<16x16x8xf32>, vector<16x16x8xf32>, vector<16x16x8xf32>, vector<16x16x8xf32> -> vector<16x16x72xf32>
    %30 = vector.shape_cast %29 : vector<16x16x72xf32> to vector<256x72xf32>
    %c0_15 = arith.constant 0 : index
    %c0_16 = arith.constant 0 : index
    %31 = vector.load %arg5[%c0_15, %c0_16] : memref<72x8xf32, #tpu.memory_space<vmem>>, vector<72x8xf32>
    %cst_17 = arith.constant dense<0.000000e+00> : vector<256x8xf32>
    %32 = tpu.matmul %30, %31, %cst_17 {dimension_numbers = #tpu.dot_dimension_numbers<[1], [0], [0], [1], [0, 0, 1, 1], [], []>} : vector<256x72xf32>, vector<72x8xf32>, vector<256x8xf32> -> vector<256x8xf32>
    %c0_18 = arith.constant 0 : index
    %c0_19 = arith.constant 0 : index
    %33 = vector.load %arg6[%c0_18, %c0_19] : memref<1x8xf32, #tpu.memory_space<vmem>>, vector<1x8xf32>
    %34 = vector.broadcast %33 : vector<1x8xf32> to vector<256x8xf32>
    %35 = arith.addf %32, %34 : vector<256x8xf32>
    %cst_20 = arith.constant dense<0.000000e+00> : vector<8xf32>
    %36 = vector.multi_reduction <add>, %35, %cst_20 [0] : vector<256x8xf32> to vector<8xf32>
    %37 = vector.shape_cast %36 : vector<8xf32> to vector<1x8xf32>
    %cst_21 = arith.constant 3.906250e-03 : f32
    %38 = vector.broadcast %cst_21 : f32 to vector<1x8xf32>
    %39 = arith.mulf %37, %38 : vector<1x8xf32>
    %40 = vector.broadcast %39 : vector<1x8xf32> to vector<256x8xf32>
    %41 = arith.subf %35, %40 : vector<256x8xf32>
    %42 = arith.mulf %41, %41 : vector<256x8xf32>
    %cst_22 = arith.constant dense<0.000000e+00> : vector<8xf32>
    %43 = vector.multi_reduction <add>, %42, %cst_22 [0] : vector<256x8xf32> to vector<8xf32>
    %44 = vector.shape_cast %43 : vector<8xf32> to vector<1x8xf32>
    %45 = vector.shape_cast %35 : vector<256x8xf32> to vector<1x16x16x8xf32>
    %c0_23 = arith.constant 0 : index
    %c0_24 = arith.constant 0 : index
    %c0_25 = arith.constant 0 : index
    %c0_26 = arith.constant 0 : index
    %46 = vector.load %arg9[%c0_23, %c0_24, %c0_25, %c0_26] : memref<1x16x16x8xf32, #tpu.memory_space<vmem>>, vector<1x16x16x8xf32>
    tpu.vector_store %arg9[%c0_23, %c0_24, %c0_25, %c0_26], %45 {strides = array<i32>} : memref<1x16x16x8xf32, #tpu.memory_space<vmem>>, vector<1x16x16x8xf32>,
    %47 = tpu.concatenate %37, %44 in 0 : vector<1x8xf32>, vector<1x8xf32> -> vector<2x8xf32>
    %48 = vector.shape_cast %47 : vector<2x8xf32> to vector<1x1x2x8xf32>
    %c0_27 = arith.constant 0 : index
    %c0_28 = arith.constant 0 : index
    %c0_29 = arith.constant 0 : index
    %c0_30 = arith.constant 0 : index
    %49 = vector.load %arg10[%c0_27, %c0_28, %c0_29, %c0_30] : memref<1x1x2x8xf32, #tpu.memory_space<vmem>>, vector<1x1x2x8xf32>
    tpu.vector_store %arg10[%c0_27, %c0_28, %c0_29, %c0_30], %48 {strides = array<i32>} : memref<1x1x2x8xf32, #tpu.memory_space<vmem>>, vector<1x1x2x8xf32>,
    return
  }
  func.func @transform_0(%arg0: i32, %arg1: i32) -> (i32, i32, i32, i32) {
    %c0_i32 = arith.constant 0 : i32
    %0 = arith.cmpi eq, %arg1, %c0_i32 : i32
    %c16_i32 = arith.constant 16 : i32
    %1 = arith.muli %arg1, %c16_i32 : i32
    %c1_i32 = arith.constant 1 : i32
    %2 = arith.subi %1, %c1_i32 : i32
    %c1_i32_0 = arith.constant 1 : i32
    %3 = arith.select %0, %c1_i32_0, %2 : i32
    %c0_i32_1 = arith.constant 0 : i32
    %c0_i32_2 = arith.constant 0 : i32
    %c0_i32_3 = arith.constant 0 : i32
    return %arg0, %3, %c0_i32_1, %c0_i32_2 : i32, i32, i32, i32
  }
  func.func @transform_1(%arg0: i32, %arg1: i32) -> (i32, i32, i32, i32) {
    %c0_i32 = arith.constant 0 : i32
    %c0_i32_0 = arith.constant 0 : i32
    %c0_i32_1 = arith.constant 0 : i32
    return %arg0, %arg1, %c0_i32, %c0_i32_0 : i32, i32, i32, i32
  }
  func.func @transform_2(%arg0: i32, %arg1: i32) -> (i32, i32, i32, i32) {
    %c0_i32 = arith.constant 0 : i32
    %0 = arith.cmpi eq, %arg1, %c0_i32 : i32
    %c1_i32 = arith.constant 1 : i32
    %1 = arith.addi %arg1, %c1_i32 : i32
    %c16_i32 = arith.constant 16 : i32
    %2 = arith.muli %1, %c16_i32 : i32
    %c14_i32 = arith.constant 14 : i32
    %3 = arith.select %0, %c14_i32, %2 : i32
    %c0_i32_0 = arith.constant 0 : i32
    %c0_i32_1 = arith.constant 0 : i32
    %c0_i32_2 = arith.constant 0 : i32
    return %arg0, %3, %c0_i32_0, %c0_i32_1 : i32, i32, i32, i32
  }
  func.func @transform_3(%arg0: i32, %arg1: i32) -> (i32, i32) {
    %c0_i32 = arith.constant 0 : i32
    %c0_i32_0 = arith.constant 0 : i32
    %c0_i32_1 = arith.constant 0 : i32
    return %c0_i32, %c0_i32_0 : i32, i32
  }
  func.func @transform_4(%arg0: i32, %arg1: i32) -> (i32, i32) {
    %c0_i32 = arith.constant 0 : i32
    %c0_i32_0 = arith.constant 0 : i32
    %c0_i32_1 = arith.constant 0 : i32
    return %c0_i32, %c0_i32_0 : i32, i32
  }
  func.func @transform_5(%arg0: i32, %arg1: i32) -> (i32, i32) {
    %c0_i32 = arith.constant 0 : i32
    %c0_i32_0 = arith.constant 0 : i32
    %c0_i32_1 = arith.constant 0 : i32
    return %c0_i32, %c0_i32_0 : i32, i32
  }
  func.func @transform_6(%arg0: i32, %arg1: i32) -> (i32, i32) {
    %c0_i32 = arith.constant 0 : i32
    %c0_i32_0 = arith.constant 0 : i32
    %c0_i32_1 = arith.constant 0 : i32
    return %c0_i32, %c0_i32_0 : i32, i32
  }
  func.func @transform_7(%arg0: i32, %arg1: i32) -> (i32, i32, i32, i32) {
    %c0_i32 = arith.constant 0 : i32
    %c0_i32_0 = arith.constant 0 : i32
    %c0_i32_1 = arith.constant 0 : i32
    return %arg0, %arg1, %c0_i32, %c0_i32_0 : i32, i32, i32, i32
  }
  func.func @transform_8(%arg0: i32, %arg1: i32) -> (i32, i32, i32, i32) {
    %c0_i32 = arith.constant 0 : i32
    %c0_i32_0 = arith.constant 0 : i32
    %c0_i32_1 = arith.constant 0 : i32
    return %arg0, %arg1, %c0_i32, %c0_i32_0 : i32, i32, i32, i32
  }
}

module attributes {stable_mosaic.version = 11 : i64} {
  func.func @_residual_affine_kernel(%arg0: i32, %arg1: memref<32x128xf32, #tpu.memory_space<vmem>>, %arg2: memref<32x128xf32, #tpu.memory_space<vmem>>, %arg3: memref<1x128xf32, #tpu.memory_space<vmem>>, %arg4: memref<1x128xf32, #tpu.memory_space<vmem>>, %arg5: memref<32x128xf32, #tpu.memory_space<vmem>>) attributes {dimension_semantics = [#tpu.dimension_semantics<parallel>], iteration_bounds = array<i64: 1>, scalar_prefetch = 0 : i64, scratch_operands = 0 : i64, tpu.core_type = #tpu.core_type<tc>, window_params = [{transform_indices = @transform_0, window_bounds = array<i64: 32, 128>}, {transform_indices = @transform_1, window_bounds = array<i64: 32, 128>}, {pipeline_mode = #tpu.pipeline_mode<synchronous>, transform_indices = @transform_2, window_bounds = array<i64: 1, 128>}, {pipeline_mode = #tpu.pipeline_mode<synchronous>, transform_indices = @transform_3, window_bounds = array<i64: 1, 128>}, {transform_indices = @transform_4, window_bounds = array<i64: 32, 128>}]} {
    %c0 = arith.constant 0 : index
    %c0_0 = arith.constant 0 : index
    %0 = vector.load %arg1[%c0, %c0_0] : memref<32x128xf32, #tpu.memory_space<vmem>>, vector<32x128xf32>
    %c0_1 = arith.constant 0 : index
    %c0_2 = arith.constant 0 : index
    %1 = vector.load %arg2[%c0_1, %c0_2] : memref<32x128xf32, #tpu.memory_space<vmem>>, vector<32x128xf32>
    %c0_3 = arith.constant 0 : index
    %c0_4 = arith.constant 0 : index
    %2 = vector.load %arg3[%c0_3, %c0_4] : memref<1x128xf32, #tpu.memory_space<vmem>>, vector<1x128xf32>
    %3 = vector.broadcast %2 : vector<1x128xf32> to vector<32x128xf32>
    %4 = arith.mulf %1, %3 : vector<32x128xf32>
    %5 = arith.addf %0, %4 : vector<32x128xf32>
    %c0_5 = arith.constant 0 : index
    %c0_6 = arith.constant 0 : index
    %6 = vector.load %arg4[%c0_5, %c0_6] : memref<1x128xf32, #tpu.memory_space<vmem>>, vector<1x128xf32>
    %7 = vector.broadcast %6 : vector<1x128xf32> to vector<32x128xf32>
    %8 = arith.addf %5, %7 : vector<32x128xf32>
    %c0_7 = arith.constant 0 : index
    %c0_8 = arith.constant 0 : index
    %9 = vector.load %arg5[%c0_7, %c0_8] : memref<32x128xf32, #tpu.memory_space<vmem>>, vector<32x128xf32>
    tpu.vector_store %arg5[%c0_7, %c0_8], %8 {strides = array<i32>} : memref<32x128xf32, #tpu.memory_space<vmem>>, vector<32x128xf32>,
    return
  }
  func.func @transform_0(%arg0: i32) -> (i32, i32) {
    %c0_i32 = arith.constant 0 : i32
    %c0_i32_0 = arith.constant 0 : i32
    return %arg0, %c0_i32 : i32, i32
  }
  func.func @transform_1(%arg0: i32) -> (i32, i32) {
    %c0_i32 = arith.constant 0 : i32
    %c0_i32_0 = arith.constant 0 : i32
    return %arg0, %c0_i32 : i32, i32
  }
  func.func @transform_2(%arg0: i32) -> (i32, i32) {
    %c0_i32 = arith.constant 0 : i32
    %c0_i32_0 = arith.constant 0 : i32
    %c0_i32_1 = arith.constant 0 : i32
    return %c0_i32, %c0_i32_0 : i32, i32
  }
  func.func @transform_3(%arg0: i32) -> (i32, i32) {
    %c0_i32 = arith.constant 0 : i32
    %c0_i32_0 = arith.constant 0 : i32
    %c0_i32_1 = arith.constant 0 : i32
    return %c0_i32, %c0_i32_0 : i32, i32
  }
  func.func @transform_4(%arg0: i32) -> (i32, i32) {
    %c0_i32 = arith.constant 0 : i32
    %c0_i32_0 = arith.constant 0 : i32
    return %arg0, %c0_i32 : i32, i32
  }
}

</mosaic_0001>

<bundles_post_ra>
// kernel: residule_block.5
= control target key start
LH: loop header
LB: loop body
LE: loop exit
PB: predicated region body
PF: predicated region fallthrough
CT: control target
= control target key end

     0   :  { %s128_s0 = inlined_call_operand.vmem [shape: f32[32,128], index: 0, kind: input, shape index: {}]   ;;  %s129_s1 = inlined_call_operand.vmem [shape: f32[32,128], index: 1, kind: input, shape index: {}]   ;;  %s130_s2 = inlined_call_operand.vmem [shape: f32[1,128], index: 2, kind: input, shape index: {}]   ;;  %s131_s3 = inlined_call_operand.vmem [shape: f32[1,128], index: 3, kind: input, shape index: {}]   ;;  %s132_s4 = inlined_call_operand.vmem [shape: f32[32,128], index: 4, kind: output, shape index: {}]  }
   0x1   :  { %v17_v0 = vld [vmem:[%s128_s0] sm:$0xff]  ;;  %v18_v4 = vld [vmem:[%s128_s0 + $0x8] sm:$0xff]  ;;  %v19_v8 = vld [vmem:[%s128_s0 + $0x10] sm:$0xff] }
   0x2   :  { %v21_v1 = vld [vmem:[%s129_s1] sm:$0xff]  ;;  %v22_v5 = vld [vmem:[%s129_s1 + $0x8] sm:$0xff]  ;;  %v23_v9 = vld [vmem:[%s129_s1 + $0x10] sm:$0xff] }
   0x3   :  { %v59_v2 = vld [vmem:[%s130_s2] ss:$0 sm:$0xff]  ;;  %v20_v12 = vld [vmem:[%s128_s0 + $0x18] sm:$0xff] }
   0x4   :  { %v32_v3 = vmul.f32 %v59_v2, %v21_v1  ;;  %v60_v6 = vld [vmem:[%s131_s3] ss:$0 sm:$0xff]  ;;  %v33_v7 = vmul.f32 %v59_v2, %v22_v5  ;;  %v34_v11 = vmul.f32 %v59_v2, %v23_v9  ;;  %v24_v13 = vld [vmem:[%s129_s1 + $0x18] sm:$0xff] }
   0x5   :  { %v35_v15 = vmul.f32 %v59_v2, %v24_v13 }
   0x6   :  { %v36_v10 = vadd.f32 %v32_v3, %v17_v0  ;;  %v37_v14 = vadd.f32 %v33_v7, %v18_v4  ;;  %v38_v17 = vadd.f32 %v34_v11, %v19_v8 }
   0x7   :  { %v39_v19 = vadd.f32 %v35_v15, %v20_v12 }
   0x8   :  { %v47_v16 = vadd.f32 %v60_v6, %v36_v10  ;;  %v48_v18 = vadd.f32 %v60_v6, %v37_v14  ;;  %v49_v20 = vadd.f32 %v60_v6, %v38_v17 }
   0x9   :  { %v50_v21 = vadd.f32 %v60_v6, %v39_v19 }
   0xa   :  { %51 = vst [vmem:[%s132_s4] sm:$0xff] %v47_v16  ;;  %52 = vst [vmem:[%s132_s4 + $0x8] sm:$0xff] %v48_v18 }
   0xb   :  { %53 = vst [vmem:[%s132_s4 + $0x10] sm:$0xff] %v49_v20  ;;  %54 = vst [vmem:[%s132_s4 + $0x18] sm:$0xff] %v50_v21 }

// kernel: residule_block.3
= control target key start
LH: loop header
LB: loop body
LE: loop exit
PB: predicated region body
PF: predicated region fallthrough
CT: control target
= control target key end

     0   :  { %s2980_s18 = smov 0   ;;  %s2982_s19 = smov 0   ;;  %s4792_s0 = inlined_call_operand.vmem [shape: f32[2,16,16,8], index: 0, kind: input, shape index: {}, may-alias: {0,1,2}]   ;;  %s4793_s1 = inlined_call_operand.vmem [shape: f32[2,16,16,8], index: 1, kind: input, shape index: {}, may-alias: {0,1,2}]   ;;  %s4794_s2 = inlined_call_operand.vmem [shape: f32[2,16,16,8], index: 2, kind: input, shape index: {}, may-alias: {0,1,2}]   ;;  %s4795_s3 = inlined_call_operand.vmem [shape: f32[72,8], index: 3, kind: input, shape index: {}]   ;;  %s4796_s4 = inlined_call_operand.vmem [shape: f32[2,16,16,8], index: 4, kind: output, shape index: {0}]   ;;  %s4797_s5 = inlined_call_operand.vmem [shape: f32[2,1,2,8], index: 5, kind: output, shape index: {1}]  }
   0x1   :  { %s2984_s20 = smov 0  }
   0x2 LB: > { %s28_s21 = sadd.s32 1, %s2936_s19  ;;  %p2701_p0 = scmp.ge.s32.totalorder %s2940_s20, 1  ;;  %s2940_s20 = sphi %s2984_s20, %s16_s20   ;;  %s2936_s19 = sphi %s2982_s19, %s4968_s19   ;;  %s2932_s18 = sphi %s2980_s18, %s4967_s18  }
   0x3   : > { %p30_p1 = scmp.ge.s32.totalorder %s28_s21, 2  ;;  %p278_p2 = scmp.lt.s32.totalorder %s2940_s20, 3 }
   0x5   : > { %s4970_s21 = smov (%p30_p1, %s28_s21), 0  ;;  %p279_p3 = pnand %p2701_p0, %p278_p2 }
   0x7   : > { %282 = sbr.rel (%p279_p3) target bundleno = 964 (0x3c4), region = 36 }
   0xe   : > { %p353_p4 = scmp.lt.s32.totalorder %s2932_s18, 1  ;;  %vm520_vm0 = vcmask 1040384   ;;  %vm731_vm1 = vcmask 1046528   ;;  %s2942_s30 = smov 8   ;;  %vm908_vm2 = vcmask 1045504   ;;  %vm1718_vm3 = vcmask 130048  }
   0xf   : > { %s2943_s6 = smov 16   ;;  %s2944_s7 = smov 24   ;;  %vm1685_vm4 = vcmask 64512   ;;  %vm1751_vm5 = vcmask 195584   ;;  %vm1784_vm6 = vcmask 261120   ;;  %vm1817_vm7 = vcmask 326656  }
  0x10   : > { %s4972_s18 = smov (!%p353_p4, %s2932_s18), 1  ;;  %s2945_s12 = smov 32   ;;  %vm1850_vm8 = vcmask 392192   ;;  %vm1883_vm9 = vcmask 457728   ;;  %vm1916_vm10 = vcmask 523264   ;;  %vm1958_vm11 = vcmask 588800  }
  0x11   : > { %s3001_s22 = sshll.u32 %s4972_s18, 8  ;;  %s2946_s17 = smov 40   ;;  %vm2516_vm12 = vcmask 58368  }
  0x12   : > { %s3007_s25 = scalar_lea.vmem %s4793_s1, %s3001_s22  ;;  %s2746_s26 = sadd.s32 16, %s3001_s22 }
  0x13   : > { %v416_v0 = vld [vmem:[%s3007_s25 + $0x10] sm:$0xff]  ;;  %v417_v1 = vld [vmem:[%s3007_s25 + $0x18] sm:$0xff]  ;;  %v414_v2 = vld [vmem:[%s3007_s25] sm:$0xff]  ;;  %s361_s29 = scalar_lea.vmem %s4792_s0, %s2746_s26  ;;  %s2947_s28 = smov 48  }
  0x14   : > { %v468_v3 = vrot.slane %v416_v0, 1  ;;  %v527_v4 = vrot.slane %v416_v0, 7  ;;  %v528_v5 = vrot.slane %v417_v1, 7  ;;  %v415_v6 = vld [vmem:[%s3007_s25 + $0x8] sm:$0xff]  ;;  %v467_v7 = vrot.slane %v414_v2, 1  ;;  %v418_v8 = vld [vmem:[%s3007_s25 + $0x20] sm:$0xff]  ;;  %s4138_s23 = scalar_lea.vmem %s4796_s4, %s3001_s22 }
  0x15   : > { %v524_v9 = vrot.slane %v414_v2, 7  ;;  %v525_v10 = vrot.slane %v415_v6, 7  ;;  %v419_v11 = vld [vmem:[%s3007_s25 + $0x28] sm:$0xff]  ;;  %v469_v12 = vrot.slane %v418_v8, 1  ;;  %v530_v13 = vrot.slane %v418_v8, 7  ;;  %v412_v22 = vld [vmem:[%s361_s29] sm:$0xff] }
  0x16   : > { %v3020_v14 = vsel %vm520_vm0, %v527_v4, %v528_v5  ;;  %v3023_v15 = vsel %vm520_vm0, %v468_v3, %v527_v4  ;;  %v531_v16 = vrot.slane %v419_v11, 7  ;;  %v628_v17 = vrot.slane %v415_v6, 5  ;;  %v413_v27 = vld [vmem:[%s361_s29 + $0x8] sm:$0xff]  ;;  %v420_v32 = vld [vmem:[%s3007_s25 + $0x30] sm:$0xff]  ;;  %v421_v44 = vld [vmem:[%s3007_s25 + $0x38] sm:$0xff]  ;;  %s2948_s10 = smov 56  }
  0x17   : > { %v742_v18 = vrot.slane %v3023_v15, 1  ;;  %v743_v19 = vrot.slane %v3020_v14, 1  ;;  %v3028_v20 = vsel %vm520_vm0, %v524_v9, %v525_v10  ;;  %v3031_v21 = vsel %vm520_vm0, %v467_v7, %v524_v9  ;;  %v422_v50 = vld [vmem:[%s3007_s25 + $0x40] sm:$0xff]  ;;  %v423_v55 = vld [vmem:[%s3007_s25 + $0x48] sm:$0xff]  ;;  %v424_v2 = vld [vmem:[%s3007_s25 + $0x50] sm:$0xff]  ;;  %s2949_s14 = smov 64  }
  0x18   : > { %v737_v23 = vrot.slane %v3031_v21, 1  ;;  %v738_v24 = vrot.slane %v3028_v20, 1  ;;  %v3036_v25 = vsel %vm520_vm0, %v530_v13, %v531_v16  ;;  %v3039_v26 = vsel %vm520_vm0, %v469_v12, %v530_v13  ;;  %v425_v3 = vld [vmem:[%s3007_s25 + $0x58] sm:$0xff] }
  0x19   : > { %v3042_v28 = vsel %vm731_vm1, %v742_v18, %v743_v19  ;;  %v747_v29 = vrot.slane %v3039_v26, 1  ;;  %v748_v30 = vrot.slane %v3036_v25, 1  ;;  %v3047_v31 = vsel %vm520_vm0, %v525_v10, %v628_v17  ;;  %v427_v18 = vld [vmem:[%s3007_s25 + $0x68] sm:$0xff] }
  0x1a   : > { %820 = vrot.lane.b32.xlu0 %v3042_v28, %s2942_s30  ;;  %v3053_v33 = vsel %vm731_vm1, %v737_v23, %v738_v24  ;;  %v740_v34 = vrot.slane %v3047_v31, 1  ;;  %v629_v35 = vrot.slane %v417_v1, 5  ;;  %v466_v36 = vrot.slane %v412_v22, 1 }
  0x1b   : > { %816 = vrot.lane.b32.xlu1 %v3053_v33, %s2942_s30  ;;  %v3059_v37 = vsel %vm731_vm1, %v747_v29, %v748_v30  ;;  %v521_v38 = vrot.slane %v412_v22, 7  ;;  %v522_v39 = vrot.slane %v413_v27, 7  ;;  %v630_v40 = vrot.slane %v419_v11, 5  ;;  %v426_v11 = vld [vmem:[%s3007_s25 + $0x60] sm:$0xff] }
  0x1c   : > { %v3062_v41 = vsel %vm731_vm1, %v738_v24, %v740_v34  ;;  %v3065_v42 = vsel %vm520_vm0, %v528_v5, %v629_v35  ;;  %v627_v43 = vrot.slane %v413_v27, 5  ;;  %v533_v45 = vrot.slane %v420_v32, 7  ;;  %v428_v35 = vld [vmem:[%s3007_s25 + $0x70] sm:$0xff] }
  0x1d   : > { %v745_v46 = vrot.slane %v3065_v42, 1  ;;  %v3070_v47 = vsel %vm520_vm0, %v521_v38, %v522_v39  ;;  %v3073_v48 = vsel %vm520_vm0, %v466_v36, %v521_v38  ;;  %v3076_v49 = vsel %vm520_vm0, %v531_v16, %v630_v40  ;;  %v429_v36 = vld [vmem:[%s3007_s25 + $0x78] sm:$0xff] }
  0x1e   : > { %824 = vrot.lane.b32.xlu0 %v3059_v37, %s2942_s30  ;;  %v732_v51 = vrot.slane %v3073_v48, 1  ;;  %v733_v52 = vrot.slane %v3070_v47, 1  ;;  %v750_v53 = vrot.slane %v3076_v49, 1  ;;  %v3085_v54 = vsel %vm520_vm0, %v522_v39, %v627_v43 }
  0x1f   : > { %818 = vrot.lane.b32.xlu1 %v3062_v41, %s2942_s30  ;;  %v735_v56 = vrot.slane %v3085_v54, 1  ;;  %v534_v57 = vrot.slane %v421_v44, 7  ;;  %v631_v58 = vrot.slane %v421_v44, 5  ;;  %v3092_v59 = vsel %vm731_vm1, %v743_v19, %v745_v46 }
  0x20   : > { %v734_v60 = vsel %vm731_vm1, %v732_v51, %v733_v52  ;;  %v470_v61 = vrot.slane %v420_v32, 1  ;;  %v536_v62 = vrot.slane %v422_v50, 7  ;;  %v537_v1 = vrot.slane %v423_v55, 7 }
  0x21   : > { %v3096_v63 = vsel %vm520_vm0, %v533_v45, %v534_v57  ;;  %v3099_v0 = vsel %vm520_vm0, %v534_v57, %v631_v58  ;;  %v3105_v4 = vsel %vm731_vm1, %v748_v30, %v750_v53  ;;  %v632_v6 = vrot.slane %v423_v55, 5  ;;  %v430_v58 = vld [vmem:[%s3007_s25 + $0x80] sm:$0xff] }
  0x22   : > { %812 = vrot.lane.b32.xlu0 %v734_v60, %s2942_s30  ;;  %v3108_v5 = vsel %vm520_vm0, %v470_v61, %v533_v45  ;;  %v736_v7 = vsel %vm731_vm1, %v733_v52, %v735_v56  ;;  %v753_v8 = vrot.slane %v3096_v63, 1  ;;  %v471_v10 = vrot.slane %v422_v50, 1  ;;  %v431_v60 = vld [vmem:[%s3007_s25 + $0x88] sm:$0xff] }
  0x23   : > { %822 = vrot.lane.b32.xlu1 %v3092_v59, %s2942_s30  ;;  %v752_v9 = vrot.slane %v3108_v5, 1  ;;  %v755_v12 = vrot.slane %v3099_v0, 1  ;;  %v3118_v13 = vsel %vm520_vm0, %v536_v62, %v537_v1  ;;  %v539_v16 = vrot.slane %v424_v2, 7 }
  0x24   : > { %v540_v17 = vrot.slane %v425_v3, 7  ;;  %v3122_v19 = vsel %vm520_vm0, %v537_v1, %v632_v6  ;;  %v3125_v22 = vsel %vm520_vm0, %v471_v10, %v536_v62  ;;  %v633_v23 = vrot.slane %v425_v3, 5 }
  0x25   : > { %v472_v24 = vrot.slane %v424_v2, 1  ;;  %v542_v27 = vrot.slane %v426_v11, 7  ;;  %v3131_v29 = vsel %vm731_vm1, %v752_v9, %v753_v8  ;;  %v758_v30 = vrot.slane %v3118_v13, 1 }
  0x26   : > { %814 = vrot.lane.b32.xlu0 %v736_v7, %s2942_s30  ;;  %v757_v32 = vrot.slane %v3125_v22, 1  ;;  %v543_v34 = vrot.slane %v427_v18, 7  ;;  %v3138_v38 = vsel %vm731_vm1, %v753_v8, %v755_v12  ;;  %v760_v39 = vrot.slane %v3122_v19, 1 }
  0x27   : > { %826 = vrot.lane.b32.xlu1 %v3105_v4, %s2942_s30  ;;  %v3142_v40 = vsel %vm520_vm0, %v539_v16, %v540_v17  ;;  %v3145_v43 = vsel %vm520_vm0, %v472_v24, %v539_v16  ;;  %v3148_v44 = vsel %vm520_vm0, %v540_v17, %v633_v23  ;;  %v634_v45 = vrot.slane %v427_v18, 5  ;;  %v432_v16 = vld [vmem:[%s3007_s25 + $0x90] sm:$0xff]  ;;  %v433_v17 = vld [vmem:[%s3007_s25 + $0x98] sm:$0xff] }
  0x28   : > { %4859 = vst [vmem:[#allocation2_spill] sm:$0xff] %v3142_v40  ;;  %v473_v46 = vrot.slane %v426_v11, 1  ;;  %v3153_v50 = vsel %vm520_vm0, %v542_v27, %v543_v34  ;;  %v545_v51 = vrot.slane %v428_v35, 7  ;;  %v546_v52 = vrot.slane %v429_v36, 7 }
  0x29   : > { %v3158_v53 = vsel %vm731_vm1, %v757_v32, %v758_v30  ;;  %v763_v55 = vrot.slane %v3142_v40, 1  ;;  %v762_v56 = vrot.slane %v3145_v43, 1  ;;  %v3168_v61 = vsel %vm731_vm1, %v758_v30, %v760_v39 }
  0x2a   : > { %828 = vrot.lane.b32.xlu0 %v3131_v29, %s2942_s30  ;;  %v3163_v57 = vsel %vm520_vm0, %v473_v46, %v542_v27  ;;  %v765_v62 = vrot.slane %v3148_v44, 1  ;;  %v474_v1 = vrot.slane %v428_v35, 1  ;;  %v3172_v2 = vsel %vm520_vm0, %v543_v34, %v634_v45 }
  0x2b   : > { %830 = vrot.lane.b32.xlu1 %v3138_v38, %s2942_s30  ;;  %v768_v3 = vrot.slane %v3153_v50, 1  ;;  %v635_v6 = vrot.slane %v429_v36, 5  ;;  %v767_v7 = vrot.slane %v3163_v57, 1  ;;  %v3179_v8 = vsel %vm520_vm0, %v545_v51, %v546_v52 }
  0x2c   : > { %v548_v9 = vrot.slane %v430_v58, 7  ;;  %v549_v10 = vrot.slane %v431_v60, 7  ;;  %v3184_v11 = vsel %vm731_vm1, %v762_v56, %v763_v55  ;;  %v475_v12 = vrot.slane %v430_v58, 1  ;;  %v435_v56 = vld [vmem:[%s3007_s25 + $0xa8] sm:$0xff] }
  0x2d   : > { %v3189_v18 = vsel %vm731_vm1, %v763_v55, %v765_v62  ;;  %v770_v23 = vrot.slane %v3172_v2, 1  ;;  %v3193_v24 = vsel %vm520_vm0, %v474_v1, %v545_v51  ;;  %v3196_v27 = vsel %vm520_vm0, %v546_v52, %v635_v6  ;;  %v434_v55 = vld [vmem:[%s3007_s25 + $0xa0] sm:$0xff] }
  0x2e   : > { %832 = vrot.lane.b32.xlu0 %v3158_v53, %s2942_s30  ;;  %4860 = vst [vmem:[#allocation3_spill] sm:$0xff] %v3196_v27  ;;  %v773_v30 = vrot.slane %v3179_v8, 1  ;;  %v636_v32 = vrot.slane %v431_v60, 5  ;;  %v3202_v34 = vsel %vm731_vm1, %v767_v7, %v768_v3  ;;  %v3205_v35 = vsel %vm520_vm0, %v548_v9, %v549_v10 }
  0x2f   : > { %834 = vrot.lane.b32.xlu1 %v3168_v61, %s2942_s30  ;;  %4861 = vst [vmem:[#allocation4_spill] sm:$0xff] %v3205_v35  ;;  %v551_v36 = vrot.slane %v432_v16, 7  ;;  %v552_v39 = vrot.slane %v433_v17, 7  ;;  %v772_v45 = vrot.slane %v3193_v24, 1  ;;  %v3211_v46 = vsel %vm520_vm0, %v475_v12, %v548_v9 }
  0x30   : > { %4862 = vst [vmem:[#allocation5_spill] sm:$0xff] %v3211_v46  ;;  %v637_v51 = vrot.slane %v433_v17, 5  ;;  %v476_v52 = vrot.slane %v432_v16, 1  ;;  %v3216_v58 = vsel %vm731_vm1, %v768_v3, %v770_v23  ;;  %v775_v60 = vrot.slane %v3196_v27, 1 }
  0x31   : > { %v3220_v62 = vsel %vm520_vm0, %v549_v10, %v636_v32  ;;  %v778_v1 = vrot.slane %v3205_v35, 1  ;;  %v777_v6 = vrot.slane %v3211_v46, 1  ;;  %v3227_v7 = vsel %vm520_vm0, %v551_v36, %v552_v39  ;;  %v436_v35 = vld [vmem:[%s3007_s25 + $0xb0] sm:$0xff]  ;;  %v437_v46 = vld [vmem:[%s3007_s25 + $0xb8] sm:$0xff] }
  0x32   : > { %836 = vrot.lane.b32.xlu0 %v3184_v11, %s2942_s30  ;;  %4863 = vst [vmem:[#allocation6_spill] sm:$0xff] %v3220_v62  ;;  %4864 = vst [vmem:[#allocation7_spill] sm:$0xff] %v3227_v7  ;;  %v554_v9 = vrot.slane %v434_v55, 7  ;;  %v555_v3 = vrot.slane %v435_v56, 7  ;;  %v3232_v12 = vsel %vm731_vm1, %v772_v45, %v773_v30  ;;  %v3235_v10 = vsel %vm520_vm0, %v552_v39, %v637_v51 }
  0x33   : > { %838 = vrot.lane.b32.xlu1 %v3189_v18, %s2942_s30  ;;  %4865 = vst [vmem:[#allocation8_spill] sm:$0xff] %v3232_v12  ;;  %4866 = vst [vmem:[#allocation9_spill] sm:$0xff] %v3235_v10  ;;  %v3238_v16 = vsel %vm520_vm0, %v476_v52, %v551_v36  ;;  %v477_v17 = vrot.slane %v434_v55, 1  ;;  %v3241_v23 = vsel %vm731_vm1, %v773_v30, %v775_v60  ;;  %v780_v32 = vrot.slane %v3220_v62, 1  ;;  %v438_v62 = vld [vmem:[%s3007_s25 + $0xc0] sm:$0xff] }
  0x34   : > { %4867 = vst [vmem:[#allocation10_spill] sm:$0xff] %v3238_v16  ;;  %4868 = vst [vmem:[#allocation11_spill] sm:$0xff] %v3241_v23  ;;  %v783_v27 = vrot.slane %v3227_v7, 1  ;;  %v638_v45 = vrot.slane %v435_v56, 5  ;;  %v3250_v39 = vsel %vm731_vm1, %v777_v6, %v778_v1  ;;  %v785_v36 = vrot.slane %v3235_v10, 1  ;;  %v439_v10 = vld [vmem:[%s3007_s25 + $0xc8] sm:$0xff] }
  0x35   : > { %4869 = vst [vmem:[#allocation12_spill] sm:$0xff] %v3250_v39  ;;  %v782_v30 = vrot.slane %v3238_v16, 1  ;;  %v3255_v51 = vsel %vm520_vm0, %v554_v9, %v555_v3  ;;  %v3260_v52 = vsel %vm520_vm0, %v477_v17, %v554_v9  ;;  %v557_v55 = vrot.slane %v436_v35, 7 }
  0x36   : > { %840 = vrot.lane.b32.xlu0 %v3202_v34, %s2942_s30  ;;  %4870 = vst [vmem:[#allocation13_spill] sm:$0xff] %v3255_v51  ;;  %4871 = vst [vmem:[#allocation14_spill] sm:$0xff] %v3260_v52  ;;  %v558_v56 = vrot.slane %v437_v46, 7  ;;  %v639_v60 = vrot.slane %v437_v46, 5  ;;  %v3263_v7 = vsel %vm731_vm1, %v778_v1, %v780_v32  ;;  %v478_v6 = vrot.slane %v436_v35, 1 }
  0x37   : > { %842 = vrot.lane.b32.xlu1 %v3216_v58, %s2942_s30  ;;  %4872 = vst [vmem:[#allocation15_spill] sm:$0xff] %v3263_v7  ;;  %v3268_v16 = vsel %vm520_vm0, %v555_v3, %v638_v45  ;;  %v3273_v9 = vsel %vm731_vm1, %v783_v27, %v785_v36  ;;  %v3276_v17 = vsel %vm731_vm1, %v782_v30, %v783_v27  ;;  %v788_v46 = vrot.slane %v3255_v51, 1 }
  0x38   : > { %4873 = vst [vmem:[#allocation16_spill] sm:$0xff] %v3268_v16  ;;  %4874 = vst [vmem:[#allocation17_spill] sm:$0xff] %v3273_v9  ;;  %v787_v35 = vrot.slane %v3260_v52, 1  ;;  %v3283_v1 = vsel %vm520_vm0, %v557_v55, %v558_v56  ;;  %v3286_v3 = vsel %vm520_vm0, %v558_v56, %v639_v60  ;;  %v560_v32 = vrot.slane %v438_v62, 7  ;;  %v441_v52 = vld [vmem:[%s3007_s25 + $0xd8] sm:$0xff] }
  0x39   : > { %4875 = vst [vmem:[#allocation18_spill] sm:$0xff] %v3276_v17  ;;  %4876 = vst [vmem:[#allocation19_spill] sm:$0xff] %v3283_v1  ;;  %v561_v45 = vrot.slane %v439_v10, 7  ;;  %v790_v36 = vrot.slane %v3268_v16, 1  ;;  %v3290_v27 = vsel %vm520_vm0, %v478_v6, %v557_v55  ;;  %v640_v30 = vrot.slane %v439_v10, 5 }
  0x3a   : > { %844 = vrot.lane.b32.xlu0 %v3232_v12, %s2942_s30  ;;  %4877 = vst [vmem:[#allocation20_spill] sm:$0xff] %v3286_v3  ;;  %4878 = vst [vmem:[#allocation21_spill] sm:$0xff] %v3290_v27  ;;  %v479_v51 = vrot.slane %v438_v62, 1  ;;  %v793_v56 = vrot.slane %v3283_v1, 1  ;;  %v795_v60 = vrot.slane %v3286_v3, 1  ;;  %v792_v10 = vrot.slane %v3290_v27, 1 }
  0x3b   : > { %846 = vrot.lane.b32.xlu1 %v3241_v23, %s2942_s30  ;;  %v3305_v62 = vsel %vm520_vm0, %v560_v32, %v561_v45  ;;  %v564_v6 = vrot.slane %v441_v52, 7  ;;  %v3308_v16 = vsel %vm731_vm1, %v788_v46, %v790_v36  ;;  %v442_v23 = vld [vmem:[%s3007_s25 + $0xe0] sm:$0xff] }
  0x3c   : > { %4879 = vst [vmem:[#allocation22_spill] sm:$0xff] %v3305_v62  ;;  %v3314_v1 = vsel %vm520_vm0, %v479_v51, %v560_v32  ;;  %v3321_v27 = vsel %vm731_vm1, %v793_v56, %v795_v60  ;;  %v798_v12 = vrot.slane %v3305_v62, 1 }
  0x3d   : > { %4881 = vst [vmem:[#allocation24_spill] sm:$0xff] %v3314_v1 }
  0x3e   : > { %848 = vrot.lane.b32.xlu0 %v3250_v39, %s2942_s30  ;;  %v440_v39 = vld [vmem:[%s3007_s25 + $0xd0] sm:$0xff] }
  0x3f   : > { %850 = vrot.lane.b32.xlu1 %v3263_v7, %s2942_s30  ;;  %v3297_v7 = vsel %vm731_vm1, %v787_v35, %v788_v46  ;;  %v563_v55 = vrot.slane %v440_v39, 7  ;;  %v3311_v35 = vsel %vm520_vm0, %v561_v45, %v640_v30  ;;  %v480_v3 = vrot.slane %v440_v39, 1 }
  0x40   : > { %4880 = vst [vmem:[#allocation23_spill] sm:$0xff] %v3311_v35  ;;  %v3327_v46 = vsel %vm731_vm1, %v792_v10, %v793_v56  ;;  %v800_v51 = vrot.slane %v3311_v35, 1  ;;  %v797_v39 = vrot.slane %v3314_v1, 1  ;;  %v566_v45 = vrot.slane %v442_v23, 7 }
  0x41   : > { %v3335_v32 = vsel %vm520_vm0, %v480_v3, %v563_v55  ;;  %v481_v30 = vrot.slane %v442_v23, 1 }
  0x42   : > { %852 = vrot.lane.b32.xlu0 %v3276_v17, %s2942_s30  ;;  %v641_v17 = vrot.slane %v441_v52, 5  ;;  %v3332_v52 = vsel %vm520_vm0, %v563_v55, %v564_v6  ;;  %4883 = vst [vmem:[#allocation26_spill] sm:$0xff] %v3335_v32  ;;  %v3345_v56 = vsel %vm731_vm1, %v797_v39, %v798_v12  ;;  %v802_v3 = vrot.slane %v3335_v32, 1 }
  0x43   : > { %854 = vrot.lane.b32.xlu1 %v3273_v9, %s2942_s30  ;;  %v443_v9 = vld [vmem:[%s3007_s25 + $0xe8] sm:$0xff]  ;;  %4882 = vst [vmem:[#allocation25_spill] sm:$0xff] %v3332_v52  ;;  %4885 = vst [vmem:[#allocation28_spill] sm:$0xff] %v3345_v56  ;;  %v803_v10 = vrot.slane %v3332_v52, 1  ;;  %v3350_v55 = vsel %vm731_vm1, %v798_v12, %v800_v51  ;;  %v939_v52 = vrot.slane %v3145_v43, 2  ;;  %v940_v32 = vrot.slane %v3142_v40, 2 }
  0x44   : > { %v567_v36 = vrot.slane %v443_v9, 7  ;;  %v3338_v60 = vsel %vm520_vm0, %v564_v6, %v641_v17  ;;  %v642_v62 = vrot.slane %v443_v9, 5  ;;  %4886 = vst [vmem:[#allocation29_spill] sm:$0xff] %v3350_v55  ;;  %v3357_v17 = vsel %vm520_vm0, %v481_v30, %v566_v45 }
  0x45   : > { %4884 = vst [vmem:[#allocation27_spill] sm:$0xff] %v3338_v60  ;;  %v805_v23 = vrot.slane %v3338_v60, 1  ;;  %4888 = vst [vmem:[#allocation31_spill] sm:$0xff] %v3357_v17  ;;  %v3367_v12 = vsel %vm731_vm1, %v802_v3, %v803_v10  ;;  %v807_v39 = vrot.slane %v3357_v17, 1  ;;  %v909_v30 = vrot.slane %v3073_v48, 2 }
  0x46   : > { %856 = vrot.lane.b32.xlu0 %v3297_v7, %s2942_s30  ;;  %v3354_v9 = vsel %vm520_vm0, %v566_v45, %v567_v36  ;;  %v3360_v6 = vsel %vm520_vm0, %v567_v36, %v642_v62  ;;  %4890 = vst [vmem:[#allocation33_spill] sm:$0xff] %v3367_v12  ;;  %v910_v36 = vrot.slane %v3070_v47, 2  ;;  %v941_v35 = vsel %vm908_vm2, %v939_v52, %v940_v32 }
  0x47   : > { %858 = vrot.lane.b32.xlu1 %v3308_v16, %s2942_s30  ;;  %4887 = vst [vmem:[#allocation30_spill] sm:$0xff] %v3354_v9  ;;  %4889 = vst [vmem:[#allocation32_spill] sm:$0xff] %v3360_v6  ;;  %v808_v51 = vrot.slane %v3354_v9, 1  ;;  %v3372_v60 = vsel %vm731_vm1, %v803_v10, %v805_v23  ;;  %v810_v45 = vrot.slane %v3360_v6, 1  ;;  %v912_v10 = vrot.slane %v3085_v54, 2 }
  0x48   : > { %4891 = vst [vmem:[#allocation34_spill] sm:$0xff] %v3372_v60  ;;  %v911_v23 = vsel %vm908_vm2, %v909_v30, %v910_v36  ;;  %v914_v6 = vrot.slane %v3031_v21, 2 }
  0x49   : > { %v3380_v62 = vsel %vm731_vm1, %v807_v39, %v808_v51  ;;  %v3385_v3 = vsel %vm731_vm1, %v808_v51, %v810_v45  ;;  %v915_v39 = vrot.slane %v3028_v20, 2  ;;  %v913_v9 = vsel %vm908_vm2, %v910_v36, %v912_v10 }
  0x4a   : > { %860 = vrot.lane.b32.xlu0 %v3327_v46, %s2942_s30  ;;  %4892 = vst [vmem:[#allocation35_spill] sm:$0xff] %v3380_v62  ;;  %4893 = vst [vmem:[#allocation36_spill] sm:$0xff] %v3385_v3  ;;  %v917_v51 = vrot.slane %v3047_v31, 2  ;;  %v920_v45 = vrot.slane %v3020_v14, 2 }
  0x4b   : > { %862 = vrot.lane.b32.xlu1 %v3321_v27, %s2942_s30  ;;  %v916_v54 = vsel %vm908_vm2, %v914_v6, %v915_v39 }
  0x4c   : > { %v918_v30 = vsel %vm908_vm2, %v915_v39, %v917_v51  ;;  %v1956_v51 = vld [vmem:[%s4795_s3 + $0x38] sm:$0xff] }
  0x4e   : > { %864 = vrot.lane.b32.xlu0 %v3345_v56, %s2942_s30  ;;  %v942_v56 = vrot.slane %v3148_v44, 2 }
  0x4f   : > { %866 = vrot.lane.b32.xlu1 %v3350_v55, %s2942_s30 }
  0x50   : > { %v943_v44 = vsel %vm908_vm2, %v940_v32, %v942_v56 }
  0x52   : > { %868 = vrot.lane.b32.xlu0 %v3367_v12, %s2942_s30 }
  0x53   : > { %870 = vrot.lane.b32.xlu1 %v3372_v60, %s2942_s30 }
  0x56   : > { %872 = vrot.lane.b32.xlu0 %v3380_v62, %s2942_s30  ;;  %v922_v62 = vrot.slane %v3065_v42, 2  ;;  %v1949_v42 = vld [vmem:[%s4795_s3] sm:$0xff] }
  0x57   : > { %874 = vrot.lane.b32.xlu1 %v3385_v3, %s2942_s30  ;;  %v919_v3 = vrot.slane %v3023_v15, 2 }
  0x58   : > { %v923_v36 = vsel %vm908_vm2, %v920_v45, %v922_v62  ;;  %v1951_v62 = vld [vmem:[%s4795_s3 + $0x10] sm:$0xff] }
  0x59   : > { %v921_v31 = vsel %vm908_vm2, %v919_v3, %v920_v45  ;;  %v1952_v3 = vld [vmem:[%s4795_s3 + $0x18] sm:$0xff]  ;;  %v1957_v45 = vld [vmem:[%s4795_s3 + $0x40] sm:$0xff] }
  0x5a   : > { %989 = vrot.lane.b32.xlu0 %v911_v23, %s2943_s6  ;;  %v2864_v10 = vpack.c.bf16 %v1952_v3, %v1951_v62  ;;  %v1954_v23 = vld [vmem:[%s4795_s3 + $0x28] sm:$0xff]  ;;  %v927_v3 = vrot.slane %v3076_v49, 2 }
  0x5b   : > { %991 = vrot.lane.b32.xlu1 %v913_v9, %s2943_s6  ;;  %v1950_v9 = vld [vmem:[%s4795_s3 + $0x8] sm:$0xff] }
  0x5c   : > { %v2860_v6 = vpack.c.bf16 %v1950_v9, %v1949_v42 }
  0x5e   : > { %993 = vrot.lane.b32.xlu0 %v916_v54, %s2943_s6  ;;  %2861 = vmatprep.subr.bf16.mxu0 %v2860_v6 }
  0x5f   : > { %995 = vrot.lane.b32.xlu1 %v918_v30, %s2943_s6  ;;  %2876 = vmatprep.subr.bf16.mxu1 %v2860_v6 }
  0x60   : > { %2863 = vmatpush3.bf16.msra.mxu0 %v2860_v6  ;;  %2881 = vmatpush3.bf16.msra.mxu1 %v2860_v6 }
  0x61   : > { %2865 = vmatprep.subr.bf16.mxu0 %v2864_v10  ;;  %2877 = vmatprep.subr.bf16.mxu1 %v2864_v10 }
  0x62   : > { %997 = vrot.lane.b32.xlu0 %v921_v31, %s2943_s6 }
  0x63   : > { %999 = vrot.lane.b32.xlu1 %v923_v36, %s2943_s6 }
  0x64   : > { %2867 = vmatpush3.bf16.msra.mxu0 %v2864_v10  ;;  %2882 = vmatpush3.bf16.msra.mxu1 %v2864_v10 }
  0x66   : > { %1086 = vrot.lane.b32.xlu0 %v3031_v21, %s2944_s7 }
  0x67   : > { %1088 = vrot.lane.b32.xlu1 %v3028_v20, %s2944_s7 }
  0x6a   : > { %1188 = vrot.lane.b32.xlu0 %v3053_v33, %s2945_s12  ;;  %v1953_v33 = vld [vmem:[%s4795_s3 + $0x20] sm:$0xff] }
  0x6b   : > { %1190 = vrot.lane.b32.xlu1 %v3062_v41, %s2945_s12  ;;  %v2868_v39 = vpack.c.bf16 %v1954_v23, %v1953_v33  ;;  %v1955_v41 = vld [vmem:[%s4795_s3 + $0x30] sm:$0xff] }
  0x6d   : > { %2869 = vmatprep.subr.bf16.mxu0 %v2868_v39  ;;  %2878 = vmatprep.subr.bf16.mxu1 %v2868_v39 }
  0x6e   : > { %1289 = vrot.lane.b32.xlu0 %v916_v54, %s2946_s17  ;;  %2871 = vmatpush3.bf16.msra.mxu0 %v2868_v39  ;;  %v2872_v54 = vpack.c.bf16 %v1956_v51, %v1955_v41 }
  0x6f   : > { %1291 = vrot.lane.b32.xlu1 %v918_v30, %s2946_s17  ;;  %2883 = vmatpush3.bf16.msra.mxu1 %v2868_v39 }
  0x70   : > { %2873 = vmatprep.subr.bf16.mxu0 %v2872_v54  ;;  %2879 = vmatprep.subr.bf16.mxu1 %v2872_v54 }
  0x72   : > { %1386 = vrot.lane.b32.xlu0 %v3023_v15, %s2947_s28  ;;  %2875 = vmatpush3.bf16.msra.mxu0 %v2872_v54 }
  0x73   : > { %1090 = vrot.lane.b32.xlu1 %v3023_v15, %s2944_s7  ;;  %2884 = vmatpush3.bf16.msra.mxu1 %v2872_v54 }
  0x74   : > { %2810 = vmatprep.subr.mxu0 %v1957_v45  ;;  %2880 = vmatprep.subr.mxu1 %v1957_v45 }
  0x76   : > { %1388 = vrot.lane.b32.xlu0 %v3020_v14, %s2947_s28  ;;  %2811 = vmatpush3.msra.mxu0 %v1957_v45 }
  0x77   : > { %1488 = vrot.lane.b32.xlu1 %v3042_v28, %s2948_s10  ;;  %2885 = vmatpush3.msra.mxu1 %v1957_v45 }
  0x7a   : > { %1092 = vrot.lane.b32.xlu0 %v3020_v14, %s2944_s7 }
  0x7b   : > { %1192 = vrot.lane.b32.xlu1 %v3042_v28, %s2945_s12 }
  0x7e   : > { %1490 = vrot.lane.b32.xlu0 %v3092_v59, %s2948_s10 }
  0x7f   : > { %1589 = vrot.lane.b32.xlu1 %v921_v31, %s2949_s14 }
  0x82   : > { %1194 = vrot.lane.b32.xlu0 %v3092_v59, %s2945_s12 }
  0x83   : > { %1293 = vrot.lane.b32.xlu1 %v921_v31, %s2946_s17  ;;  %v924_v31 = vrot.slane %v3039_v26, 2 }
  0x86   : > { %1591 = vrot.lane.b32.xlu0 %v923_v36, %s2949_s14 }
  0x87   : > { %1295 = vrot.lane.b32.xlu1 %v923_v36, %s2946_s17  ;;  %v925_v36 = vrot.slane %v3036_v25, 2 }
  0x89   : > { %v926_v6 = vsel %vm908_vm2, %v924_v31, %v925_v36 }
  0x8a   : > { %1390 = vrot.lane.b32.xlu0 %v3039_v26, %s2947_s28 }
  0x8b   : > { %1094 = vrot.lane.b32.xlu1 %v3039_v26, %s2944_s7 }
  0x8c   : > { %v3471_v28 = vpop.permute.xlu0 %820 }
  0x8d   : > { %v3473_v30 = vpop.permute.xlu1 %816 }
  0x8e   : > { %1392 = vrot.lane.b32.xlu0 %v3036_v25, %s2947_s28 }
  0x8f   : > { %1492 = vrot.lane.b32.xlu1 %v3059_v37, %s2948_s10 }
  0x90   : > { %v3479_v59 = vpop.permute.xlu0 %824 }
  0x91   : > { %v3483_v42 = vpop.permute.xlu1 %818 }
  0x92   : > { %1096 = vrot.lane.b32.xlu0 %v3036_v25, %s2944_s7 }
  0x93   : > { %1196 = vrot.lane.b32.xlu1 %v3059_v37, %s2945_s12  ;;  %v928_v37 = vsel %vm908_vm2, %v925_v36, %v927_v3  ;;  %v929_v36 = vrot.slane %v3108_v5, 2 }
  0x94   : > { %v3489_v9 = vpop.permute.xlu0 %812 }
  0x95   : > { %v3492_v62 = vpop.permute.xlu1 %822 }
  0x96   : > { %1494 = vrot.lane.b32.xlu0 %v3105_v4, %s2948_s10 }
  0x97   : > { %1593 = vrot.lane.b32.xlu1 %v926_v6, %s2949_s14 }
  0x98   : > { %v3498_v10 = vpop.permute.xlu0 %814 }
  0x99   : > { %v3500_v33 = vpop.permute.xlu1 %826 }
  0x9a   : > { %1198 = vrot.lane.b32.xlu0 %v3105_v4, %s2945_s12 }
  0x9b   : > { %1297 = vrot.lane.b32.xlu1 %v926_v6, %s2946_s17 }
  0x9c   : > { %v3506_v23 = vpop.permute.xlu0 %828 }
  0x9d   : > { %v3508_v39 = vpop.permute.xlu1 %830 }
  0x9e   : > { %1595 = vrot.lane.b32.xlu0 %v928_v37, %s2949_s14 }
  0x9f   : > { %1001 = vrot.lane.b32.xlu1 %v926_v6, %s2943_s6  ;;  %v930_v6 = vrot.slane %v3096_v63, 2 }
  0xa0   : > { %v3512_v49 = vpop.permute.xlu0 %832 }
  0xa1   : > { %v3514_v41 = vpop.permute.xlu1 %834  ;;  %v931_v17 = vsel %vm908_vm2, %v929_v36, %v930_v6 }
  0xa2   : > { %1299 = vrot.lane.b32.xlu0 %v928_v37, %s2946_s17 }
  0xa3   : > { %1394 = vrot.lane.b32.xlu1 %v3108_v5, %s2947_s28 }
  0xa4   : > { %v3519_v4 = vpop.permute.xlu0 %836 }
  0xa5   : > { %v3521_v51 = vpop.permute.xlu1 %838 }
  0xa6   : > { %4894 = vst [vmem:[#allocation37_spill] sm:$0xff] %v3521_v51  ;;  %1003 = vrot.lane.b32.xlu0 %v928_v37, %s2943_s6 }
  0xa7   : > { %1098 = vrot.lane.b32.xlu1 %v3108_v5, %s2944_s7 }
  0xa8   : > { %v3526_v54 = vpop.permute.xlu0 %840 }
  0xa9   : > { %4895 = vst [vmem:[#allocation38_spill] sm:$0xff] %v3526_v54  ;;  %v3528_v45 = vpop.permute.xlu1 %842  ;;  %v1686_v54 = vsel %vm1685_vm4, %v3073_v48, %v3489_v9 }
  0xaa   : > { %4896 = vst [vmem:[#allocation39_spill] sm:$0xff] %v3528_v45  ;;  %1396 = vrot.lane.b32.xlu0 %v3096_v63, %s2947_s28 }
  0xab   : > { %1496 = vrot.lane.b32.xlu1 %v3131_v29, %s2948_s10 }
  0xac   : > { %v3534_v31 = vpop.permute.xlu0 %844 }
  0xad   : > { %4897 = vst [vmem:[#allocation40_spill] sm:$0xff] %v3534_v31  ;;  %v3538_v3 = vpop.permute.xlu1 %846  ;;  %v932_v31 = vrot.slane %v3099_v0, 2 }
  0xae   : > { %4898 = vst [vmem:[#allocation41_spill] sm:$0xff] %v3538_v3  ;;  %1100 = vrot.lane.b32.xlu0 %v3096_v63, %s2944_s7 }
  0xaf   : > { %1200 = vrot.lane.b32.xlu1 %v3131_v29, %s2945_s12  ;;  %v933_v29 = vsel %vm908_vm2, %v930_v6, %v932_v31 }
  0xb0   : > { %v3544_v37 = vpop.permute.xlu0 %848 }
  0xb1   : > { %4899 = vst [vmem:[#allocation42_spill] sm:$0xff] %v3544_v37  ;;  %v3547_v60 = vpop.permute.xlu1 %850 }
  0xb2   : > { %4900 = vst [vmem:[#allocation43_spill] sm:$0xff] %v3547_v60  ;;  %1498 = vrot.lane.b32.xlu0 %v3138_v38, %s2948_s10 }
  0xb3   : > { %1597 = vrot.lane.b32.xlu1 %v931_v17, %s2949_s14 }
  0xb4   : > { %v3553_v3 = vpop.permute.xlu0 %852 }
  0xb5   : > { %4901 = vst [vmem:[#allocation44_spill] sm:$0xff] %v3553_v3  ;;  %v3555_v12 = vpop.permute.xlu1 %854 }
  0xb6   : > { %4902 = vst [vmem:[#allocation45_spill] sm:$0xff] %v3555_v12  ;;  %1202 = vrot.lane.b32.xlu0 %v3138_v38, %s2945_s12 }
  0xb7   : > { %1301 = vrot.lane.b32.xlu1 %v931_v17, %s2946_s17 }
  0xb8   : > { %v3561_v36 = vpop.permute.xlu0 %856 }
  0xb9   : > { %4903 = vst [vmem:[#allocation46_spill] sm:$0xff] %v3561_v36  ;;  %v3563_v60 = vpop.permute.xlu1 %858 }
  0xba   : > { %4904 = vst [vmem:[#allocation47_spill] sm:$0xff] %v3563_v60  ;;  %1599 = vrot.lane.b32.xlu0 %v933_v29, %s2949_s14 }
  0xbb   : > { %1005 = vrot.lane.b32.xlu1 %v931_v17, %s2943_s6 }
  0xbc   : > { %v3567_v0 = vpop.permute.xlu0 %860 }
  0xbd   : > { %4905 = vst [vmem:[#allocation48_spill] sm:$0xff] %v3567_v0  ;;  %v3569_v3 = vpop.permute.xlu1 %862 }
  0xbe   : > { %4906 = vst [vmem:[#allocation49_spill] sm:$0xff] %v3569_v3  ;;  %1303 = vrot.lane.b32.xlu0 %v933_v29, %s2946_s17 }
  0xbf   : > { %1398 = vrot.lane.b32.xlu1 %v3125_v22, %s2947_s28 }
  0xc0   : > { %v3574_v38 = vpop.permute.xlu0 %864 }
  0xc1   : > { %4907 = vst [vmem:[#allocation50_spill] sm:$0xff] %v3574_v38  ;;  %v3576_v31 = vpop.permute.xlu1 %866  ;;  %v934_v38 = vrot.slane %v3125_v22, 2 }
  0xc2   : > { %4908 = vst [vmem:[#allocation51_spill] sm:$0xff] %v3576_v31  ;;  %1007 = vrot.lane.b32.xlu0 %v933_v29, %s2943_s6  ;;  %v935_v31 = vrot.slane %v3118_v13, 2 }
  0xc3   : > { %1102 = vrot.lane.b32.xlu1 %v3125_v22, %s2944_s7 }
  0xc4   : > { %v3581_v6 = vpop.permute.xlu0 %868 }
  0xc5   : > { %4909 = vst [vmem:[#allocation52_spill] sm:$0xff] %v3581_v6  ;;  %v3583_v17 = vpop.permute.xlu1 %870  ;;  %v936_v6 = vsel %vm908_vm2, %v934_v38, %v935_v31 }
  0xc6   : > { %4910 = vst [vmem:[#allocation53_spill] sm:$0xff] %v3583_v17  ;;  %1400 = vrot.lane.b32.xlu0 %v3118_v13, %s2947_s28 }
  0xc7   : > { %1500 = vrot.lane.b32.xlu1 %v3158_v53, %s2948_s10 }
  0xc8   : > { %v3589_v3 = vpop.permute.xlu0 %872 }
  0xc9   : > { %4911 = vst [vmem:[#allocation54_spill] sm:$0xff] %v3589_v3  ;;  %v3593_v29 = vpop.permute.xlu1 %874  ;;  %v937_v3 = vrot.slane %v3122_v19, 2 }
  0xca   : > { %4912 = vst [vmem:[#allocation55_spill] sm:$0xff] %v3593_v29  ;;  %1104 = vrot.lane.b32.xlu0 %v3118_v13, %s2944_s7 }
  0xcb   : > { %1204 = vrot.lane.b32.xlu1 %v3158_v53, %s2945_s12  ;;  %v938_v53 = vsel %vm908_vm2, %v935_v31, %v937_v3 }
  0xcc   : > { %v990_v17 = vpop.permute.xlu0 %989 }
  0xcd   : > { %v3600_v0 = vpop.permute.xlu1 %991 }
  0xce   : > { %1502 = vrot.lane.b32.xlu0 %v3168_v61, %s2948_s10 }
  0xcf   : > { %1601 = vrot.lane.b32.xlu1 %v936_v6, %s2949_s14 }
  0xd0   : > { %v3606_v60 = vpop.permute.xlu0 %993 }
  0xd1   : > { %v3608_v29 = vpop.permute.xlu1 %995 }
  0xd2   : > { %1206 = vrot.lane.b32.xlu0 %v3168_v61, %s2945_s12 }
  0xd3   : > { %1305 = vrot.lane.b32.xlu1 %v936_v6, %s2946_s17 }
  0xd4   : > { %v3614_v38 = vpop.permute.xlu0 %997 }
  0xd5   : > { %v3616_v36 = vpop.permute.xlu1 %999 }
  0xd6   : > { %1603 = vrot.lane.b32.xlu0 %v938_v53, %s2949_s14 }
  0xd7   : > { %1009 = vrot.lane.b32.xlu1 %v936_v6, %s2943_s6 }
  0xd8   : > { %v1087_v19 = vpop.permute.xlu0 %1086 }
  0xd9   : > { %v1089_v12 = vpop.permute.xlu1 %1088 }
  0xda   : > { %1307 = vrot.lane.b32.xlu0 %v938_v53, %s2946_s17 }
  0xdb   : > { %1402 = vrot.lane.b32.xlu1 %v3145_v43, %s2947_s28 }
  0xdc   : > { %v1189_v61 = vpop.permute.xlu0 %1188 }
  0xdd   : > { %v1191_v37 = vpop.permute.xlu1 %1190 }
  0xde   : > { %1011 = vrot.lane.b32.xlu0 %v938_v53, %s2943_s6 }
  0xdf   : > { %1106 = vrot.lane.b32.xlu1 %v3145_v43, %s2944_s7 }
  0xe0   : > { %v1290_v3 = vpop.permute.xlu0 %1289 }
  0xe1   : > { %v1292_v31 = vpop.permute.xlu1 %1291 }
  0xe2   : > { %1404 = vrot.lane.b32.xlu0 %v3142_v40, %s2947_s28 }
  0xe3   : > { %1504 = vrot.lane.b32.xlu1 %v3184_v11, %s2948_s10 }
  0xe4   : > { %v1387_v6 = vpop.permute.xlu0 %1386 }
  0xe5   : > { %v3632_v45 = vpop.permute.xlu1 %1090 }
  0xe6   : > { %1108 = vrot.lane.b32.xlu0 %v3142_v40, %s2944_s7 }
  0xe7   : > { %1208 = vrot.lane.b32.xlu1 %v3184_v11, %s2945_s12  ;;  %v1719_v11 = vsel %vm1718_vm3, %v1686_v54, %v990_v17 }
  0xe8   : > { %v1389_v53 = vpop.permute.xlu0 %1388  ;;  %v1752_v1 = vsel %vm1751_vm5, %v1719_v11, %v1087_v19  ;;  %v945_v11 = vrot.slane %v3153_v50, 2 }
  0xe9   : > { %v1489_v55 = vpop.permute.xlu1 %1488  ;;  %v1785_v51 = vsel %vm1784_vm6, %v1752_v1, %v1189_v61  ;;  %v1687_v1 = vsel %vm1685_vm4, %v3070_v47, %v3498_v10 }
  0xea   : > { %1506 = vrot.lane.b32.xlu0 %v3189_v18, %s2948_s10  ;;  %v1818_v48 = vsel %vm1817_vm7, %v1785_v51, %v1290_v3  ;;  %v1720_v51 = vsel %vm1718_vm3, %v1687_v1, %v3600_v0 }
  0xeb   : > { %1605 = vrot.lane.b32.xlu1 %v941_v35, %s2949_s14  ;;  %v1851_v9 = vsel %vm1850_vm8, %v1818_v48, %v1387_v6  ;;  %v1753_v32 = vsel %vm1751_vm5, %v1720_v51, %v1089_v12 }
  0xec   : > { %v3647_v52 = vpop.permute.xlu0 %1092  ;;  %v1884_v17 = vsel %vm1883_vm9, %v1851_v9, %v1489_v55  ;;  %v1786_v55 = vsel %vm1784_vm6, %v1753_v32, %v1191_v37 }
  0xed   : > { %v1193_v40 = vpop.permute.xlu1 %1192  ;;  %v1819_v3 = vsel %vm1817_vm7, %v1786_v55, %v1292_v31 }
  0xee   : > { %1210 = vrot.lane.b32.xlu0 %v3189_v18, %s2945_s12  ;;  %v1852_v47 = vsel %vm1850_vm8, %v1819_v3, %v1389_v53  ;;  %v944_v53 = vrot.slane %v3163_v57, 2 }
  0xef   : > { %1309 = vrot.lane.b32.xlu1 %v941_v35, %s2946_s17 }
  0xf0   : > { %v1491_v54 = vpop.permute.xlu0 %1490 }
  0xf1   : > { %v1590_v19 = vpop.permute.xlu1 %1589  ;;  %v1885_v10 = vsel %vm1883_vm9, %v1852_v47, %v1491_v54 }
  0xf2   : > { %1607 = vrot.lane.b32.xlu0 %v943_v44, %s2949_s14  ;;  %v1917_v18 = vsel %vm1916_vm10, %v1884_v17, %v1590_v19  ;;  %v946_v17 = vsel %vm908_vm2, %v944_v53, %v945_v11 }
  0xf3   : > { %1013 = vrot.lane.b32.xlu1 %v941_v35, %s2943_s6  ;;  %2812 = vmatprep.mubr.msk.f32.mxu0 %vm1958_vm11, %v1917_v18 }
  0xf4   : > { %v1195_v56 = vpop.permute.xlu0 %1194 }
  0xf5   : > { %v1294_v61 = vpop.permute.xlu1 %1293 }
  0xf6   : > { %1311 = vrot.lane.b32.xlu0 %v943_v44, %s2946_s17 }
  0xf7   : > { %1406 = vrot.lane.b32.xlu1 %v3163_v57, %s2947_s28 }
  0xf8   : > { %v1592_v35 = vpop.permute.xlu0 %1591 }
  0xf9   : > { %v1296_v0 = vpop.permute.xlu1 %1295  ;;  %v1918_v6 = vsel %vm1916_vm10, %v1885_v10, %v1592_v35 }
  0xfa   : > { %1015 = vrot.lane.b32.xlu0 %v943_v44, %s2943_s6  ;;  %2813 = vmatmul.mubr.msk.f32.vlgmr.msra.gmra.mrb[0].mxu0 %vm1958_vm11, %v1918_v6  ;;  %v1688_v44 = vsel %vm1685_vm4, %v3031_v21, %v3473_v30 }
  0xfb   : > { %1110 = vrot.lane.b32.xlu1 %v3163_v57, %s2944_s7  ;;  %v1721_v9 = vsel %vm1718_vm3, %v1688_v44, %v3606_v60 }
  0xfc   : > { %v1391_v12 = vpop.permute.xlu0 %1390  ;;  %v1754_v19 = vsel %vm1751_vm5, %v1721_v9, %v3632_v45  ;;  %v1689_v45 = vsel %vm1685_vm4, %v3028_v20, %v3483_v42  ;;  %v1690_v9 = vsel %vm1685_vm4, %v3023_v15, %v3471_v28  ;;  %v4915_v28 = vld [vmem:[#allocation3_spill] sm:$0xff] }
  0xfd   : > { %v3680_v37 = vpop.permute.xlu1 %1094  ;;  %v1787_v18 = vsel %vm1784_vm6, %v1754_v19, %v1193_v40  ;;  %v1722_v55 = vsel %vm1718_vm3, %v1689_v45, %v3608_v29 }
  0xfe   : > { %1408 = vrot.lane.b32.xlu0 %v3153_v50, %s2947_s28  ;;  %v1820_v21 = vsel %vm1817_vm7, %v1787_v18, %v1294_v61  ;;  %v1755_v61 = vsel %vm1751_vm5, %v1722_v55, %v3647_v52 }
  0xff   : > { %1508 = vrot.lane.b32.xlu1 %v3202_v34, %s2948_s10  ;;  %v1853_v60 = vsel %vm1850_vm8, %v1820_v21, %v1391_v12  ;;  %v1788_v20 = vsel %vm1784_vm6, %v1755_v61, %v1195_v56 }
 0x100   : > { %v1393_v31 = vpop.permute.xlu0 %1392  ;;  %v1821_v47 = vsel %vm1817_vm7, %v1788_v20, %v1296_v0 }
 0x101   : > { %v1493_v48 = vpop.permute.xlu1 %1492 }
 0x102   : > { %1112 = vrot.lane.b32.xlu0 %v3153_v50, %s2944_s7  ;;  %v1886_v51 = vsel %vm1883_vm9, %v1853_v60, %v1493_v48  ;;  %v950_v48 = vrot.slane %v3179_v8, 2 }
 0x103   : > { %1212 = vrot.lane.b32.xlu1 %v3202_v34, %s2945_s12  ;;  %v947_v34 = vrot.slane %v3172_v2, 2 }
 0x104   : > { %v3697_v54 = vpop.permute.xlu0 %1096 }
 0x105   : > { %v1197_v1 = vpop.permute.xlu1 %1196  ;;  %v948_v2 = vsel %vm908_vm2, %v945_v11, %v947_v34  ;;  %v949_v11 = vrot.slane %v3193_v24, 2 }
 0x106   : > { %1510 = vrot.lane.b32.xlu0 %v3216_v58, %s2948_s10 }
 0x107   : > { %1609 = vrot.lane.b32.xlu1 %v946_v17, %s2949_s14  ;;  %v951_v18 = vsel %vm908_vm2, %v949_v11, %v950_v48 }
 0x108   : > { %v1495_v30 = vpop.permute.xlu0 %1494 }
 0x109   : > { %v1594_v32 = vpop.permute.xlu1 %1593 }
 0x10a   : > { %v1919_v40 = vsel %vm1916_vm10, %v1886_v51, %v1594_v32  ;;  %1214 = vrot.lane.b32.xlu0 %v3216_v58, %s2945_s12  ;;  %v1854_v58 = vsel %vm1850_vm8, %v1821_v47, %v1393_v31  ;;  %v4913_v31 = vld [vmem:[#allocation8_spill] sm:$0xff]  ;;  %v952_v51 = vrot.slane %v4915_v28, 2 }
 0x10b   : > { %1313 = vrot.lane.b32.xlu1 %v946_v17, %s2946_s17  ;;  %2815 = vmatprep.mubr.msk.f32.mxu0 %vm1958_vm11, %v1919_v40  ;;  %v1887_v29 = vsel %vm1883_vm9, %v1854_v58, %v1495_v30  ;;  %v4914_v30 = vld [vmem:[#allocation11_spill] sm:$0xff] }
 0x10c   : > { %v1199_v3 = vpop.permute.xlu0 %1198 }
 0x10d   : > { %v1298_v42 = vpop.permute.xlu1 %1297 }
 0x10e   : > { %1611 = vrot.lane.b32.xlu0 %v948_v2, %s2949_s14 }
 0x10f   : > { %1017 = vrot.lane.b32.xlu1 %v946_v17, %s2943_s6  ;;  %v1723_v17 = vsel %vm1718_vm3, %v1690_v9, %v3614_v38 }
 0x110   : > { %v1596_v10 = vpop.permute.xlu0 %1595  ;;  %v1756_v21 = vsel %vm1751_vm5, %v1723_v17, %v3680_v37  ;;  %v1691_v37 = vsel %vm1685_vm4, %v3020_v14, %v3492_v62  ;;  %v1692_v17 = vsel %vm1685_vm4, %v3039_v26, %v3479_v59  ;;  %v4920_v59 = vld [vmem:[#allocation6_spill] sm:$0xff] }
 0x111   : > { %v3729_v35 = vpop.permute.xlu1 %1001  ;;  %v1920_v6 = vsel %vm1916_vm10, %v1887_v29, %v1596_v10  ;;  %v1789_v60 = vsel %vm1784_vm6, %v1756_v21, %v1197_v1  ;;  %v1724_v55 = vsel %vm1718_vm3, %v1691_v37, %v3616_v36 }
 0x112   : > { %1315 = vrot.lane.b32.xlu0 %v948_v2, %s2946_s17  ;;  %2816 = vmatmul.mubr.msk.f32.gmra.mrb[2].mxu0 %vm1958_vm11, %v1920_v6  ;;  %v1822_v15 = vsel %vm1817_vm7, %v1789_v60, %v1298_v42  ;;  %v1757_v61 = vsel %vm1751_vm5, %v1724_v55, %v3697_v54  ;;  %v4916_v54 = vld [vmem:[#allocation5_spill] sm:$0xff] }
 0x113   : > { %1410 = vrot.lane.b32.xlu1 %v3193_v24, %s2947_s28  ;;  %v1790_v14 = vsel %vm1784_vm6, %v1757_v61, %v1199_v3 }
 0x114   : > { %v1300_v52 = vpop.permute.xlu0 %1299 }
 0x115   : > { %v1395_v56 = vpop.permute.xlu1 %1394  ;;  %v1823_v42 = vsel %vm1817_vm7, %v1790_v14, %v1300_v52 }
 0x116   : > { %1019 = vrot.lane.b32.xlu0 %v948_v2, %s2943_s6  ;;  %v1855_v38 = vsel %vm1850_vm8, %v1822_v15, %v1395_v56  ;;  %v953_v2 = vsel %vm908_vm2, %v950_v48, %v952_v51  ;;  %v954_v48 = vrot.slane %v4916_v54, 2  ;;  %v4919_v51 = vld [vmem:[#allocation15_spill] sm:$0xff] }
 0x117   : > { %1114 = vrot.lane.b32.xlu1 %v3193_v24, %s2944_s7 }
 0x118   : > { %v3739_v0 = vpop.permute.xlu0 %1003 }
 0x119   : > { %v3741_v12 = vpop.permute.xlu1 %1098 }
 0x11a   : > { %1412 = vrot.lane.b32.xlu0 %v3179_v8, %s2947_s28 }
 0x11b   : > { %1512 = vrot.lane.b32.xlu1 %v4913_v31, %s2948_s10 }
 0x11c   : > { %v1397_v53 = vpop.permute.xlu0 %1396 }
 0x11d   : > { %v1497_v44 = vpop.permute.xlu1 %1496  ;;  %v1856_v47 = vsel %vm1850_vm8, %v1823_v42, %v1397_v53  ;;  %v4918_v53 = vld [vmem:[#allocation12_spill] sm:$0xff] }
 0x11e   : > { %1116 = vrot.lane.b32.xlu0 %v3179_v8, %s2944_s7  ;;  %v1888_v45 = vsel %vm1883_vm9, %v1855_v38, %v1497_v44  ;;  %v957_v38 = vrot.slane %v4920_v59, 2 }
 0x11f   : > { %1216 = vrot.lane.b32.xlu1 %v4913_v31, %s2945_s12  ;;  %v4917_v31 = vld [vmem:[#allocation4_spill] sm:$0xff] }
 0x120   : > { %v3758_v19 = vpop.permute.xlu0 %1100  ;;  %v955_v44 = vrot.slane %v4917_v31, 2 }
 0x121   : > { %v1201_v34 = vpop.permute.xlu1 %1200 }
 0x122   : > { %1514 = vrot.lane.b32.xlu0 %v4914_v30, %s2948_s10  ;;  %v956_v60 = vsel %vm908_vm2, %v954_v48, %v955_v44 }
 0x123   : > { %1613 = vrot.lane.b32.xlu1 %v951_v18, %s2949_s14 }
 0x124   : > { %v1499_v32 = vpop.permute.xlu0 %1498 }
 0x125   : > { %v1598_v40 = vpop.permute.xlu1 %1597  ;;  %v1889_v36 = vsel %vm1883_vm9, %v1856_v47, %v1499_v32 }
 0x126   : > { %v1921_v1 = vsel %vm1916_vm10, %v1888_v45, %v1598_v40  ;;  %1218 = vrot.lane.b32.xlu0 %v4914_v30, %s2945_s12 }
 0x127   : > { %1317 = vrot.lane.b32.xlu1 %v951_v18, %s2946_s17  ;;  %2818 = vmatprep.mubr.msk.f32.mxu0 %vm1958_vm11, %v1921_v1  ;;  %v958_v1 = vsel %vm908_vm2, %v955_v44, %v957_v38 }
 0x128   : > { %v1203_v20 = vpop.permute.xlu0 %1202 }
 0x129   : > { %v1302_v62 = vpop.permute.xlu1 %1301 }
 0x12a   : > { %1615 = vrot.lane.b32.xlu0 %v953_v2, %s2949_s14 }
 0x12b   : > { %1021 = vrot.lane.b32.xlu1 %v951_v18, %s2943_s6  ;;  %v1725_v18 = vsel %vm1718_vm3, %v1692_v17, %v3729_v35 }
 0x12c   : > { %v1600_v58 = vpop.permute.xlu0 %1599  ;;  %v1758_v30 = vsel %vm1751_vm5, %v1725_v18, %v3741_v12  ;;  %v1693_v12 = vsel %vm1685_vm4, %v3036_v25, %v3500_v33 }
 0x12d   : > { %v3790_v29 = vpop.permute.xlu1 %1005  ;;  %v1922_v10 = vsel %vm1916_vm10, %v1889_v36, %v1600_v58  ;;  %v1791_v28 = vsel %vm1784_vm6, %v1758_v30, %v1201_v34  ;;  %v1726_v37 = vsel %vm1718_vm3, %v1693_v12, %v3739_v0 }
 0x12e   : > { %1319 = vrot.lane.b32.xlu0 %v953_v2, %s2946_s17  ;;  %2819 = vmatmul.mubr.msk.f32.gmra.mrb[4].mxu0 %vm1958_vm11, %v1922_v10  ;;  %v1824_v26 = vsel %vm1817_vm7, %v1791_v28, %v1302_v62  ;;  %v1759_v55 = vsel %vm1751_vm5, %v1726_v37, %v3758_v19  ;;  %v4921_v19 = vld [vmem:[#allocation10_spill] sm:$0xff] }
 0x12f   : > { %1414 = vrot.lane.b32.xlu1 %v4916_v54, %s2947_s28  ;;  %v1792_v25 = vsel %vm1784_vm6, %v1759_v55, %v1203_v20 }
 0x130   : > { %v1304_v3 = vpop.permute.xlu0 %1303 }
 0x131   : > { %v1399_v6 = vpop.permute.xlu1 %1398  ;;  %v1825_v61 = vsel %vm1817_vm7, %v1792_v25, %v1304_v3  ;;  %v4922_v3 = vld [vmem:[#allocation7_spill] sm:$0xff] }
 0x132   : > { %1023 = vrot.lane.b32.xlu0 %v953_v2, %s2943_s6  ;;  %v1857_v35 = vsel %vm1850_vm8, %v1824_v26, %v1399_v6  ;;  %v4923_v6 = vld [vmem:[#allocation18_spill] sm:$0xff]  ;;  %v960_v48 = vrot.slane %v4922_v3, 2  ;;  %v4924_v26 = vld [vmem:[#allocation17_spill] sm:$0xff] }
 0x133   : > { %1118 = vrot.lane.b32.xlu1 %v4916_v54, %s2944_s7 }
 0x134   : > { %v3800_v52 = vpop.permute.xlu0 %1007 }
 0x135   : > { %v3802_v56 = vpop.permute.xlu1 %1102 }
 0x136   : > { %1416 = vrot.lane.b32.xlu0 %v4917_v31, %s2947_s28 }
 0x137   : > { %1516 = vrot.lane.b32.xlu1 %v4918_v53, %s2948_s10 }
 0x138   : > { %v1401_v11 = vpop.permute.xlu0 %1400 }
 0x139   : > { %v1501_v9 = vpop.permute.xlu1 %1500  ;;  %v1858_v14 = vsel %vm1850_vm8, %v1825_v61, %v1401_v11  ;;  %v959_v11 = vrot.slane %v4921_v19, 2 }
 0x13a   : > { %1120 = vrot.lane.b32.xlu0 %v4917_v31, %s2944_s7  ;;  %v1890_v45 = vsel %vm1883_vm9, %v1857_v35, %v1501_v9  ;;  %v1694_v9 = vsel %vm1685_vm4, %v3108_v5, %v3506_v23  ;;  %v4925_v23 = vld [vmem:[#allocation9_spill] sm:$0xff] }
 0x13b   : > { %1220 = vrot.lane.b32.xlu1 %v4918_v53, %s2945_s12  ;;  %v1727_v17 = vsel %vm1718_vm3, %v1694_v9, %v3790_v29  ;;  %v962_v59 = vrot.slane %v4925_v23, 2 }
 0x13c   : > { %v3819_v21 = vpop.permute.xlu0 %1104  ;;  %v1760_v30 = vsel %vm1751_vm5, %v1727_v17, %v3802_v56  ;;  %v1695_v56 = vsel %vm1685_vm4, %v3096_v63, %v3508_v39 }
 0x13d   : > { %v1205_v15 = vpop.permute.xlu1 %1204 }
 0x13e   : > { %1518 = vrot.lane.b32.xlu0 %v4919_v51, %s2948_s10 }
 0x13f   : > { %1617 = vrot.lane.b32.xlu1 %v956_v60, %s2949_s14 }
 0x140   : > { %v1503_v32 = vpop.permute.xlu0 %1502 }
 0x141   : > { %v1602_v40 = vpop.permute.xlu1 %1601  ;;  %v1891_v0 = vsel %vm1883_vm9, %v1858_v14, %v1503_v32 }
 0x142   : > { %v1923_v34 = vsel %vm1916_vm10, %v1890_v45, %v1602_v40  ;;  %1222 = vrot.lane.b32.xlu0 %v4919_v51, %s2945_s12  ;;  %v1793_v51 = vsel %vm1784_vm6, %v1760_v30, %v1205_v15  ;;  %v1728_v45 = vsel %vm1718_vm3, %v1695_v56, %v3800_v52  ;;  %v963_v40 = vsel %vm908_vm2, %v960_v48, %v962_v59 }
 0x143   : > { %1321 = vrot.lane.b32.xlu1 %v956_v60, %s2946_s17  ;;  %2821 = vmatprep.mubr.msk.f32.mxu0 %vm1958_vm11, %v1923_v34  ;;  %v1761_v12 = vsel %vm1751_vm5, %v1728_v45, %v3819_v21  ;;  %v4926_v21 = vld [vmem:[#allocation14_spill] sm:$0xff] }
 0x144   : > { %v1207_v2 = vpop.permute.xlu0 %1206 }
 0x145   : > { %v1306_v33 = vpop.permute.xlu1 %1305  ;;  %v1794_v63 = vsel %vm1784_vm6, %v1761_v12, %v1207_v2 }
 0x146   : > { %1619 = vrot.lane.b32.xlu0 %v958_v1, %s2949_s14  ;;  %v1826_v5 = vsel %vm1817_vm7, %v1793_v51, %v1306_v33 }
 0x147   : > { %1025 = vrot.lane.b32.xlu1 %v956_v60, %s2943_s6  ;;  %v961_v60 = vsel %vm908_vm2, %v959_v11, %v960_v48 }
 0x148   : > { %v1604_v62 = vpop.permute.xlu0 %1603 }
 0x149   : > { %v3851_v42 = vpop.permute.xlu1 %1009  ;;  %v1924_v47 = vsel %vm1916_vm10, %v1891_v0, %v1604_v62  ;;  %v4927_v62 = vld [vmem:[#allocation13_spill] sm:$0xff] }
 0x14a   : > { %1323 = vrot.lane.b32.xlu0 %v958_v1, %s2946_s17  ;;  %2822 = vmatmul.mubr.msk.f32.gmra.mrb[6].mxu0 %vm1958_vm11, %v1924_v47 }
 0x14b   : > { %1418 = vrot.lane.b32.xlu1 %v4921_v19, %s2947_s28 }
 0x14c   : > { %v1308_v20 = vpop.permute.xlu0 %1307 }
 0x14d   : > { %v1403_v36 = vpop.permute.xlu1 %1402  ;;  %v1827_v37 = vsel %vm1817_vm7, %v1794_v63, %v1308_v20  ;;  %v964_v20 = vrot.slane %v4926_v21, 2 }
 0x14e   : > { %1027 = vrot.lane.b32.xlu0 %v958_v1, %s2943_s6  ;;  %v1859_v29 = vsel %vm1850_vm8, %v1826_v5, %v1403_v36  ;;  %v965_v36 = vrot.slane %v4927_v62, 2 }
 0x14f   : > { %1122 = vrot.lane.b32.xlu1 %v4921_v19, %s2944_s7 }
 0x150   : > { %v3861_v58 = vpop.permute.xlu0 %1011 }
 0x151   : > { %v3863_v10 = vpop.permute.xlu1 %1106 }
 0x152   : > { %1420 = vrot.lane.b32.xlu0 %v4922_v3, %s2947_s28 }
 0x153   : > { %1520 = vrot.lane.b32.xlu1 %v4923_v6, %s2948_s10 }
 0x154   : > { %v1405_v53 = vpop.permute.xlu0 %1404 }
 0x155   : > { %v1505_v44 = vpop.permute.xlu1 %1504  ;;  %v1860_v1 = vsel %vm1850_vm8, %v1827_v37, %v1405_v53  ;;  %v1696_v53 = vsel %vm1685_vm4, %v3125_v22, %v3512_v49 }
 0x156   : > { %1124 = vrot.lane.b32.xlu0 %v4922_v3, %s2944_s7  ;;  %v1892_v35 = vsel %vm1883_vm9, %v1859_v29, %v1505_v44  ;;  %v1729_v11 = vsel %vm1718_vm3, %v1696_v53, %v3851_v42  ;;  %v966_v44 = vsel %vm908_vm2, %v964_v20, %v965_v36 }
 0x157   : > { %1224 = vrot.lane.b32.xlu1 %v4923_v6, %s2945_s12  ;;  %v1762_v9 = vsel %vm1751_vm5, %v1729_v11, %v3863_v10  ;;  %v1697_v10 = vsel %vm1685_vm4, %v3118_v13, %v3514_v41  ;;  %v4932_v11 = vld [vmem:[#allocation37_spill] sm:$0xff] }
 0x158   : > { %v3880_v18 = vpop.permute.xlu0 %1108  ;;  %v1730_v5 = vsel %vm1718_vm3, %v1697_v10, %v3861_v58 }
 0x159   : > { %v1209_v28 = vpop.permute.xlu1 %1208  ;;  %v1763_v59 = vsel %vm1751_vm5, %v1730_v5, %v3880_v18  ;;  %v4929_v18 = vld [vmem:[#allocation21_spill] sm:$0xff] }
 0x15a   : > { %1522 = vrot.lane.b32.xlu0 %v4924_v26, %s2948_s10 }
 0x15b   : > { %1621 = vrot.lane.b32.xlu1 %v961_v60, %s2949_s14 }
 0x15c   : > { %v1507_v38 = vpop.permute.xlu0 %1506 }
 0x15d   : > { %v1606_v32 = vpop.permute.xlu1 %1605  ;;  %v1893_v52 = vsel %vm1883_vm9, %v1860_v1, %v1507_v38 }
 0x15e   : > { %v1925_v15 = vsel %vm1916_vm10, %v1892_v35, %v1606_v32  ;;  %1226 = vrot.lane.b32.xlu0 %v4924_v26, %s2945_s12 }
 0x15f   : > { %1325 = vrot.lane.b32.xlu1 %v961_v60, %s2946_s17  ;;  %2824 = vmatprep.mubr.msk.f32.mxu0 %vm1958_vm11, %v1925_v15 }
 0x160   : > { %v1211_v34 = vpop.permute.xlu0 %1210 }
 0x161   : > { %v1310_v39 = vpop.permute.xlu1 %1309  ;;  %v1796_v13 = vsel %vm1784_vm6, %v1763_v59, %v1211_v34  ;;  %v4930_v34 = vld [vmem:[#allocation19_spill] sm:$0xff] }
 0x162   : > { %1623 = vrot.lane.b32.xlu0 %v963_v40, %s2949_s14  ;;  %v970_v37 = vrot.slane %v4930_v34, 2 }
 0x163   : > { %1029 = vrot.lane.b32.xlu1 %v961_v60, %s2943_s6  ;;  %v1795_v60 = vsel %vm1784_vm6, %v1762_v9, %v1209_v28 }
 0x164   : > { %v1608_v55 = vpop.permute.xlu0 %1607  ;;  %v1828_v22 = vsel %vm1817_vm7, %v1795_v60, %v1310_v39  ;;  %v969_v39 = vrot.slane %v4929_v18, 2 }
 0x165   : > { %v3912_v25 = vpop.permute.xlu1 %1013  ;;  %v1926_v33 = vsel %vm1916_vm10, %v1893_v52, %v1608_v55  ;;  %v1698_v52 = vsel %vm1685_vm4, %v3145_v43, %v3519_v4 }
 0x166   : > { %1327 = vrot.lane.b32.xlu0 %v963_v40, %s2946_s17  ;;  %2825 = vmatmul.mubr.msk.f32.gmra.mrb[8].mxu0 %vm1958_vm11, %v1926_v33  ;;  %v1731_v55 = vsel %vm1718_vm3, %v1698_v52, %v3912_v25  ;;  %v4938_v52 = vld [vmem:[#allocation29_spill] sm:$0xff] }
 0x167   : > { %1422 = vrot.lane.b32.xlu1 %v4926_v21, %s2947_s28 }
 0x168   : > { %v1312_v2 = vpop.permute.xlu0 %1311 }
 0x169   : > { %v1407_v61 = vpop.permute.xlu1 %1406  ;;  %v1829_v38 = vsel %vm1817_vm7, %v1796_v13, %v1312_v2  ;;  %v971_v2 = vsel %vm908_vm2, %v969_v39, %v970_v37  ;;  %v4936_v13 = vld [vmem:[#allocation28_spill] sm:$0xff] }
 0x16a   : > { %1031 = vrot.lane.b32.xlu0 %v963_v40, %s2943_s6  ;;  %v1861_v42 = vsel %vm1850_vm8, %v1828_v22, %v1407_v61 }
 0x16b   : > { %1126 = vrot.lane.b32.xlu1 %v4926_v21, %s2944_s7 }
 0x16c   : > { %v3922_v14 = vpop.permute.xlu0 %1015 }
 0x16d   : > { %v3924_v0 = vpop.permute.xlu1 %1110 }
 0x16e   : > { %1424 = vrot.lane.b32.xlu0 %v4927_v62, %s2947_s28  ;;  %v1764_v61 = vsel %vm1751_vm5, %v1731_v55, %v3924_v0  ;;  %v4933_v0 = vld [vmem:[#allocation2_spill] sm:$0xff]  ;;  %v4939_v55 = vld [vmem:[#allocation23_spill] sm:$0xff] }
 0x16f   : > { %1524 = vrot.lane.b32.xlu1 %v3297_v7, %s2948_s10 }
 0x170   : > { %v1409_v47 = vpop.permute.xlu0 %1408 }
 0x171   : > { %v1509_v6 = vpop.permute.xlu1 %1508 }
 0x172   : > { %1128 = vrot.lane.b32.xlu0 %v4927_v62, %s2944_s7  ;;  %v1894_v51 = vsel %vm1883_vm9, %v1861_v42, %v1509_v6 }
 0x173   : > { %1228 = vrot.lane.b32.xlu1 %v3297_v7, %s2945_s12  ;;  %v4928_v7 = vld [vmem:[#allocation16_spill] sm:$0xff] }
 0x174   : > { %v3941_v48 = vpop.permute.xlu0 %1112  ;;  %v967_v49 = vrot.slane %v4928_v7, 2 }
 0x175   : > { %v1213_v17 = vpop.permute.xlu1 %1212 }
 0x176   : > { %1526 = vrot.lane.b32.xlu0 %v3308_v16, %s2948_s10  ;;  %v968_v23 = vsel %vm908_vm2, %v965_v36, %v967_v49  ;;  %v1797_v20 = vsel %vm1784_vm6, %v1764_v61, %v1213_v17 }
 0x177   : > { %1625 = vrot.lane.b32.xlu1 %v966_v44, %s2949_s14 }
 0x178   : > { %v1511_v30 = vpop.permute.xlu0 %1510 }
 0x179   : > { %v1610_v26 = vpop.permute.xlu1 %1609 }
 0x17a   : > { %v1927_v28 = vsel %vm1916_vm10, %v1894_v51, %v1610_v26  ;;  %1230 = vrot.lane.b32.xlu0 %v3308_v16, %s2945_s12  ;;  %v1862_v16 = vsel %vm1850_vm8, %v1829_v38, %v1409_v47 }
 0x17b   : > { %1329 = vrot.lane.b32.xlu1 %v966_v44, %s2946_s17  ;;  %2827 = vmatprep.mubr.msk.f32.mxu0 %vm1958_vm11, %v1927_v28  ;;  %v1895_v58 = vsel %vm1883_vm9, %v1862_v16, %v1511_v30 }
 0x17c   : > { %v1215_v29 = vpop.permute.xlu0 %1214 }
 0x17d   : > { %v1314_v41 = vpop.permute.xlu1 %1313 }
 0x17e   : > { %1627 = vrot.lane.b32.xlu0 %v968_v23, %s2949_s14  ;;  %v1830_v43 = vsel %vm1817_vm7, %v1797_v20, %v1314_v41 }
 0x17f   : > { %1033 = vrot.lane.b32.xlu1 %v966_v44, %s2943_s6  ;;  %v1699_v44 = vsel %vm1685_vm4, %v4933_v0, %v4932_v11 }
 0x180   : > { %v1612_v35 = vpop.permute.xlu0 %1611  ;;  %v1732_v17 = vsel %vm1718_vm3, %v1699_v44, %v3922_v14 }
 0x181   : > { %v3973_v32 = vpop.permute.xlu1 %1017  ;;  %v1928_v56 = vsel %vm1916_vm10, %v1895_v58, %v1612_v35  ;;  %v1765_v22 = vsel %vm1751_vm5, %v1732_v17, %v3941_v48  ;;  %v4934_v48 = vld [vmem:[#allocation24_spill] sm:$0xff]  ;;  %v4937_v35 = vld [vmem:[#allocation38_spill] sm:$0xff] }
 0x182   : > { %1331 = vrot.lane.b32.xlu0 %v968_v23, %s2946_s17  ;;  %2828 = vmatmul.mubr.msk.f32.gmra.mrb[10].mxu0 %vm1958_vm11, %v1928_v56  ;;  %v1798_v49 = vsel %vm1784_vm6, %v1765_v22, %v1215_v29  ;;  %v4935_v29 = vld [vmem:[#allocation22_spill] sm:$0xff]  ;;  %v974_v38 = vrot.slane %v4934_v48, 2  ;;  %v1700_v56 = vsel %vm1685_vm4, %v3163_v57, %v4937_v35 }
 0x183   : > { %1426 = vrot.lane.b32.xlu1 %v4929_v18, %s2947_s28  ;;  %v975_v16 = vrot.slane %v4935_v29, 2 }
 0x184   : > { %v1316_v15 = vpop.permute.xlu0 %1315 }
 0x185   : > { %v1411_v45 = vpop.permute.xlu1 %1410  ;;  %v1831_v30 = vsel %vm1817_vm7, %v1798_v49, %v1316_v15  ;;  %v1733_v15 = vsel %vm1718_vm3, %v1700_v56, %v3973_v32  ;;  %v4945_v56 = vld [vmem:[#allocation34_spill] sm:$0xff] }
 0x186   : > { %1035 = vrot.lane.b32.xlu0 %v968_v23, %s2943_s6  ;;  %v1863_v25 = vsel %vm1850_vm8, %v1830_v43, %v1411_v45 }
 0x187   : > { %1130 = vrot.lane.b32.xlu1 %v4929_v18, %s2944_s7 }
 0x188   : > { %v3983_v40 = vpop.permute.xlu0 %1019 }
 0x189   : > { %v3985_v12 = vpop.permute.xlu1 %1114 }
 0x18a   : > { %1428 = vrot.lane.b32.xlu0 %v4930_v34, %s2947_s28  ;;  %v1766_v39 = vsel %vm1751_vm5, %v1733_v15, %v3985_v12 }
 0x18b   : > { %1528 = vrot.lane.b32.xlu1 %v3327_v46, %s2948_s10 }
 0x18c   : > { %v1413_v63 = vpop.permute.xlu0 %1412 }
 0x18d   : > { %v1513_v1 = vpop.permute.xlu1 %1512 }
 0x18e   : > { %1132 = vrot.lane.b32.xlu0 %v4930_v34, %s2944_s7  ;;  %v1896_v6 = vsel %vm1883_vm9, %v1863_v25, %v1513_v1 }
 0x18f   : > { %1232 = vrot.lane.b32.xlu1 %v3327_v46, %s2945_s12  ;;  %v4931_v46 = vld [vmem:[#allocation20_spill] sm:$0xff] }
 0x190   : > { %v4002_v33 = vpop.permute.xlu0 %1116  ;;  %v972_v4 = vrot.slane %v4931_v46, 2  ;;  %v4940_v46 = vld [vmem:[#allocation39_spill] sm:$0xff] }
 0x191   : > { %v1217_v47 = vpop.permute.xlu1 %1216  ;;  %v1701_v12 = vsel %vm1685_vm4, %v3153_v50, %v4940_v46 }
 0x192   : > { %1530 = vrot.lane.b32.xlu0 %v3321_v27, %s2948_s10  ;;  %v973_v60 = vsel %vm908_vm2, %v970_v37, %v972_v4  ;;  %v1799_v1 = vsel %vm1784_vm6, %v1766_v39, %v1217_v47  ;;  %v1734_v4 = vsel %vm1718_vm3, %v1701_v12, %v3983_v40 }
 0x193   : > { %1629 = vrot.lane.b32.xlu1 %v971_v2, %s2949_s14 }
 0x194   : > { %v1515_v36 = vpop.permute.xlu0 %1514 }
 0x195   : > { %v1614_v53 = vpop.permute.xlu1 %1613 }
 0x196   : > { %v1929_v9 = vsel %vm1916_vm10, %v1896_v6, %v1614_v53  ;;  %1234 = vrot.lane.b32.xlu0 %v3321_v27, %s2945_s12  ;;  %v1864_v27 = vsel %vm1850_vm8, %v1831_v30, %v1413_v63  ;;  %v976_v63 = vsel %vm908_vm2, %v974_v38, %v975_v16  ;;  %v4943_v30 = vld [vmem:[#allocation33_spill] sm:$0xff] }
 0x197   : > { %1333 = vrot.lane.b32.xlu1 %v971_v2, %s2946_s17  ;;  %2830 = vmatprep.mubr.msk.f32.mxu0 %vm1958_vm11, %v1929_v9  ;;  %v1897_v14 = vsel %vm1883_vm9, %v1864_v27, %v1515_v36  ;;  %v1767_v36 = vsel %vm1751_vm5, %v1734_v4, %v4002_v33  ;;  %v4941_v33 = vld [vmem:[#allocation26_spill] sm:$0xff] }
 0x198   : > { %v1219_v7 = vpop.permute.xlu0 %1218 }
 0x199   : > { %v1318_v42 = vpop.permute.xlu1 %1317  ;;  %v1800_v50 = vsel %vm1784_vm6, %v1767_v36, %v1219_v7 }
 0x19a   : > { %1631 = vrot.lane.b32.xlu0 %v973_v60, %s2949_s14  ;;  %v1832_v57 = vsel %vm1817_vm7, %v1799_v1, %v1318_v42  ;;  %v4942_v42 = vld [vmem:[#allocation25_spill] sm:$0xff] }
 0x19b   : > { %1037 = vrot.lane.b32.xlu1 %v971_v2, %s2943_s6  ;;  %v977_v2 = vrot.slane %v4939_v55, 2 }
 0x19c   : > { %v1616_v51 = vpop.permute.xlu0 %1615 }
 0x19d   : > { %v4034_v26 = vpop.permute.xlu1 %1021  ;;  %v1930_v10 = vsel %vm1916_vm10, %v1897_v14, %v1616_v51  ;;  %v978_v25 = vsel %vm908_vm2, %v975_v16, %v977_v2  ;;  %v979_v14 = vrot.slane %v4941_v33, 2  ;;  %v980_v51 = vrot.slane %v4942_v42, 2 }
 0x19e   : > { %1335 = vrot.lane.b32.xlu0 %v973_v60, %s2946_s17  ;;  %2831 = vmatmul.mubr.msk.f32.gmra.mrb[12].mxu0 %vm1958_vm11, %v1930_v10 }
 0x19f   : > { %1430 = vrot.lane.b32.xlu1 %v4934_v48, %s2947_s28  ;;  %v981_v38 = vsel %vm908_vm2, %v979_v14, %v980_v51 }
 0x1a0   : > { %v1320_v28 = vpop.permute.xlu0 %1319 }
 0x1a1   : > { %v1415_v5 = vpop.permute.xlu1 %1414  ;;  %v1833_v11 = vsel %vm1817_vm7, %v1800_v50, %v1320_v28  ;;  %v4944_v28 = vld [vmem:[#allocation40_spill] sm:$0xff] }
 0x1a2   : > { %1039 = vrot.lane.b32.xlu0 %v973_v60, %s2943_s6  ;;  %v1865_v32 = vsel %vm1850_vm8, %v1832_v57, %v1415_v5  ;;  %v1702_v5 = vsel %vm1685_vm4, %v3193_v24, %v4944_v28 }
 0x1a3   : > { %1134 = vrot.lane.b32.xlu1 %v4934_v48, %s2944_s7 }
 0x1a4   : > { %v4044_v23 = vpop.permute.xlu0 %1023 }
 0x1a5   : > { %v4046_v59 = vpop.permute.xlu1 %1118 }
 0x1a6   : > { %1432 = vrot.lane.b32.xlu0 %v4935_v29, %s2947_s28 }
 0x1a7   : > { %1532 = vrot.lane.b32.xlu1 %v4936_v13, %s2948_s10 }
 0x1a8   : > { %v1417_v41 = vpop.permute.xlu0 %1416 }
 0x1a9   : > { %v1517_v58 = vpop.permute.xlu1 %1516  ;;  %v1866_v0 = vsel %vm1850_vm8, %v1833_v11, %v1417_v41 }
 0x1aa   : > { %1136 = vrot.lane.b32.xlu0 %v4935_v29, %s2944_s7  ;;  %v1898_v20 = vsel %vm1883_vm9, %v1865_v32, %v1517_v58 }
 0x1ab   : > { %1236 = vrot.lane.b32.xlu1 %v4936_v13, %s2945_s12  ;;  %v1735_v13 = vsel %vm1718_vm3, %v1702_v5, %v4034_v26  ;;  %v4946_v26 = vld [vmem:[#allocation27_spill] sm:$0xff] }
 0x1ac   : > { %v4063_v45 = vpop.permute.xlu0 %1120  ;;  %v1768_v16 = vsel %vm1751_vm5, %v1735_v13, %v4046_v59  ;;  %v982_v15 = vrot.slane %v4946_v26, 2 }
 0x1ad   : > { %v1221_v37 = vpop.permute.xlu1 %1220 }
 0x1ae   : > { %1534 = vrot.lane.b32.xlu0 %v4938_v52, %s2948_s10  ;;  %v1801_v35 = vsel %vm1784_vm6, %v1768_v16, %v1221_v37 }
 0x1af   : > { %1633 = vrot.lane.b32.xlu1 %v976_v63, %s2949_s14 }
 0x1b0   : > { %v1519_v61 = vpop.permute.xlu0 %1518 }
 0x1b1   : > { %v1618_v43 = vpop.permute.xlu1 %1617  ;;  %v1899_v40 = vsel %vm1883_vm9, %v1866_v0, %v1519_v61 }
 0x1b2   : > { %v1931_v47 = vsel %vm1916_vm10, %v1898_v20, %v1618_v43  ;;  %1238 = vrot.lane.b32.xlu0 %v4938_v52, %s2945_s12  ;;  %v4947_v52 = vld [vmem:[#allocation41_spill] sm:$0xff]  ;;  %v983_v20 = vsel %vm908_vm2, %v980_v51, %v982_v15  ;;  %v4951_v51 = vld [vmem:[#allocation42_spill] sm:$0xff] }
 0x1b3   : > { %1337 = vrot.lane.b32.xlu1 %v976_v63, %s2946_s17  ;;  %2833 = vmatprep.mubr.msk.f32.mxu0 %vm1958_vm11, %v1931_v47  ;;  %v1703_v57 = vsel %vm1685_vm4, %v3179_v8, %v4947_v52 }
 0x1b4   : > { %v1223_v6 = vpop.permute.xlu0 %1222  ;;  %v1736_v61 = vsel %vm1718_vm3, %v1703_v57, %v4044_v23  ;;  %v444_v57 = vld [vmem:[%s3007_s25 + $0xf0] sm:$0xff] }
 0x1b5   : > { %v1322_v53 = vpop.permute.xlu1 %1321  ;;  %v1769_v43 = vsel %vm1751_vm5, %v1736_v61, %v4063_v45 }
 0x1b6   : > { %1635 = vrot.lane.b32.xlu0 %v978_v25, %s2949_s14  ;;  %v1834_v24 = vsel %vm1817_vm7, %v1801_v35, %v1322_v53  ;;  %v1802_v23 = vsel %vm1784_vm6, %v1769_v43, %v1223_v6  ;;  %v4948_v6 = vld [vmem:[#allocation31_spill] sm:$0xff] }
 0x1b7   : > { %1041 = vrot.lane.b32.xlu1 %v976_v63, %s2943_s6 }
 0x1b8   : > { %v1620_v44 = vpop.permute.xlu0 %1619 }
 0x1b9   : > { %v4095_v9 = vpop.permute.xlu1 %1025  ;;  %v1932_v17 = vsel %vm1916_vm10, %v1899_v40, %v1620_v44 }
 0x1ba   : > { %1339 = vrot.lane.b32.xlu0 %v978_v25, %s2946_s17  ;;  %2834 = vmatmul.mubr.msk.f32.gmra.mrb[14].mxu0 %vm1958_vm11, %v1932_v17  ;;  %v4949_v17 = vld [vmem:[#allocation30_spill] sm:$0xff] }
 0x1bb   : > { %1434 = vrot.lane.b32.xlu1 %v4941_v33, %s2947_s28 }
 0x1bc   : > { %v1324_v60 = vpop.permute.xlu0 %1323 }
 0x1bd   : > { %v1419_v22 = vpop.permute.xlu1 %1418  ;;  %v1835_v4 = vsel %vm1817_vm7, %v1802_v23, %v1324_v60  ;;  %v4950_v60 = vld [vmem:[#allocation35_spill] sm:$0xff] }
 0x1be   : > { %1043 = vrot.lane.b32.xlu0 %v978_v25, %s2943_s6  ;;  %v1867_v59 = vsel %vm1850_vm8, %v1834_v24, %v1419_v22 }
 0x1bf   : > { %1138 = vrot.lane.b32.xlu1 %v4941_v33, %s2944_s7 }
 0x1c0   : > { %v4105_v7 = vpop.permute.xlu0 %1027 }
 0x1c1   : > { %v4107_v49 = vpop.permute.xlu1 %1122 }
 0x1c2   : > { %1436 = vrot.lane.b32.xlu0 %v4942_v42, %s2947_s28 }
 0x1c3   : > { %1536 = vrot.lane.b32.xlu1 %v4943_v30, %s2948_s10 }
 0x1c4   : > { %v1421_v27 = vpop.permute.xlu0 %1420 }
 0x1c5   : > { %v1521_v10 = vpop.permute.xlu1 %1520  ;;  %v1868_v25 = vsel %vm1850_vm8, %v1835_v4, %v1421_v27  ;;  %v985_v27 = vrot.slane %v4949_v17, 2  ;;  %v569_v4 = vrot.slane %v444_v57, 7 }
 0x1c6   : > { %1140 = vrot.lane.b32.xlu0 %v4942_v42, %s2944_s7  ;;  %v1900_v39 = vsel %vm1883_vm9, %v1867_v59, %v1521_v10  ;;  %v1704_v10 = vsel %vm1685_vm4, %v4916_v54, %v4951_v51 }
 0x1c7   : > { %1240 = vrot.lane.b32.xlu1 %v4943_v30, %s2945_s12  ;;  %v984_v30 = vrot.slane %v4948_v6, 2  ;;  %v1737_v28 = vsel %vm1718_vm3, %v1704_v10, %v4095_v9  ;;  %v4952_v9 = vld [vmem:[#allocation36_spill] sm:$0xff] }
 0x1c8   : > { %v4124_v41 = vpop.permute.xlu0 %1124 }
 0x1c9   : > { %v1225_v58 = vpop.permute.xlu1 %1224  ;;  %v986_v13 = vsel %vm908_vm2, %v984_v30, %v985_v27 }
 0x1ca   : > { %1538 = vrot.lane.b32.xlu0 %v4945_v56, %s2948_s10 }
 0x1cb   : > { %1637 = vrot.lane.b32.xlu1 %v981_v38, %s2949_s14 }
 0x1cc   : > { %v1523_v63 = vpop.permute.xlu0 %1522 }
 0x1cd   : > { %v1622_v37 = vpop.permute.xlu1 %1621  ;;  %v4143_v1 = vpop.f32.mrb[0].mxu0  ;;  %v1901_v36 = vsel %vm1883_vm9, %v1868_v25, %v1523_v63 }
 0x1ce   : > { %v2281_v55 = vsel %vm1685_vm4, %v4143_v1, 0.0  ;;  %2484 = vst.msk [vmem:[%s4138_s23 + $0x8] sm:$0xff] %vm1685_vm4, %v4143_v1  ;;  %v4153_v2 = vpop.f32.mrb[1].mxu0  ;;  %v1933_v32 = vsel %vm1916_vm10, %v1900_v39, %v1622_v37  ;;  %1242 = vrot.lane.b32.xlu0 %v4945_v56, %s2945_s12 }
 0x1cf   : > { %1341 = vrot.lane.b32.xlu1 %v981_v38, %s2946_s17  ;;  %v2280_v8 = vsel %vm1685_vm4, %v4153_v2, 0.0  ;;  %2483 = vst.msk [vmem:[%s4138_s23] sm:$0xff] %vm1685_vm4, %v4153_v2  ;;  %2836 = vmatprep.mubr.msk.f32.mxu1 %vm1958_vm11, %v1933_v32 }
 0x1d0   : > { %v2282_v46 = vadd.f32 %v2281_v55, %v2280_v8  ;;  %v4170_v12 = vpop.permute.xlu0 %1226  ;;  %v4954_v55 = vld [vmem:[#allocation43_spill] sm:$0xff]  ;;  %v445_v8 = vld [vmem:[%s3007_s25 + $0xf8] sm:$0xff]  ;;  %s2749_s25 = sadd.s32 224, %s3001_s22  ;;  %s2710_s22 = sshll.u32 %s4972_s18, 1 }
 0x1d1   : > { %v1326_v47 = vpop.permute.xlu1 %1325  ;;  %v1705_v32 = vsel %vm1685_vm4, %v4917_v31, %v4954_v55  ;;  %v643_v51 = vrot.slane %v445_v8, 5  ;;  %s389_s26 = scalar_lea.vmem %s4794_s2, %s2749_s25 }
 0x1d2   : > { %1639 = vrot.lane.b32.xlu0 %v983_v20, %s2949_s14  ;;  %v1738_v43 = vsel %vm1718_vm3, %v1705_v32, %v4105_v7 }
 0x1d3   : > { %1045 = vrot.lane.b32.xlu1 %v981_v38, %s2943_s6  ;;  %v1770_v38 = vsel %vm1751_vm5, %v1737_v28, %v4107_v49  ;;  %v1771_v31 = vsel %vm1751_vm5, %v1738_v43, %v4124_v41 }
 0x1d4   : > { %v1624_v50 = vpop.permute.xlu0 %1623  ;;  %v1803_v54 = vsel %vm1784_vm6, %v1770_v38, %v1225_v58  ;;  %v4953_v58 = vld [vmem:[#allocation32_spill] sm:$0xff]  ;;  %v1804_v25 = vsel %vm1784_vm6, %v1771_v31, %v4170_v12 }
 0x1d5   : > { %v4178_v53 = vpop.permute.xlu1 %1029  ;;  %v1934_v45 = vsel %vm1916_vm10, %v1901_v36, %v1624_v50  ;;  %v1836_v24 = vsel %vm1817_vm7, %v1803_v54, %v1326_v47  ;;  %v987_v26 = vrot.slane %v4953_v58, 2  ;;  %v482_v47 = vrot.slane %v444_v57, 1  ;;  %v446_v57 = vld [vmem:[%s389_s26] sm:$0xff] }
 0x1d6   : > { %1343 = vrot.lane.b32.xlu0 %v983_v20, %s2946_s17  ;;  %2837 = vmatmul.mubr.msk.f32.vlgmr.msra.gmra.mrb[0].mxu1 %vm1958_vm11, %v1934_v45  ;;  %v570_v50 = vrot.slane %v445_v8, 7  ;;  %v572_v31 = vrot.slane %v446_v57, 7 }
 0x1d7   : > { %1438 = vrot.lane.b32.xlu1 %v4948_v6, %s2947_s28 }
 0x1d8   : > { %v1328_v11 = vpop.permute.xlu0 %1327  ;;  %v4267_v12 = vsel %vm520_vm0, %v569_v4, %v570_v50  ;;  %v697_v38 = vsel %vm520_vm0, %v570_v50, %v643_v51  ;;  %v483_v50 = vrot.slane %v446_v57, 1 }
 0x1d9   : > { %v1423_v0 = vpop.permute.xlu1 %1422  ;;  %v1837_v7 = vsel %vm1817_vm7, %v1804_v25, %v1328_v11  ;;  %v1285_v58 = vrot.slane %v4267_v12, 2 }
 0x1da   : > { %1047 = vrot.lane.b32.xlu0 %v983_v20, %s2943_s6  ;;  %v1869_v15 = vsel %vm1850_vm8, %v1836_v24, %v1423_v0 }
 0x1db   : > { %1142 = vrot.lane.b32.xlu1 %v4948_v6, %s2944_s7 }
 0x1dc   : > { %v4188_v40 = vpop.permute.xlu0 %1031 }
 0x1dd   : > { %v4190_v44 = vpop.permute.xlu1 %1126 }
 0x1de   : > { %1440 = vrot.lane.b32.xlu0 %v4949_v17, %s2947_s28 }
 0x1df   : > { %1540 = vrot.lane.b32.xlu1 %v4950_v60, %s2948_s10 }
 0x1e0   : > { %v1425_v22 = vpop.permute.xlu0 %1424 }
 0x1e1   : > { %v1525_v14 = vpop.permute.xlu1 %1524  ;;  %v1870_v45 = vsel %vm1850_vm8, %v1837_v7, %v1425_v22 }
 0x1e2   : > { %1144 = vrot.lane.b32.xlu0 %v4949_v17, %s2944_s7  ;;  %v1902_v39 = vsel %vm1883_vm9, %v1869_v15, %v1525_v14  ;;  %v1184_v14 = vrot.slane %v4267_v12, 1  ;;  %v4955_v15 = vld [vmem:[#allocation44_spill] sm:$0xff] }
 0x1e3   : > { %1244 = vrot.lane.b32.xlu1 %v4950_v60, %s2945_s12  ;;  %v679_v60 = vsel %vm520_vm0, %v482_v47, %v569_v4 }
 0x1e4   : > { %v4207_v5 = vpop.permute.xlu0 %1128  ;;  %v1183_v11 = vrot.slane %v679_v60, 1  ;;  %v1284_v24 = vrot.slane %v679_v60, 2 }
 0x1e5   : > { %v4212_v16 = vpop.permute.xlu1 %1228  ;;  %v4214_v35 = vpop.f32.mrb[2].mxu0 }
 0x1e6   : > { %2486 = vst.msk [vmem:[%s4138_s23 + $0x18] sm:$0xff] %vm1685_vm4, %v4214_v35  ;;  %v4220_v56 = vpop.f32.mrb[3].mxu0  ;;  %1542 = vrot.lane.b32.xlu0 %v4952_v9, %s2948_s10  ;;  %v2285_v37 = vsel %vm1685_vm4, %v4214_v35, 0.0 }
 0x1e7   : > { %1641 = vrot.lane.b32.xlu1 %v986_v13, %s2949_s14  ;;  %v2283_v49 = vsel %vm1685_vm4, %v4220_v56, 0.0  ;;  %2485 = vst.msk [vmem:[%s4138_s23 + $0x10] sm:$0xff] %vm1685_vm4, %v4220_v56 }
 0x1e8   : > { %v2284_v59 = vadd.f32 %v2283_v49, %v2282_v46  ;;  %v1527_v63 = vpop.permute.xlu0 %1526  ;;  %v988_v46 = vsel %vm908_vm2, %v985_v27, %v987_v26 }
 0x1e9   : > { %v1626_v52 = vpop.permute.xlu1 %1625  ;;  %v1903_v0 = vsel %vm1883_vm9, %v1870_v45, %v1527_v63 }
 0x1ea   : > { %v1935_v61 = vsel %vm1916_vm10, %v1902_v39, %v1626_v52  ;;  %1246 = vrot.lane.b32.xlu0 %v4952_v9, %s2945_s12  ;;  %v4244_v20 = vadd.f32 %v2285_v37, %v2284_v59  ;;  %v1186_v9 = vrot.slane %v697_v38, 1  ;;  %v1706_v59 = vsel %vm1685_vm4, %v4921_v19, %v4955_v15  ;;  %v447_v19 = vld [vmem:[%s389_s26 + $0x8] sm:$0xff] }
 0x1eb   : > { %1345 = vrot.lane.b32.xlu1 %v986_v13, %s2946_s17  ;;  %2839 = vmatprep.mubr.msk.f32.mxu1 %vm1958_vm11, %v1935_v61  ;;  %v1739_v39 = vsel %vm1718_vm3, %v1706_v59, %v4178_v53  ;;  %v1286_v52 = vsel %vm908_vm2, %v1284_v24, %v1285_v58  ;;  %v573_v25 = vrot.slane %v447_v19, 7 }
 0x1ec   : > { %v4253_v23 = vpop.permute.xlu0 %1230  ;;  %v1187_v63 = vsel %vm731_vm1, %v1184_v14, %v1186_v9  ;;  %v1772_v55 = vsel %vm1751_vm5, %v1739_v39, %v4190_v44 }
 0x1ed   : > { %v1330_v36 = vpop.permute.xlu1 %1329  ;;  %v1805_v8 = vsel %vm1784_vm6, %v1772_v55, %v4212_v16 }
 0x1ee   : > { %1643 = vrot.lane.b32.xlu0 %v988_v46, %s2949_s14  ;;  %v1838_v43 = vsel %vm1817_vm7, %v1805_v8, %v1330_v36 }
 0x1ef   : > { %1049 = vrot.lane.b32.xlu1 %v986_v13, %s2943_s6  ;;  %v1185_v13 = vsel %vm731_vm1, %v1183_v11, %v1184_v14 }
 0x1f0   : > { %v1628_v41 = vpop.permute.xlu0 %1627 }
 0x1f1   : > { %v4263_v30 = vpop.permute.xlu1 %1033  ;;  %v1936_v27 = vsel %vm1916_vm10, %v1903_v0, %v1628_v41  ;;  %v644_v0 = vrot.slane %v447_v19, 5  ;;  %v4956_v41 = vld [vmem:[#allocation45_spill] sm:$0xff] }
 0x1f2   : > { %1347 = vrot.lane.b32.xlu0 %v988_v46, %s2946_s17  ;;  %2840 = vmatmul.mubr.msk.f32.gmra.mrb[2].mxu1 %vm1958_vm11, %v1936_v27 }
 0x1f3   : > { %1442 = vrot.lane.b32.xlu1 %v679_v60, %s2947_s28 }
 0x1f4   : > { %v4272_v22 = vpop.permute.xlu0 %1331 }
 0x1f5   : > { %v1427_v10 = vpop.permute.xlu1 %1426 }
 0x1f6   : > { %1051 = vrot.lane.b32.xlu0 %v988_v46, %s2943_s6  ;;  %v1287_v46 = vrot.slane %v697_v38, 2  ;;  %v1871_v16 = vsel %vm1850_vm8, %v1838_v43, %v1427_v10  ;;  %v680_v10 = vsel %vm520_vm0, %v483_v50, %v572_v31 }
 0x1f7   : > { %1146 = vrot.lane.b32.xlu1 %v679_v60, %s2944_s7  ;;  %v1707_v60 = vsel %vm1685_vm4, %v4922_v3, %v4956_v41  ;;  %v574_v3 = vsel %vm520_vm0, %v572_v31, %v573_v25 }
 0x1f8   : > { %v4277_v28 = vpop.permute.xlu0 %1035  ;;  %v1288_v11 = vsel %vm908_vm2, %v1285_v58, %v1287_v46  ;;  %v1483_v58 = vrot.slane %v680_v10, 1 }
 0x1f9   : > { %v4281_v54 = vpop.permute.xlu1 %1130 }
 0x1fa   : > { %1444 = vrot.lane.b32.xlu0 %v4267_v12, %s2947_s28 }
 0x1fb   : > { %1544 = vrot.lane.b32.xlu1 %v1185_v13, %s2948_s10 }
 0x1fc   : > { %v1429_v49 = vpop.permute.xlu0 %1428 }
 0x1fd   : > { %v1529_v26 = vpop.permute.xlu1 %1528 }
 0x1fe   : > { %1148 = vrot.lane.b32.xlu0 %v4267_v12, %s2944_s7  ;;  %v1904_v7 = vsel %vm1883_vm9, %v1871_v16, %v1529_v26 }
 0x1ff   : > { %1248 = vrot.lane.b32.xlu1 %v1185_v13, %s2945_s12 }
 0x200   : > { %v4300_v37 = vpop.permute.xlu0 %1132 }
 0x201   : > { %v4305_v32 = vpop.permute.xlu1 %1232  ;;  %v4307_v61 = vpop.f32.mrb[4].mxu0 }
 0x202   : > { %2488 = vst.msk [vmem:[%s4138_s23 + $0x28] sm:$0xff] %vm1685_vm4, %v4307_v61  ;;  %v4314_v53 = vpop.f32.mrb[5].mxu0  ;;  %1546 = vrot.lane.b32.xlu0 %v1187_v63, %s2948_s10  ;;  %v2289_v36 = vsel %vm1685_vm4, %v4307_v61, 0.0 }
 0x203   : > { %1645 = vrot.lane.b32.xlu1 %v1286_v52, %s2949_s14  ;;  %v2287_v44 = vsel %vm1685_vm4, %v4314_v53, 0.0  ;;  %2487 = vst.msk [vmem:[%s4138_s23 + $0x20] sm:$0xff] %vm1685_vm4, %v4314_v53 }
 0x204   : > { %v2288_v47 = vadd.f32 %v2287_v44, %v4244_v20  ;;  %v1531_v4 = vpop.permute.xlu0 %1530  ;;  %v1740_v20 = vsel %vm1718_vm3, %v1707_v60, %v4188_v40  ;;  %v698_v40 = vsel %vm520_vm0, %v573_v25, %v644_v0 }
 0x205   : > { %v1630_v45 = vpop.permute.xlu1 %1629  ;;  %v1773_v14 = vsel %vm1751_vm5, %v1740_v20, %v4207_v5  ;;  %v1484_v5 = vrot.slane %v574_v3, 1  ;;  %v1486_v59 = vrot.slane %v698_v40, 1  ;;  %v1587_v55 = vrot.slane %v698_v40, 2 }
 0x206   : > { %v1937_v27 = vsel %vm1916_vm10, %v1904_v7, %v1630_v45  ;;  %1250 = vrot.lane.b32.xlu0 %v1187_v63, %s2945_s12  ;;  %v2290_v12 = vadd.f32 %v2289_v36, %v2288_v47  ;;  %v1806_v13 = vsel %vm1784_vm6, %v1773_v14, %v4253_v23  ;;  %v4957_v47 = vld [vmem:[#allocation46_spill] sm:$0xff]  ;;  %v4958_v14 = vld [vmem:[#allocation47_spill] sm:$0xff] }
 0x207   : > { %1349 = vrot.lane.b32.xlu1 %v1286_v52, %s2946_s17  ;;  %2842 = vmatprep.mubr.msk.f32.mxu1 %vm1958_vm11, %v1937_v27  ;;  %v1839_v9 = vsel %vm1817_vm7, %v1806_v13, %v4272_v22  ;;  %v1585_v22 = vrot.slane %v574_v3, 2  ;;  %v1485_v39 = vsel %vm731_vm1, %v1483_v58, %v1484_v5  ;;  %v1487_v57 = vsel %vm731_vm1, %v1484_v5, %v1486_v59 }
 0x208   : > { %v4341_v51 = vpop.permute.xlu0 %1234  ;;  %v1872_v24 = vsel %vm1850_vm8, %v1839_v9, %v1429_v49  ;;  %v1584_v49 = vrot.slane %v680_v10, 2 }
 0x209   : > { %v1334_v38 = vpop.permute.xlu1 %1333  ;;  %v1905_v26 = vsel %vm1883_vm9, %v1872_v24, %v1531_v4  ;;  %v1588_v44 = vsel %vm908_vm2, %v1585_v22, %v1587_v55  ;;  %v1708_v4 = vsel %vm1685_vm4, %v4926_v21, %v4957_v47 }
 0x20a   : > { %1647 = vrot.lane.b32.xlu0 %v1288_v11, %s2949_s14  ;;  %v1586_v8 = vsel %vm908_vm2, %v1584_v49, %v1585_v22  ;;  %v1741_v25 = vsel %vm1718_vm3, %v1708_v4, %v4263_v30 }
 0x20b   : > { %1351 = vrot.lane.b32.xlu1 %v1288_v11, %s2946_s17  ;;  %v1774_v7 = vsel %vm1751_vm5, %v1741_v25, %v4281_v54  ;;  %s411_s17 = scalar_lea.vmem %s4797_s5, %s2710_s22 }
 0x20c   : > { %v1632_v15 = vpop.permute.xlu0 %1631  ;;  %v1807_v0 = vsel %vm1784_vm6, %v1774_v7, %v4305_v32 }
 0x20d   : > { %v4354_v63 = vpop.permute.xlu1 %1037  ;;  %v1938_v23 = vsel %vm1916_vm10, %v1905_v26, %v1632_v15  ;;  %v1840_v21 = vsel %vm1817_vm7, %v1807_v0, %v1334_v38  ;;  %v4960_v0 = vld [vmem:[#allocation49_spill] sm:$0xff] }
 0x20e   : > { %1446 = vrot.lane.b32.xlu0 %v680_v10, %s2947_s28  ;;  %2843 = vmatmul.mubr.msk.f32.gmra.mrb[4].mxu1 %vm1958_vm11, %v1938_v23 }
 0x20f   : > { %1448 = vrot.lane.b32.xlu1 %v574_v3, %s2947_s28  ;;  %v1709_v3 = vsel %vm1685_vm4, %v4927_v62, %v4958_v14 }
 0x210   : > { %v1336_v52 = vpop.permute.xlu0 %1335  ;;  %v1742_v38 = vsel %vm1718_vm3, %v1709_v3, %v4277_v28 }
 0x211   : > { %v1431_v19 = vpop.permute.xlu1 %1430 }
 0x212   : > { %1548 = vrot.lane.b32.xlu0 %v1485_v39, %s2948_s10  ;;  %v1873_v54 = vsel %vm1850_vm8, %v1840_v21, %v1431_v19  ;;  %v4959_v39 = vld [vmem:[#allocation48_spill] sm:$0xff]  ;;  %v1711_v21 = vsel %vm1685_vm4, %v4930_v34, %v4960_v0 }
 0x213   : > { %1550 = vrot.lane.b32.xlu1 %v1487_v57, %s2948_s10 }
 0x214   : > { %v4365_v43 = vpop.permute.xlu0 %1039 }
 0x215   : > { %v1135_v46 = vpop.permute.xlu1 %1134 }
 0x216   : > { %1649 = vrot.lane.b32.xlu0 %v1586_v8, %s2949_s14 }
 0x217   : > { %1651 = vrot.lane.b32.xlu1 %v1588_v44, %s2949_s14 }
 0x218   : > { %v1433_v31 = vpop.permute.xlu0 %1432 }
 0x219   : > { %v1533_v16 = vpop.permute.xlu1 %1532 }
 0x21a   : > { %v1906_v20 = vsel %vm1883_vm9, %v1873_v54, %v1533_v16 }
 0x21c   : > { %v1137_v50 = vpop.permute.xlu0 %1136 }
 0x21d   : > { %v1237_v36 = vpop.permute.xlu1 %1236  ;;  %v4377_v45 = vpop.f32.mrb[6].mxu0 }
 0x21e   : > { %2490 = vst.msk [vmem:[%s4138_s23 + $0x38] sm:$0xff] %vm1685_vm4, %v4377_v45  ;;  %v4384_v41 = vpop.f32.mrb[7].mxu0  ;;  %v2293_v32 = vsel %vm1685_vm4, %v4377_v45, 0.0 }
 0x21f   : > { %v2291_v30 = vsel %vm1685_vm4, %v4384_v41, 0.0  ;;  %2489 = vst.msk [vmem:[%s4138_s23 + $0x30] sm:$0xff] %vm1685_vm4, %v4384_v41 }
 0x220   : > { %v2292_v60 = vadd.f32 %v2291_v30, %v2290_v12  ;;  %v1535_v27 = vpop.permute.xlu0 %1534  ;;  %v1775_v12 = vsel %vm1751_vm5, %v1742_v38, %v4300_v37 }
 0x221   : > { %v1634_v11 = vpop.permute.xlu1 %1633  ;;  %v1808_v9 = vsel %vm1784_vm6, %v1775_v12, %v4341_v51 }
 0x222   : > { %v1939_v10 = vsel %vm1916_vm10, %v1906_v20, %v1634_v11  ;;  %v2294_v13 = vadd.f32 %v2293_v32, %v2292_v60  ;;  %v1841_v5 = vsel %vm1817_vm7, %v1808_v9, %v1336_v52  ;;  %v1710_v52 = vsel %vm1685_vm4, %v4929_v18, %v4959_v39 }
 0x223   : > { %2845 = vmatprep.mubr.msk.f32.mxu1 %vm1958_vm11, %v1939_v10  ;;  %v1874_v62 = vsel %vm1850_vm8, %v1841_v5, %v1433_v31  ;;  %v1743_v57 = vsel %vm1718_vm3, %v1710_v52, %v4354_v63  ;;  %v1744_v60 = vsel %vm1718_vm3, %v1711_v21, %v4365_v43  ;;  %v4961_v5 = vld [vmem:[#allocation50_spill] sm:$0xff] }
 0x224   : > { %v1239_v40 = vpop.permute.xlu0 %1238  ;;  %v1907_v58 = vsel %vm1883_vm9, %v1874_v62, %v1535_v27  ;;  %v1776_v19 = vsel %vm1751_vm5, %v1743_v57, %v1135_v46  ;;  %v1777_v27 = vsel %vm1751_vm5, %v1744_v60, %v1137_v50  ;;  %v1712_v62 = vsel %vm1685_vm4, %v4934_v48, %v4961_v5 }
 0x225   : > { %v1338_v24 = vpop.permute.xlu1 %1337  ;;  %v1809_v31 = vsel %vm1784_vm6, %v1776_v19, %v1237_v36  ;;  %v1810_v32 = vsel %vm1784_vm6, %v1777_v27, %v1239_v40 }
 0x226   : > { %v1842_v47 = vsel %vm1817_vm7, %v1809_v31, %v1338_v24  ;;  %v4962_v31 = vld [vmem:[#allocation51_spill] sm:$0xff] }
 0x228   : > { %v1636_v26 = vpop.permute.xlu0 %1635 }
 0x229   : > { %v1042_v15 = vpop.permute.xlu1 %1041  ;;  %v1940_v28 = vsel %vm1916_vm10, %v1907_v58, %v1636_v26 }
 0x22a   : > { %2846 = vmatmul.mubr.msk.f32.gmra.mrb[6].mxu1 %vm1958_vm11, %v1940_v28  ;;  %v1745_v58 = vsel %vm1718_vm3, %v1712_v62, %v1042_v15 }
 0x22c   : > { %v1340_v59 = vpop.permute.xlu0 %1339 }
 0x22d   : > { %v1435_v37 = vpop.permute.xlu1 %1434  ;;  %v1843_v14 = vsel %vm1817_vm7, %v1810_v32, %v1340_v59 }
 0x22e   : > { %v1875_v63 = vsel %vm1850_vm8, %v1842_v47, %v1435_v37  ;;  %v1713_v47 = vsel %vm1685_vm4, %v4935_v29, %v4962_v31 }
 0x230   : > { %v4412_v23 = vpop.permute.xlu0 %1043 }
 0x231   : > { %v1139_v51 = vpop.permute.xlu1 %1138 }
 0x232   : > { %v1778_v28 = vsel %vm1751_vm5, %v1745_v58, %v1139_v51 }
 0x234   : > { %v1437_v22 = vpop.permute.xlu0 %1436 }
 0x235   : > { %v1537_v49 = vpop.permute.xlu1 %1536  ;;  %v1876_v3 = vsel %vm1850_vm8, %v1843_v14, %v1437_v22  ;;  %v4963_v14 = vld [vmem:[#allocation52_spill] sm:$0xff] }
 0x236   : > { %v1908_v25 = vsel %vm1883_vm9, %v1875_v63, %v1537_v49 }
 0x238   : > { %v1141_v55 = vpop.permute.xlu0 %1140 }
 0x239   : > { %v1241_v8 = vpop.permute.xlu1 %1240  ;;  %v4420_v44 = vpop.f32.mrb[8].mxu0 }
 0x23a   : > { %2492 = vst.msk [vmem:[%s4138_s23 + $0x48] sm:$0xff] %vm1685_vm4, %v4420_v44  ;;  %v4426_v16 = vpop.f32.mrb[9].mxu0  ;;  %v2297_v7 = vsel %vm1685_vm4, %v4420_v44, 0.0  ;;  %v1811_v22 = vsel %vm1784_vm6, %v1778_v28, %v1241_v8 }
 0x23b   : > { %v2295_v18 = vsel %vm1685_vm4, %v4426_v16, 0.0  ;;  %2491 = vst.msk [vmem:[%s4138_s23 + $0x40] sm:$0xff] %vm1685_vm4, %v4426_v16 }
 0x23c   : > { %v2296_v46 = vadd.f32 %v2295_v18, %v2294_v13  ;;  %v1539_v4 = vpop.permute.xlu0 %1538 }
 0x23d   : > { %v1638_v36 = vpop.permute.xlu1 %1637  ;;  %v1909_v34 = vsel %vm1883_vm9, %v1876_v3, %v1539_v4  ;;  %v1714_v3 = vsel %vm1685_vm4, %v4941_v33, %v4963_v14 }
 0x23e   : > { %v1941_v30 = vsel %vm1916_vm10, %v1908_v25, %v1638_v36  ;;  %v2298_v54 = vadd.f32 %v2297_v7, %v2296_v46  ;;  %v1746_v46 = vsel %vm1718_vm3, %v1713_v47, %v4412_v23 }
 0x23f   : > { %2848 = vmatprep.mubr.msk.f32.mxu1 %vm1958_vm11, %v1941_v30  ;;  %v1779_v4 = vsel %vm1751_vm5, %v1746_v46, %v1141_v55 }
 0x240   : > { %v1243_v20 = vpop.permute.xlu0 %1242 }
 0x241   : > { %v1342_v11 = vpop.permute.xlu1 %1341  ;;  %v1812_v7 = vsel %vm1784_vm6, %v1779_v4, %v1243_v20 }
 0x242   : > { %v1844_v39 = vsel %vm1817_vm7, %v1811_v22, %v1342_v11  ;;  %v4964_v22 = vld [vmem:[#allocation53_spill] sm:$0xff] }
 0x244   : > { %v1640_v10 = vpop.permute.xlu0 %1639 }
 0x245   : > { %v1046_v13 = vpop.permute.xlu1 %1045  ;;  %v1942_v38 = vsel %vm1916_vm10, %v1909_v34, %v1640_v10 }
 0x246   : > { %2849 = vmatmul.mubr.msk.f32.gmra.mrb[8].mxu1 %vm1958_vm11, %v1942_v38  ;;  %v1747_v34 = vsel %vm1718_vm3, %v1714_v3, %v1046_v13 }
 0x248   : > { %v1344_v43 = vpop.permute.xlu0 %1343 }
 0x249   : > { %v1439_v12 = vpop.permute.xlu1 %1438  ;;  %v1845_v0 = vsel %vm1817_vm7, %v1812_v7, %v1344_v43  ;;  %v4965_v7 = vld [vmem:[#allocation54_spill] sm:$0xff] }
 0x24a   : > { %v1877_v15 = vsel %vm1850_vm8, %v1844_v39, %v1439_v12  ;;  %v1715_v39 = vsel %vm1685_vm4, %v4942_v42, %v4964_v22 }
 0x24c   : > { %v4452_v50 = vpop.permute.xlu0 %1047 }
 0x24d   : > { %v1143_v40 = vpop.permute.xlu1 %1142 }
 0x24e   : > { %v1780_v38 = vsel %vm1751_vm5, %v1747_v34, %v1143_v40 }
 0x250   : > { %v1441_v9 = vpop.permute.xlu0 %1440 }
 0x251   : > { %v1541_v24 = vpop.permute.xlu1 %1540  ;;  %v1878_v21 = vsel %vm1850_vm8, %v1845_v0, %v1441_v9 }
 0x252   : > { %v1910_v57 = vsel %vm1883_vm9, %v1877_v15, %v1541_v24 }
 0x254   : > { %v1145_v26 = vpop.permute.xlu0 %1144 }
 0x255   : > { %v1245_v59 = vpop.permute.xlu1 %1244  ;;  %v4459_v37 = vpop.f32.mrb[10].mxu0 }
 0x256   : > { %2494 = vst.msk [vmem:[%s4138_s23 + $0x58] sm:$0xff] %vm1685_vm4, %v4459_v37  ;;  %v4465_v49 = vpop.f32.mrb[11].mxu0  ;;  %v2301_v19 = vsel %vm1685_vm4, %v4459_v37, 0.0  ;;  %v1813_v9 = vsel %vm1784_vm6, %v1780_v38, %v1245_v59 }
 0x257   : > { %v2299_v48 = vsel %vm1685_vm4, %v4465_v49, 0.0  ;;  %2493 = vst.msk [vmem:[%s4138_s23 + $0x50] sm:$0xff] %vm1685_vm4, %v4465_v49 }
 0x258   : > { %v2300_v51 = vadd.f32 %v2299_v48, %v2298_v54  ;;  %v1543_v52 = vpop.permute.xlu0 %1542 }
 0x259   : > { %v1642_v8 = vpop.permute.xlu1 %1641  ;;  %v1911_v29 = vsel %vm1883_vm9, %v1878_v21, %v1543_v52 }
 0x25a   : > { %v1943_v18 = vsel %vm1916_vm10, %v1910_v57, %v1642_v8  ;;  %v2302_v63 = vadd.f32 %v2301_v19, %v2300_v51  ;;  %v1748_v51 = vsel %vm1718_vm3, %v1715_v39, %v4452_v50 }
 0x25b   : > { %2851 = vmatprep.mubr.msk.f32.mxu1 %vm1958_vm11, %v1943_v18  ;;  %v1781_v52 = vsel %vm1751_vm5, %v1748_v51, %v1145_v26  ;;  %v1716_v26 = vsel %vm1685_vm4, %v4948_v6, %v4965_v7 }
 0x25c   : > { %v1247_v25 = vpop.permute.xlu0 %1246 }
 0x25d   : > { %v1346_v36 = vpop.permute.xlu1 %1345  ;;  %v1814_v19 = vsel %vm1784_vm6, %v1781_v52, %v1247_v25  ;;  %v4966_v25 = vld [vmem:[#allocation55_spill] sm:$0xff] }
 0x25e   : > { %v1846_v5 = vsel %vm1817_vm7, %v1813_v9, %v1346_v36  ;;  %v1717_v36 = vsel %vm1685_vm4, %v4949_v17, %v4966_v25 }
 0x260   : > { %v1644_v30 = vpop.permute.xlu0 %1643 }
 0x261   : > { %v1050_v54 = vpop.permute.xlu1 %1049  ;;  %v1944_v60 = vsel %vm1916_vm10, %v1911_v29, %v1644_v30 }
 0x262   : > { %2852 = vmatmul.mubr.msk.f32.gmra.mrb[10].mxu1 %vm1958_vm11, %v1944_v60  ;;  %v1749_v0 = vsel %vm1718_vm3, %v1716_v26, %v1050_v54 }
 0x264   : > { %v1348_v23 = vpop.permute.xlu0 %1347 }
 0x265   : > { %v1443_v27 = vpop.permute.xlu1 %1442  ;;  %v1847_v31 = vsel %vm1817_vm7, %v1814_v19, %v1348_v23 }
 0x266   : > { %v1879_v13 = vsel %vm1850_vm8, %v1846_v5, %v1443_v27 }
 0x268   : > { %v1052_v55 = vpop.permute.xlu0 %1051 }
 0x269   : > { %v1147_v32 = vpop.permute.xlu1 %1146  ;;  %v1750_v29 = vsel %vm1718_vm3, %v1717_v36, %v1052_v55 }
 0x26a   : > { %v1782_v21 = vsel %vm1751_vm5, %v1749_v0, %v1147_v32 }
 0x26c   : > { %v1445_v20 = vpop.permute.xlu0 %1444 }
 0x26d   : > { %v1545_v11 = vpop.permute.xlu1 %1544  ;;  %v1880_v47 = vsel %vm1850_vm8, %v1847_v31, %v1445_v20 }
 0x26e   : > { %v1912_v58 = vsel %vm1883_vm9, %v1879_v13, %v1545_v11 }
 0x270   : > { %v1149_v10 = vpop.permute.xlu0 %1148 }
 0x271   : > { %v1249_v43 = vpop.permute.xlu1 %1248  ;;  %v4496_v12 = vpop.f32.mrb[12].mxu0  ;;  %v1783_v23 = vsel %vm1751_vm5, %v1750_v29, %v1149_v10 }
 0x272   : > { %2496 = vst.msk [vmem:[%s4138_s23 + $0x68] sm:$0xff] %vm1685_vm4, %v4496_v12  ;;  %v4502_v24 = vpop.f32.mrb[13].mxu0  ;;  %v2305_v28 = vsel %vm1685_vm4, %v4496_v12, 0.0  ;;  %v1815_v60 = vsel %vm1784_vm6, %v1782_v21, %v1249_v43 }
 0x273   : > { %v2303_v33 = vsel %vm1685_vm4, %v4502_v24, 0.0  ;;  %2495 = vst.msk [vmem:[%s4138_s23 + $0x60] sm:$0xff] %vm1685_vm4, %v4502_v24 }
 0x274   : > { %v2304_v40 = vadd.f32 %v2303_v33, %v2302_v63  ;;  %v1547_v62 = vpop.permute.xlu0 %1546 }
 0x275   : > { %v1646_v59 = vpop.permute.xlu1 %1645  ;;  %v1913_v42 = vsel %vm1883_vm9, %v1880_v47, %v1547_v62 }
 0x276   : > { %v1945_v48 = vsel %vm1916_vm10, %v1912_v58, %v1646_v59  ;;  %v2306_v15 = vadd.f32 %v2305_v28, %v2304_v40 }
 0x277   : > { %2854 = vmatprep.mubr.msk.f32.mxu1 %vm1958_vm11, %v1945_v48 }
 0x278   : > { %v1251_v57 = vpop.permute.xlu0 %1250 }
 0x279   : > { %v1350_v8 = vpop.permute.xlu1 %1349  ;;  %v1816_v6 = vsel %vm1784_vm6, %v1783_v23, %v1251_v57 }
 0x27a   : > { %v1848_v20 = vsel %vm1817_vm7, %v1815_v60, %v1350_v8 }
 0x27c   : > { %v1648_v18 = vpop.permute.xlu0 %1647 }
 0x27d   : > { %v1352_v63 = vpop.permute.xlu1 %1351  ;;  %v1946_v46 = vsel %vm1916_vm10, %v1913_v42, %v1648_v18 }
 0x27e   : > { %2855 = vmatmul.mubr.msk.f32.gmra.mrb[12].mxu1 %vm1958_vm11, %v1946_v46  ;;  %v1849_v17 = vsel %vm1817_vm7, %v1816_v6, %v1352_v63 }
 0x280   : > { %v1447_v50 = vpop.permute.xlu0 %1446 }
 0x281   : > { %v1449_v4 = vpop.permute.xlu1 %1448  ;;  %v1881_v54 = vsel %vm1850_vm8, %v1848_v20, %v1447_v50 }
 0x282   : > { %v1882_v32 = vsel %vm1850_vm8, %v1849_v17, %v1449_v4 }
 0x284   : > { %v1549_v30 = vpop.permute.xlu0 %1548 }
 0x285   : > { %v1551_v27 = vpop.permute.xlu1 %1550  ;;  %v1914_v55 = vsel %vm1883_vm9, %v1881_v54, %v1549_v30 }
 0x286   : > { %v1915_v14 = vsel %vm1883_vm9, %v1882_v32, %v1551_v27 }
 0x288   : > { %v1650_v11 = vpop.permute.xlu0 %1649 }
 0x289   : > { %v1652_v3 = vpop.permute.xlu1 %1651  ;;  %v1947_v34 = vsel %vm1916_vm10, %v1914_v55, %v1650_v11 }
 0x28a   : > { %v1948_v10 = vsel %vm1916_vm10, %v1915_v14, %v1652_v3  ;;  %2857 = vmatprep.mubr.msk.f32.mxu1 %vm1958_vm11, %v1947_v34 }
 0x28b   : > { %2858 = vmatmul.mubr.msk.f32.gmra.mrb[14].mxu1 %vm1958_vm11, %v1948_v10 }
 0x28d   : > { %v4550_v38 = vpop.f32.mrb[14].mxu0 }
 0x28e   : > { %2498 = vst.msk [vmem:[%s4138_s23 + $0x78] sm:$0xff] %vm1685_vm4, %v4550_v38  ;;  %v4555_v43 = vpop.f32.mrb[15].mxu0  ;;  %v2309_v33 = vsel %vm1685_vm4, %v4550_v38, 0.0 }
 0x28f   : > { %v2307_v9 = vsel %vm1685_vm4, %v4555_v43, 0.0  ;;  %2497 = vst.msk [vmem:[%s4138_s23 + $0x70] sm:$0xff] %vm1685_vm4, %v4555_v43 }
 0x290   : > { %v2308_v5 = vadd.f32 %v2307_v9, %v2306_v15 }
 0x292   : > { %v2310_v13 = vadd.f32 %v2309_v33, %v2308_v5 }
 0x2a9   : > { %v4564_v40 = vpop.f32.mrb[0].mxu1 }
 0x2aa   : > { %2500 = vst.msk [vmem:[%s4138_s23 + $0x88] sm:$0xff] %vm1685_vm4, %v4564_v40  ;;  %v4569_v62 = vpop.f32.mrb[1].mxu1  ;;  %v2313_v59 = vsel %vm1685_vm4, %v4564_v40, 0.0 }
 0x2ab   : > { %v2311_v58 = vsel %vm1685_vm4, %v4569_v62, 0.0  ;;  %2499 = vst.msk [vmem:[%s4138_s23 + $0x80] sm:$0xff] %vm1685_vm4, %v4569_v62 }
 0x2ac   : > { %v2312_v28 = vadd.f32 %v2311_v58, %v2310_v13 }
 0x2ae   : > { %v2314_v22 = vadd.f32 %v2313_v59, %v2312_v28 }
 0x2c5   : > { %v4578_v39 = vpop.f32.mrb[2].mxu1 }
 0x2c6   : > { %2502 = vst.msk [vmem:[%s4138_s23 + $0x98] sm:$0xff] %vm1685_vm4, %v4578_v39  ;;  %v4583_v48 = vpop.f32.mrb[3].mxu1  ;;  %v2317_v52 = vsel %vm1685_vm4, %v4578_v39, 0.0 }
 0x2c7   : > { %v2315_v15 = vsel %vm1685_vm4, %v4583_v48, 0.0  ;;  %2501 = vst.msk [vmem:[%s4138_s23 + $0x90] sm:$0xff] %vm1685_vm4, %v4583_v48 }
 0x2c8   : > { %v2316_v51 = vadd.f32 %v2315_v15, %v2314_v22 }
 0x2ca   : > { %v2318_v57 = vadd.f32 %v2317_v52, %v2316_v51 }
 0x2e1   : > { %v4592_v19 = vpop.f32.mrb[4].mxu1 }
 0x2e2   : > { %2504 = vst.msk [vmem:[%s4138_s23 + $0xa8] sm:$0xff] %vm1685_vm4, %v4592_v19  ;;  %v4597_v8 = vpop.f32.mrb[5].mxu1  ;;  %v2321_v42 = vsel %vm1685_vm4, %v4592_v19, 0.0 }
 0x2e3   : > { %v2319_v31 = vsel %vm1685_vm4, %v4597_v8, 0.0  ;;  %2503 = vst.msk [vmem:[%s4138_s23 + $0xa0] sm:$0xff] %vm1685_vm4, %v4597_v8 }
 0x2e4   : > { %v2320_v47 = vadd.f32 %v2319_v31, %v2318_v57 }
 0x2e6   : > { %v2322_v18 = vadd.f32 %v2321_v42, %v2320_v47 }
 0x2fd   : > { %v4606_v63 = vpop.f32.mrb[6].mxu1 }
 0x2fe   : > { %2506 = vst.msk [vmem:[%s4138_s23 + $0xb8] sm:$0xff] %vm1685_vm4, %v4606_v63  ;;  %v4611_v46 = vpop.f32.mrb[7].mxu1  ;;  %v2325_v7 = vsel %vm1685_vm4, %v4606_v63, 0.0 }
 0x2ff   : > { %v2323_v50 = vsel %vm1685_vm4, %v4611_v46, 0.0  ;;  %2505 = vst.msk [vmem:[%s4138_s23 + $0xb0] sm:$0xff] %vm1685_vm4, %v4611_v46 }
 0x300   : > { %v2324_v4 = vadd.f32 %v2323_v50, %v2322_v18 }
 0x302   : > { %v2326_v26 = vadd.f32 %v2325_v7, %v2324_v4 }
 0x319   : > { %v4620_v25 = vpop.f32.mrb[8].mxu1 }
 0x31a   : > { %2508 = vst.msk [vmem:[%s4138_s23 + $0xc8] sm:$0xff] %vm1685_vm4, %v4620_v25  ;;  %v4625_v36 = vpop.f32.mrb[9].mxu1  ;;  %v2329_v29 = vsel %vm1685_vm4, %v4620_v25, 0.0 }
 0x31b   : > { %v2327_v0 = vsel %vm1685_vm4, %v4625_v36, 0.0  ;;  %2507 = vst.msk [vmem:[%s4138_s23 + $0xc0] sm:$0xff] %vm1685_vm4, %v4625_v36 }
 0x31c   : > { %v2328_v21 = vadd.f32 %v2327_v0, %v2326_v26 }
 0x31e   : > { %v2330_v30 = vadd.f32 %v2329_v29, %v2328_v21 }
 0x335   : > { %v4634_v60 = vpop.f32.mrb[10].mxu1 }
 0x336   : > { %2510 = vst.msk [vmem:[%s4138_s23 + $0xd8] sm:$0xff] %vm1685_vm4, %v4634_v60  ;;  %v4639_v23 = vpop.f32.mrb[11].mxu1  ;;  %v2333_v6 = vsel %vm1685_vm4, %v4634_v60, 0.0 }
 0x337   : > { %v2331_v27 = vsel %vm1685_vm4, %v4639_v23, 0.0  ;;  %2509 = vst.msk [vmem:[%s4138_s23 + $0xd0] sm:$0xff] %vm1685_vm4, %v4639_v23 }
 0x338   : > { %v2332_v20 = vadd.f32 %v2331_v27, %v2330_v30 }
 0x33a   : > { %v2334_v17 = vadd.f32 %v2333_v6, %v2332_v20 }
 0x351   : > { %v4648_v54 = vpop.f32.mrb[12].mxu1 }
 0x352   : > { %2512 = vst.msk [vmem:[%s4138_s23 + $0xe8] sm:$0xff] %vm1685_vm4, %v4648_v54  ;;  %v4653_v32 = vpop.f32.mrb[13].mxu1  ;;  %v2337_v14 = vsel %vm1685_vm4, %v4648_v54, 0.0 }
 0x353   : > { %v2335_v55 = vsel %vm1685_vm4, %v4653_v32, 0.0  ;;  %2511 = vst.msk [vmem:[%s4138_s23 + $0xe0] sm:$0xff] %vm1685_vm4, %v4653_v32 }
 0x354   : > { %v2336_v11 = vadd.f32 %v2335_v55, %v2334_v17 }
 0x356   : > { %v2338_v3 = vadd.f32 %v2337_v14, %v2336_v11 }
 0x35e   : > { %v4662_v34 = vpop.f32.mrb[14].mxu1 }
 0x35f   : > { %2514 = vst.msk [vmem:[%s4138_s23 + $0xf8] sm:$0xff] %vm1685_vm4, %v4662_v34  ;;  %v4667_v10 = vpop.f32.mrb[15].mxu1  ;;  %v2341_v33 = vsel %vm1685_vm4, %v4662_v34, 0.0 }
 0x360   : > { %v2339_v9 = vsel %vm1685_vm4, %v4667_v10, 0.0  ;;  %2513 = vst.msk [vmem:[%s4138_s23 + $0xf0] sm:$0xff] %vm1685_vm4, %v4667_v10 }
 0x361   : > { %v2340_v5 = vadd.f32 %v2339_v9, %v2338_v3 }
 0x363   : > { %v2342_v13 = vadd.f32 %v2341_v33, %v2340_v5 }
 0x365   : > { %v2343_v58 = vrot.slane %v2342_v13, 4 }
 0x367   : > { %v2344_v28 = vadd.f32 %v2343_v58, %v2342_v13 }
 0x369   : > { %v2345_v59 = vrot.slane %v2344_v28, 2 }
 0x36b   : > { %v2346_v22 = vadd.f32 %v2345_v59, %v2344_v28 }
 0x36d   : > { %v2347_v15 = vrot.slane %v2346_v22, 1 }
 0x36f   : > { %v4676_v51 = vadd.f32 %v2347_v15, %v2346_v22 }
 0x371   : > { %v4679_v52 = vmul.f32 0.00390625, %v4676_v51 }
 0x373   : > { %v2350_v57 = vsub.f32 %v4153_v2, %v4679_v52  ;;  %v2351_v31 = vsub.f32 %v4143_v1, %v4679_v52  ;;  %v2352_v47 = vsub.f32 %v4220_v56, %v4679_v52  ;;  %v2353_v42 = vsub.f32 %v4214_v35, %v4679_v52 }
 0x374   : > { %v2354_v4 = vsub.f32 %v4314_v53, %v4679_v52  ;;  %v2355_v26 = vsub.f32 %v4307_v61, %v4679_v52  ;;  %v2356_v56 = vsub.f32 %v4384_v41, %v4679_v52  ;;  %v2357_v53 = vsub.f32 %v4377_v45, %v4679_v52 }
 0x375   : > { %v2382_v18 = vmul.f32 %v2350_v57, %v2350_v57  ;;  %v2383_v50 = vmul.f32 %v2351_v31, %v2351_v31  ;;  %v2384_v7 = vmul.f32 %v2352_v47, %v2352_v47  ;;  %v2385_v0 = vmul.f32 %v2353_v42, %v2353_v42 }
 0x376   : > { %v2386_v29 = vmul.f32 %v2354_v4, %v2354_v4  ;;  %v2387_v27 = vmul.f32 %v2355_v26, %v2355_v26  ;;  %v2358_v6 = vsub.f32 %v4426_v16, %v4679_v52  ;;  %v2388_v17 = vmul.f32 %v2356_v56, %v2356_v56 }
 0x377   : > { %v2414_v2 = vsel %vm1685_vm4, %v2382_v18, 0.0  ;;  %v2415_v1 = vsel %vm1685_vm4, %v2383_v50, 0.0  ;;  %v2417_v35 = vsel %vm1685_vm4, %v2384_v7, 0.0  ;;  %v2419_v20 = vsel %vm1685_vm4, %v2385_v0, 0.0 }
 0x378   : > { %v2416_v21 = vadd.f32 %v2415_v1, %v2414_v2  ;;  %v2421_v55 = vsel %vm1685_vm4, %v2386_v29, 0.0  ;;  %v2359_v41 = vsub.f32 %v4420_v44, %v4679_v52  ;;  %v2389_v14 = vmul.f32 %v2357_v53, %v2357_v53 }
 0x379   : > { %v2423_v3 = vsel %vm1685_vm4, %v2387_v27, 0.0  ;;  %v2360_v45 = vsub.f32 %v4465_v49, %v4679_v52  ;;  %v2390_v5 = vmul.f32 %v2358_v6, %v2358_v6  ;;  %v2425_v33 = vsel %vm1685_vm4, %v2388_v17, 0.0 }
 0x37a   : > { %v2418_v30 = vadd.f32 %v2417_v35, %v2416_v21  ;;  %v2361_v16 = vsub.f32 %v4459_v37, %v4679_v52  ;;  %v2391_v58 = vmul.f32 %v2359_v41, %v2359_v41  ;;  %v2427_v28 = vsel %vm1685_vm4, %v2389_v14, 0.0 }
 0x37b   : > { %v2362_v44 = vsub.f32 %v4502_v24, %v4679_v52  ;;  %v2392_v22 = vmul.f32 %v2360_v45, %v2360_v45  ;;  %v2429_v15 = vsel %vm1685_vm4, %v2390_v5, 0.0  ;;  %v2363_v49 = vsub.f32 %v4496_v12, %v4679_v52 }
 0x37c   : > { %v2420_v61 = vadd.f32 %v2419_v20, %v2418_v30  ;;  %v2393_v31 = vmul.f32 %v2361_v16, %v2361_v16  ;;  %v2431_v47 = vsel %vm1685_vm4, %v2391_v58, 0.0  ;;  %v2364_v37 = vsub.f32 %v4555_v43, %v4679_v52 }
 0x37d   : > { %v2394_v18 = vmul.f32 %v2362_v44, %v2362_v44  ;;  %v2433_v50 = vsel %vm1685_vm4, %v2392_v22, 0.0  ;;  %v2365_v24 = vsub.f32 %v4550_v38, %v4679_v52  ;;  %v2395_v7 = vmul.f32 %v2363_v49, %v2363_v49 }
 0x37e   : > { %v2422_v11 = vadd.f32 %v2421_v55, %v2420_v61  ;;  %v2435_v26 = vsel %vm1685_vm4, %v2393_v31, 0.0  ;;  %v2366_v12 = vsub.f32 %v4569_v62, %v4679_v52  ;;  %v2396_v2 = vmul.f32 %v2364_v37, %v2364_v37 }
 0x37f   : > { %v2437_v1 = vsel %vm1685_vm4, %v2394_v18, 0.0  ;;  %v2367_v43 = vsub.f32 %v4564_v40, %v4679_v52  ;;  %v2397_v56 = vmul.f32 %v2365_v24, %v2365_v24  ;;  %v2439_v29 = vsel %vm1685_vm4, %v2395_v7, 0.0 }
 0x380   : > { %v2424_v9 = vadd.f32 %v2423_v3, %v2422_v11  ;;  %v2368_v38 = vsub.f32 %v4583_v48, %v4679_v52  ;;  %v2398_v30 = vmul.f32 %v2366_v12, %v2366_v12  ;;  %v2441_v53 = vsel %vm1685_vm4, %v2396_v2, 0.0 }
 0x381   : > { %v2369_v62 = vsub.f32 %v4578_v39, %v4679_v52  ;;  %v2399_v20 = vmul.f32 %v2367_v43, %v2367_v43  ;;  %v2443_v61 = vsel %vm1685_vm4, %v2397_v56, 0.0  ;;  %v2370_v40 = vsub.f32 %v4597_v8, %v4679_v52 }
 0x382   : > { %v2426_v13 = vadd.f32 %v2425_v33, %v2424_v9  ;;  %v2400_v17 = vmul.f32 %v2368_v38, %v2368_v38  ;;  %v2445_v55 = vsel %vm1685_vm4, %v2398_v30, 0.0  ;;  %v2371_v48 = vsub.f32 %v4592_v19, %v4679_v52 }
 0x383   : > { %v2401_v41 = vmul.f32 %v2369_v62, %v2369_v62  ;;  %v2447_v14 = vsel %vm1685_vm4, %v2399_v20, 0.0  ;;  %v2372_v39 = vsub.f32 %v4611_v46, %v4679_v52  ;;  %v2402_v9 = vmul.f32 %v2370_v40, %v2370_v40 }
 0x384   : > { %v2428_v59 = vadd.f32 %v2427_v28, %v2426_v13  ;;  %v2449_v45 = vsel %vm1685_vm4, %v2400_v17, 0.0  ;;  %v2373_v8 = vsub.f32 %v4606_v63, %v4679_v52  ;;  %v2403_v33 = vmul.f32 %v2371_v48, %v2371_v48 }
 0x385   : > { %v2451_v13 = vsel %vm1685_vm4, %v2401_v41, 0.0  ;;  %v2374_v19 = vsub.f32 %v4625_v36, %v4679_v52  ;;  %v2404_v58 = vmul.f32 %v2372_v39, %v2372_v39  ;;  %v2453_v28 = vsel %vm1685_vm4, %v2402_v9, 0.0 }
 0x386   : > { %v2430_v57 = vadd.f32 %v2429_v15, %v2428_v59  ;;  %v2375_v46 = vsub.f32 %v4620_v25, %v4679_v52  ;;  %v2405_v44 = vmul.f32 %v2373_v8, %v2373_v8  ;;  %v2455_v22 = vsel %vm1685_vm4, %v2403_v33, 0.0 }
 0x387   : > { %v2376_v63 = vsub.f32 %v4639_v23, %v4679_v52  ;;  %v2457_v49 = vsel %vm1685_vm4, %v2404_v58, 0.0  ;;  %v2377_v36 = vsub.f32 %v4634_v60, %v4679_v52  ;;  %v2378_v25 = vsub.f32 %v4653_v32, %v4679_v52 }
 0x388   : > { %v2432_v42 = vadd.f32 %v2431_v47, %v2430_v57  ;;  %v2406_v57 = vmul.f32 %v2374_v19, %v2374_v19  ;;  %v2407_v47 = vmul.f32 %v2375_v46, %v2375_v46  ;;  %v2379_v23 = vsub.f32 %v4648_v54, %v4679_v52 }
 0x389   : > { %v2408_v18 = vmul.f32 %v2376_v63, %v2376_v63  ;;  %v2409_v24 = vmul.f32 %v2377_v36, %v2377_v36  ;;  %v2380_v60 = vsub.f32 %v4667_v10, %v4679_v52  ;;  %v2381_v32 = vsub.f32 %v4662_v34, %v4679_v52 }
 0x38a   : > { %v2434_v4 = vadd.f32 %v2433_v50, %v2432_v42  ;;  %v2459_v42 = vsel %vm1685_vm4, %v2405_v44, 0.0  ;;  %v2461_v50 = vsel %vm1685_vm4, %v2406_v57, 0.0  ;;  %v2463_v7 = vsel %vm1685_vm4, %v2407_v47, 0.0 }
 0x38b   : > { %v2465_v12 = vsel %vm1685_vm4, %v2408_v18, 0.0  ;;  %v2412_v54 = vmul.f32 %v2380_v60, %v2380_v60 }
 0x38c   : > { %v2436_v0 = vadd.f32 %v2435_v26, %v2434_v4 }
 0x38d   : > { %v2473_v30 = vsel %vm1685_vm4, %v2412_v54, 0.0 }
 0x38e   : > { %v2438_v21 = vadd.f32 %v2437_v1, %v2436_v0  ;;  %v2410_v0 = vmul.f32 %v2378_v25, %v2378_v25  ;;  %v2411_v1 = vmul.f32 %v2379_v23, %v2379_v23 }
 0x390   : > { %v2440_v35 = vadd.f32 %v2439_v29, %v2438_v21  ;;  %v2467_v21 = vsel %vm1685_vm4, %v2409_v24, 0.0  ;;  %v2469_v56 = vsel %vm1685_vm4, %v2410_v0, 0.0  ;;  %v2471_v38 = vsel %vm1685_vm4, %v2411_v1, 0.0 }
 0x392   : > { %v2442_v27 = vadd.f32 %v2441_v53, %v2440_v35  ;;  %v2413_v35 = vmul.f32 %v2381_v32, %v2381_v32 }
 0x394   : > { %v2444_v6 = vadd.f32 %v2443_v61, %v2442_v27  ;;  %v2475_v27 = vsel %vm1685_vm4, %v2413_v35, 0.0 }
 0x396   : > { %v2446_v11 = vadd.f32 %v2445_v55, %v2444_v6 }
 0x398   : > { %v2448_v3 = vadd.f32 %v2447_v14, %v2446_v11 }
 0x39a   : > { %v2450_v5 = vadd.f32 %v2449_v45, %v2448_v3 }
 0x39c   : > { %v2452_v16 = vadd.f32 %v2451_v13, %v2450_v5 }
 0x39e   : > { %v2454_v59 = vadd.f32 %v2453_v28, %v2452_v16 }
 0x3a0   : > { %v2456_v15 = vadd.f32 %v2455_v22, %v2454_v59 }
 0x3a2   : > { %v2458_v31 = vadd.f32 %v2457_v49, %v2456_v15 }
 0x3a4   : > { %v2460_v37 = vadd.f32 %v2459_v42, %v2458_v31 }
 0x3a6   : > { %v2462_v4 = vadd.f32 %v2461_v50, %v2460_v37 }
 0x3a8   : > { %v2464_v26 = vadd.f32 %v2463_v7, %v2462_v4 }
 0x3aa   : > { %v2466_v2 = vadd.f32 %v2465_v12, %v2464_v26 }
 0x3ac   : > { %v2468_v43 = vadd.f32 %v2467_v21, %v2466_v2 }
 0x3ae   : > { %v2470_v29 = vadd.f32 %v2469_v56, %v2468_v43 }
 0x3b0   : > { %v2472_v10 = vadd.f32 %v2471_v38, %v2470_v29 }
 0x3b2   : > { %v2474_v53 = vadd.f32 %v2473_v30, %v2472_v10 }
 0x3b4   : > { %v2476_v62 = vadd.f32 %v2475_v27, %v2474_v53 }
 0x3b6   : > { %v2477_v34 = vrot.slane %v2476_v62, 4 }
 0x3b8   : > { %v2478_v52 = vadd.f32 %v2477_v34, %v2476_v62 }
 0x3ba   : > { %v2479_v20 = vrot.slane %v2478_v52, 2 }
 0x3bc   : > { %v2480_v61 = vadd.f32 %v2479_v20, %v2478_v52 }
 0x3be   : > { %v2481_v6 = vrot.slane %v2480_v61, 1 }
 0x3c0   : > { %v2482_v40 = vadd.f32 %v2481_v6, %v2480_v61 }
 0x3c2   : > { %v2515_v17 = vsel %vm520_vm0, %v4676_v51, %v2482_v40 }
 0x3c3   : > { %2517 = vst.msk [vmem:[%s411_s17] sm:$0x3] %vm2516_vm12, %v2515_v17 }
 0x3c4 PF: > { %s16_s20 = sadd.s32 1, %s2940_s20   ;;  %s4967_s18 = smov %s2936_s19 }
 0x3c5   : > { %p13_p5 = scmp.ge.s32.totalorder %s16_s20, 4   ;;  %s4968_s19 = smov %s4970_s21 }
 0x3c7   :  { %15 = sbr.rel (!%p13_p5) target bundleno = 2 (0x2), region = 84 }

// kernel: residule_block.4
= control target key start
LH: loop header
LB: loop body
LE: loop exit
PB: predicated region body
PF: predicated region fallthrough
CT: control target
= control target key end

     0   :  { %s3210_s27 = smov 0   ;;  %s3212_s28 = smov 0   ;;  %s5139_s0 = inlined_call_operand.vmem [shape: f32[2,16,16,8], index: 0, kind: input, shape index: {}, may-alias: {0,1,2}]   ;;  %s5140_s1 = inlined_call_operand.vmem [shape: f32[2,16,16,8], index: 1, kind: input, shape index: {}, may-alias: {0,1,2}]   ;;  %s5141_s2 = inlined_call_operand.vmem [shape: f32[2,16,16,8], index: 2, kind: input, shape index: {}, may-alias: {0,1,2}]   ;;  %s5142_s3 = inlined_call_operand.vmem [shape: f32[72,8], index: 3, kind: input, shape index: {}]   ;;  %s5143_s4 = inlined_call_operand.vmem [shape: f32[1,8], index: 4, kind: input, shape index: {}]   ;;  %s5144_s5 = inlined_call_operand.vmem [shape: f32[1,8], index: 5, kind: input, shape index: {}]   ;;  %s5145_s6 = inlined_call_operand.vmem [shape: f32[1,8], index: 6, kind: input, shape index: {}]   ;;  %s5146_s7 = inlined_call_operand.vmem [shape: f32[2,16,16,8], index: 7, kind: output, shape index: {0}]   ;;  %s5147_s8 = inlined_call_operand.vmem [shape: f32[2,1,2,8], index: 8, kind: output, shape index: {1}]  }
   0x1   :  { %s3214_s29 = smov 0  }
   0x2 LB: > { %s31_s30 = sadd.s32 1, %s3151_s28  ;;  %p2911_p0 = scmp.ge.s32.totalorder %s3155_s29, 1  ;;  %s3155_s29 = sphi %s3214_s29, %s19_s29   ;;  %s3151_s28 = sphi %s3212_s28, %s5318_s28   ;;  %s3147_s27 = sphi %s3210_s27, %s5317_s27  }
   0x3   : > { %p33_p1 = scmp.ge.s32.totalorder %s31_s30, 2  ;;  %p353_p2 = scmp.lt.s32.totalorder %s3155_s29, 3 }
   0x5   : > { %s5320_s30 = smov (%p33_p1, %s31_s30), 0  ;;  %p354_p3 = pnand %p2911_p0, %p353_p2 }
   0x7   : > { %357 = sbr.rel (%p354_p3) target bundleno = 978 (0x3d2), region = 48 }
   0xe   : > { %p434_p4 = scmp.lt.s32.totalorder %s3147_s27, 1  ;;  %v3236_v0 = vld [vmem:[%s5144_s5] ss:$0 sm:$0xff]  ;;  %vm723_vm0 = vcmask 1040384   ;;  %vm934_vm1 = vcmask 1046528   ;;  %s3157_s18 = smov 8  }
   0xf   : > { %v3247_v1 = vld [vmem:[%s5145_s6] ss:$0 sm:$0xff]  ;;  %vm1111_vm2 = vcmask 1045504   ;;  %s3158_s22 = smov 16   ;;  %s3159_s10 = smov 24   ;;  %vm1921_vm3 = vcmask 130048  }
  0x10   : > { %s5322_s27 = smov (!%p434_p4, %s3147_s27), 1  ;;  %s3160_s16 = smov 32   ;;  %vm1888_vm4 = vcmask 64512   ;;  %vm1954_vm5 = vcmask 195584   ;;  %vm1987_vm6 = vcmask 261120   ;;  %vm2020_vm7 = vcmask 326656  }
  0x11   : > { %s3231_s9 = sshll.u32 %s5322_s27, 8  ;;  %s3162_s11 = smov 48   ;;  %vm2053_vm8 = vcmask 392192   ;;  %vm2086_vm9 = vcmask 457728   ;;  %vm2119_vm10 = vcmask 523264   ;;  %vm2168_vm11 = vcmask 588800  }
  0x12   : > { %s3242_s14 = scalar_lea.vmem %s5140_s1, %s3231_s9  ;;  %s2959_s17 = sadd.s32 16, %s3231_s9  ;;  %vm2726_vm12 = vcmask 58368  }
  0x13   : > { %v497_v2 = vld [vmem:[%s3242_s14 + $0x10] sm:$0xff]  ;;  %v498_v3 = vld [vmem:[%s3242_s14 + $0x18] sm:$0xff]  ;;  %v495_v4 = vld [vmem:[%s3242_s14] sm:$0xff]  ;;  %s442_s21 = scalar_lea.vmem %s5139_s0, %s2959_s17  ;;  %s3163_s15 = smov 56  }
  0x14   : > { %v540_v5 = vmul.f32 %v3236_v0, %v497_v2  ;;  %v541_v6 = vmul.f32 %v3236_v0, %v498_v3  ;;  %v496_v7 = vld [vmem:[%s3242_s14 + $0x8] sm:$0xff]  ;;  %v538_v8 = vmul.f32 %v3236_v0, %v495_v4  ;;  %v499_v9 = vld [vmem:[%s3242_s14 + $0x20] sm:$0xff]  ;;  %v501_v14 = vld [vmem:[%s3242_s14 + $0x30] sm:$0xff]  ;;  %s3164_s17 = smov 64   ;;  %s4443_s24 = scalar_lea.vmem %s5146_s7, %s3231_s9 }
  0x15   : > { %v500_v10 = vld [vmem:[%s3242_s14 + $0x28] sm:$0xff]  ;;  %v539_v11 = vmul.f32 %v3236_v0, %v496_v7  ;;  %v542_v12 = vmul.f32 %v3236_v0, %v499_v9  ;;  %v502_v15 = vld [vmem:[%s3242_s14 + $0x38] sm:$0xff]  ;;  %v544_v19 = vmul.f32 %v3236_v0, %v501_v14  ;;  %v503_v52 = vld [vmem:[%s3242_s14 + $0x40] sm:$0xff]  ;;  %s2962_s13 = sadd.s32 224, %s3231_s9 }
  0x16   : > { %v543_v13 = vmul.f32 %v3236_v0, %v500_v10  ;;  %v583_v16 = vadd.f32 %v3247_v1, %v540_v5  ;;  %v584_v17 = vadd.f32 %v3247_v1, %v541_v6  ;;  %v581_v18 = vadd.f32 %v3247_v1, %v538_v8  ;;  %v504_v53 = vld [vmem:[%s3242_s14 + $0x48] sm:$0xff]  ;;  %s470_s9 = scalar_lea.vmem %s5141_s2, %s2962_s13 }
  0x17   : > { %v582_v20 = vadd.f32 %v3247_v1, %v539_v11  ;;  %v585_v21 = vadd.f32 %v3247_v1, %v542_v12  ;;  %v545_v23 = vmul.f32 %v3236_v0, %v502_v15  ;;  %v587_v27 = vadd.f32 %v3247_v1, %v544_v19  ;;  %v493_v12 = vld [vmem:[%s442_s21] sm:$0xff] }
  0x18   : > { %v586_v22 = vadd.f32 %v3247_v1, %v543_v13  ;;  %v619_v24 = vmax.f32 %v583_v16, 0.0  ;;  %v620_v25 = vmax.f32 %v584_v17, 0.0  ;;  %v617_v26 = vmax.f32 %v581_v18, 0.0 }
  0x19   : > { %v618_v28 = vmax.f32 %v582_v20, 0.0  ;;  %v621_v29 = vmax.f32 %v585_v21, 0.0  ;;  %v588_v31 = vadd.f32 %v3247_v1, %v545_v23  ;;  %v623_v60 = vmax.f32 %v587_v27, 0.0  ;;  %v494_v21 = vld [vmem:[%s442_s21 + $0x8] sm:$0xff]  ;;  %s3161_s21 = smov 40  }
  0x1a   : > { %v622_v30 = vmax.f32 %v586_v22, 0.0  ;;  %v671_v32 = vrot.slane %v619_v24, 1  ;;  %v730_v33 = vrot.slane %v619_v24, 7  ;;  %v731_v34 = vrot.slane %v620_v25, 7 }
  0x1b   : > { %v670_v35 = vrot.slane %v617_v26, 1  ;;  %v727_v36 = vrot.slane %v617_v26, 7  ;;  %v728_v37 = vrot.slane %v618_v28, 7  ;;  %v672_v38 = vrot.slane %v621_v29, 1  ;;  %v505_v26 = vld [vmem:[%s3242_s14 + $0x50] sm:$0xff] }
  0x1c   : > { %v733_v39 = vrot.slane %v621_v29, 7  ;;  %v3274_v40 = vsel %vm723_vm0, %v730_v33, %v731_v34  ;;  %v3277_v41 = vsel %vm723_vm0, %v671_v32, %v730_v33  ;;  %v734_v42 = vrot.slane %v622_v30, 7 }
  0x1d   : > { %v831_v43 = vrot.slane %v618_v28, 5  ;;  %v945_v44 = vrot.slane %v3277_v41, 1  ;;  %v946_v45 = vrot.slane %v3274_v40, 1  ;;  %v3282_v46 = vsel %vm723_vm0, %v727_v36, %v728_v37 }
  0x1e   : > { %v3285_v47 = vsel %vm723_vm0, %v670_v35, %v727_v36  ;;  %v941_v49 = vrot.slane %v3282_v46, 1  ;;  %v3291_v50 = vsel %vm723_vm0, %v733_v39, %v734_v42  ;;  %v3294_v51 = vsel %vm723_vm0, %v672_v38, %v733_v39  ;;  %v506_v35 = vld [vmem:[%s3242_s14 + $0x58] sm:$0xff] }
  0x1f   : > { %v940_v48 = vrot.slane %v3285_v47, 1  ;;  %v3299_v54 = vsel %vm934_vm1, %v945_v44, %v946_v45  ;;  %v950_v55 = vrot.slane %v3294_v51, 1  ;;  %v951_v56 = vrot.slane %v3291_v50, 1 }
  0x20   : > { %v3304_v57 = vsel %vm723_vm0, %v728_v37, %v831_v43  ;;  %1023 = vrot.lane.b32.xlu0 %v3299_v54, %s3157_s18  ;;  %v624_v61 = vmax.f32 %v588_v31, 0.0  ;;  %v832_v63 = vrot.slane %v620_v25, 5  ;;  %v546_v2 = vmul.f32 %v3236_v0, %v503_v52 }
  0x21   : > { %v3309_v58 = vsel %vm934_vm1, %v940_v48, %v941_v49  ;;  %v943_v59 = vrot.slane %v3304_v57, 1  ;;  %v3318_v62 = vsel %vm934_vm1, %v950_v55, %v951_v56  ;;  %v547_v3 = vmul.f32 %v3236_v0, %v504_v53 }
  0x22   : > { %1019 = vrot.lane.b32.xlu1 %v3309_v58, %s3157_s18  ;;  %v673_v5 = vrot.slane %v623_v60, 1  ;;  %v736_v6 = vrot.slane %v623_v60, 7  ;;  %v737_v7 = vrot.slane %v624_v61, 7  ;;  %v3326_v8 = vsel %vm723_vm0, %v731_v34, %v832_v63 }
  0x23   : > { %v3323_v4 = vsel %vm934_vm1, %v941_v49, %v943_v59  ;;  %v589_v9 = vadd.f32 %v3247_v1, %v546_v2  ;;  %v590_v10 = vadd.f32 %v3247_v1, %v547_v3  ;;  %v833_v11 = vrot.slane %v622_v30, 5  ;;  %v508_v59 = vld [vmem:[%s3242_s14 + $0x68] sm:$0xff] }
  0x24   : > { %1027 = vrot.lane.b32.xlu0 %v3318_v62, %s3157_s18  ;;  %v3333_v13 = vsel %vm723_vm0, %v736_v6, %v737_v7  ;;  %v3336_v14 = vsel %vm723_vm0, %v673_v5, %v736_v6  ;;  %v948_v15 = vrot.slane %v3326_v8, 1  ;;  %v834_v16 = vrot.slane %v624_v61, 5 }
  0x25   : > { %v955_v17 = vrot.slane %v3336_v14, 1  ;;  %v956_v18 = vrot.slane %v3333_v13, 1  ;;  %v625_v19 = vmax.f32 %v589_v9, 0.0  ;;  %v626_v20 = vmax.f32 %v590_v10, 0.0 }
  0x26   : > { %1021 = vrot.lane.b32.xlu1 %v3323_v4, %s3157_s18  ;;  %v3344_v22 = vsel %vm934_vm1, %v946_v45, %v948_v15  ;;  %v3347_v23 = vsel %vm723_vm0, %v734_v42, %v833_v11  ;;  %v3350_v24 = vsel %vm723_vm0, %v737_v7, %v834_v16  ;;  %v536_v25 = vmul.f32 %v3236_v0, %v493_v12  ;;  %v507_v42 = vld [vmem:[%s3242_s14 + $0x60] sm:$0xff] }
  0x27   : > { %v3355_v27 = vsel %vm934_vm1, %v955_v17, %v956_v18  ;;  %v674_v28 = vrot.slane %v625_v19, 1  ;;  %v739_v29 = vrot.slane %v625_v19, 7  ;;  %v740_v30 = vrot.slane %v626_v20, 7 }
  0x28   : > { %1031 = vrot.lane.b32.xlu0 %v3355_v27, %s3157_s18  ;;  %v953_v31 = vrot.slane %v3347_v23, 1  ;;  %v958_v32 = vrot.slane %v3350_v24, 1  ;;  %v537_v33 = vmul.f32 %v3236_v0, %v494_v21  ;;  %v579_v34 = vadd.f32 %v3247_v1, %v536_v25 }
  0x29   : > { %v3367_v36 = vsel %vm723_vm0, %v739_v29, %v740_v30  ;;  %v3370_v37 = vsel %vm723_vm0, %v674_v28, %v739_v29  ;;  %v835_v38 = vrot.slane %v626_v20, 5  ;;  %v548_v39 = vmul.f32 %v3236_v0, %v505_v26 }
  0x2a   : > { %1025 = vrot.lane.b32.xlu1 %v3344_v22, %s3157_s18  ;;  %v960_v43 = vrot.slane %v3370_v37, 1  ;;  %v961_v44 = vrot.slane %v3367_v36, 1  ;;  %v3377_v45 = vsel %vm934_vm1, %v951_v56, %v953_v31  ;;  %v3380_v48 = vsel %vm934_vm1, %v956_v18, %v958_v32 }
  0x2b   : > { %v580_v49 = vadd.f32 %v3247_v1, %v537_v33  ;;  %v615_v52 = vmax.f32 %v579_v34, 0.0  ;;  %v3384_v53 = vsel %vm723_vm0, %v740_v30, %v835_v38  ;;  %v549_v55 = vmul.f32 %v3236_v0, %v506_v35 }
  0x2c   : > { %v3389_v60 = vsel %vm934_vm1, %v960_v43, %v961_v44  ;;  %v963_v61 = vrot.slane %v3384_v53, 1  ;;  %v591_v56 = vadd.f32 %v3247_v1, %v548_v39  ;;  %v550_v63 = vmul.f32 %v3236_v0, %v507_v42  ;;  %v509_v42 = vld [vmem:[%s3242_s14 + $0x70] sm:$0xff]  ;;  %v510_v43 = vld [vmem:[%s3242_s14 + $0x78] sm:$0xff] }
  0x2d   : > { %1035 = vrot.lane.b32.xlu0 %v3389_v60, %s3157_s18  ;;  %v616_v2 = vmax.f32 %v580_v49, 0.0  ;;  %v669_v3 = vrot.slane %v615_v52, 1  ;;  %v724_v5 = vrot.slane %v615_v52, 7  ;;  %v592_v6 = vadd.f32 %v3247_v1, %v549_v55 }
  0x2e   : > { %1029 = vrot.lane.b32.xlu1 %v3377_v45, %s3157_s18  ;;  %v3400_v7 = vsel %vm934_vm1, %v961_v44, %v963_v61  ;;  %v627_v9 = vmax.f32 %v591_v56, 0.0  ;;  %v551_v10 = vmul.f32 %v3236_v0, %v508_v59  ;;  %v593_v11 = vadd.f32 %v3247_v1, %v550_v63  ;;  %v511_v59 = vld [vmem:[%s3242_s14 + $0x80] sm:$0xff] }
  0x2f   : > { %v725_v12 = vrot.slane %v616_v2, 7  ;;  %v3405_v15 = vsel %vm723_vm0, %v669_v3, %v724_v5  ;;  %v830_v16 = vrot.slane %v616_v2, 5  ;;  %v628_v17 = vmax.f32 %v592_v6, 0.0 }
  0x30   : > { %v935_v18 = vrot.slane %v3405_v15, 1  ;;  %v742_v19 = vrot.slane %v627_v9, 7  ;;  %v675_v20 = vrot.slane %v627_v9, 1  ;;  %v594_v21 = vadd.f32 %v3247_v1, %v551_v10  ;;  %v512_v10 = vld [vmem:[%s3242_s14 + $0x88] sm:$0xff] }
  0x31   : > { %v3412_v25 = vsel %vm723_vm0, %v724_v5, %v725_v12  ;;  %v3415_v26 = vsel %vm723_vm0, %v725_v12, %v830_v16  ;;  %v743_v28 = vrot.slane %v628_v17, 7  ;;  %v836_v29 = vrot.slane %v628_v17, 5 }
  0x32   : > { %1033 = vrot.lane.b32.xlu1 %v3380_v48, %s3157_s18  ;;  %v936_v30 = vrot.slane %v3412_v25, 1  ;;  %v938_v31 = vrot.slane %v3415_v26, 1  ;;  %v3420_v32 = vsel %vm723_vm0, %v675_v20, %v742_v19  ;;  %v629_v33 = vmax.f32 %v593_v11, 0.0 }
  0x33   : > { %v3423_v34 = vsel %vm723_vm0, %v742_v19, %v743_v28  ;;  %v3426_v35 = vsel %vm723_vm0, %v743_v28, %v836_v29  ;;  %v965_v38 = vrot.slane %v3420_v32, 1  ;;  %v630_v39 = vmax.f32 %v594_v21, 0.0  ;;  %v514_v29 = vld [vmem:[%s3242_s14 + $0x98] sm:$0xff] }
  0x34   : > { %5209 = vst [vmem:[#allocation2_spill] sm:$0xff] %v3423_v34  ;;  %v937_v44 = vsel %vm934_vm1, %v935_v18, %v936_v30  ;;  %v939_v49 = vsel %vm934_vm1, %v936_v30, %v938_v31  ;;  %v966_v52 = vrot.slane %v3423_v34, 1  ;;  %v968_v55 = vrot.slane %v3426_v35, 1  ;;  %v513_v18 = vld [vmem:[%s3242_s14 + $0x90] sm:$0xff] }
  0x35   : > { %1015 = vrot.lane.b32.xlu0 %v937_v44, %s3157_s18  ;;  %v745_v61 = vrot.slane %v629_v33, 7  ;;  %v746_v56 = vrot.slane %v630_v39, 7  ;;  %v837_v63 = vrot.slane %v630_v39, 5  ;;  %v676_v2 = vrot.slane %v629_v33, 1 }
  0x36   : > { %1037 = vrot.lane.b32.xlu1 %v3400_v7, %s3157_s18  ;;  %v3440_v3 = vsel %vm934_vm1, %v966_v52, %v968_v55  ;;  %v3443_v5 = vsel %vm934_vm1, %v965_v38, %v966_v52  ;;  %v552_v6 = vmul.f32 %v3236_v0, %v509_v42  ;;  %v553_v9 = vmul.f32 %v3236_v0, %v510_v43  ;;  %v515_v38 = vld [vmem:[%s3242_s14 + $0xa0] sm:$0xff] }
  0x37   : > { %v3449_v11 = vsel %vm723_vm0, %v745_v61, %v746_v56  ;;  %v3452_v12 = vsel %vm723_vm0, %v746_v56, %v837_v63  ;;  %v3455_v16 = vsel %vm723_vm0, %v676_v2, %v745_v61  ;;  %v554_v17 = vmul.f32 %v3236_v0, %v511_v59 }
  0x38   : > { %v971_v19 = vrot.slane %v3449_v11, 1  ;;  %v973_v20 = vrot.slane %v3452_v12, 1  ;;  %v970_v21 = vrot.slane %v3455_v16, 1  ;;  %v595_v28 = vadd.f32 %v3247_v1, %v552_v6 }
  0x39   : > { %1017 = vrot.lane.b32.xlu0 %v939_v49, %s3157_s18  ;;  %v596_v30 = vadd.f32 %v3247_v1, %v553_v9  ;;  %v555_v31 = vmul.f32 %v3236_v0, %v512_v10  ;;  %v597_v33 = vadd.f32 %v3247_v1, %v554_v17  ;;  %v556_v44 = vmul.f32 %v3236_v0, %v513_v18 }
  0x3a   : > { %1041 = vrot.lane.b32.xlu1 %v3440_v3, %s3157_s18  ;;  %v3472_v39 = vsel %vm934_vm1, %v971_v19, %v973_v20  ;;  %v3475_v42 = vsel %vm934_vm1, %v970_v21, %v971_v19  ;;  %v631_v43 = vmax.f32 %v595_v28, 0.0  ;;  %v557_v59 = vmul.f32 %v3236_v0, %v514_v29 }
  0x3b   : > { %v632_v49 = vmax.f32 %v596_v30, 0.0  ;;  %v598_v52 = vadd.f32 %v3247_v1, %v555_v31  ;;  %v633_v55 = vmax.f32 %v597_v33, 0.0  ;;  %v599_v63 = vadd.f32 %v3247_v1, %v556_v44 }
  0x3c   : > { %v748_v61 = vrot.slane %v631_v43, 7  ;;  %v677_v56 = vrot.slane %v631_v43, 1  ;;  %v558_v2 = vmul.f32 %v3236_v0, %v515_v38  ;;  %v600_v20 = vadd.f32 %v3247_v1, %v557_v59 }
  0x3d   : > { %1039 = vrot.lane.b32.xlu0 %v3443_v5, %s3157_s18  ;;  %v749_v6 = vrot.slane %v632_v49, 7  ;;  %v838_v9 = vrot.slane %v632_v49, 5  ;;  %v634_v10 = vmax.f32 %v598_v52, 0.0  ;;  %v751_v17 = vrot.slane %v633_v55, 7 }
  0x3e   : > { %1045 = vrot.lane.b32.xlu1 %v3472_v39, %s3157_s18  ;;  %v3487_v18 = vsel %vm723_vm0, %v677_v56, %v748_v61  ;;  %v678_v19 = vrot.slane %v633_v55, 1  ;;  %v635_v21 = vmax.f32 %v599_v63, 0.0  ;;  %v636_v55 = vmax.f32 %v600_v20, 0.0  ;;  %v517_v56 = vld [vmem:[%s3242_s14 + $0xb0] sm:$0xff] }
  0x3f   : > { %v3491_v28 = vsel %vm723_vm0, %v748_v61, %v749_v6  ;;  %v3494_v29 = vsel %vm723_vm0, %v749_v6, %v838_v9  ;;  %v975_v30 = vrot.slane %v3487_v18, 1  ;;  %v752_v31 = vrot.slane %v634_v10, 7  ;;  %v516_v61 = vld [vmem:[%s3242_s14 + $0xa8] sm:$0xff] }
  0x40   : > { %5210 = vst [vmem:[#allocation3_spill] sm:$0xff] %v3494_v29  ;;  %v976_v33 = vrot.slane %v3491_v28, 1  ;;  %v978_v38 = vrot.slane %v3494_v29, 1  ;;  %v839_v43 = vrot.slane %v634_v10, 5  ;;  %v3500_v44 = vsel %vm723_vm0, %v678_v19, %v751_v17 }
  0x41   : > { %5211 = vst [vmem:[#allocation4_spill] sm:$0xff] %v3500_v44  ;;  %1043 = vrot.lane.b32.xlu0 %v3475_v42, %s3157_s18  ;;  %v3505_v49 = vsel %vm723_vm0, %v751_v17, %v752_v31  ;;  %v980_v52 = vrot.slane %v3500_v44, 1  ;;  %v754_v59 = vrot.slane %v635_v21, 7  ;;  %v755_v19 = vrot.slane %v636_v55, 7 }
  0x42   : > { %5212 = vst [vmem:[#allocation5_spill] sm:$0xff] %v3505_v49  ;;  %v3511_v63 = vsel %vm934_vm1, %v976_v33, %v978_v38  ;;  %v3514_v6 = vsel %vm934_vm1, %v975_v30, %v976_v33  ;;  %v3517_v9 = vsel %vm723_vm0, %v752_v31, %v839_v43  ;;  %v981_v10 = vrot.slane %v3505_v49, 1  ;;  %v518_v31 = vld [vmem:[%s3242_s14 + $0xb8] sm:$0xff]  ;;  %v519_v49 = vld [vmem:[%s3242_s14 + $0xc0] sm:$0xff] }
  0x43   : > { %5213 = vst [vmem:[#allocation6_spill] sm:$0xff] %v3511_v63  ;;  %5214 = vst [vmem:[#allocation7_spill] sm:$0xff] %v3517_v9  ;;  %1049 = vrot.lane.b32.xlu1 %v3511_v63, %s3157_s18  ;;  %v983_v17 = vrot.slane %v3517_v9, 1  ;;  %v840_v20 = vrot.slane %v636_v55, 5  ;;  %v679_v44 = vrot.slane %v635_v21, 1  ;;  %v559_v30 = vmul.f32 %v3236_v0, %v516_v61 }
  0x44   : > { %v3524_v38 = vsel %vm934_vm1, %v980_v52, %v981_v10  ;;  %v601_v33 = vadd.f32 %v3247_v1, %v558_v2  ;;  %v560_v43 = vmul.f32 %v3236_v0, %v517_v56  ;;  %v3537_v55 = vsel %vm723_vm0, %v754_v59, %v755_v19  ;;  %v520_v2 = vld [vmem:[%s3242_s14 + $0xc8] sm:$0xff] }
  0x45   : > { %5215 = vst [vmem:[#allocation8_spill] sm:$0xff] %v3524_v38  ;;  %1047 = vrot.lane.b32.xlu0 %v3514_v6, %s3157_s18  ;;  %v3534_v29 = vsel %vm934_vm1, %v981_v10, %v983_v17  ;;  %5217 = vst [vmem:[#allocation10_spill] sm:$0xff] %v3537_v55  ;;  %v3540_v21 = vsel %vm723_vm0, %v755_v19, %v840_v20  ;;  %v3543_v52 = vsel %vm723_vm0, %v679_v44, %v754_v59 }
  0x46   : > { %5216 = vst [vmem:[#allocation9_spill] sm:$0xff] %v3534_v29  ;;  %5218 = vst [vmem:[#allocation11_spill] sm:$0xff] %v3540_v21  ;;  %v986_v61 = vrot.slane %v3537_v55, 1  ;;  %v988_v56 = vrot.slane %v3540_v21, 1  ;;  %v985_v9 = vrot.slane %v3543_v52, 1  ;;  %v602_v63 = vadd.f32 %v3247_v1, %v559_v30 }
  0x47   : > { %5219 = vst [vmem:[#allocation12_spill] sm:$0xff] %v3543_v52  ;;  %1053 = vrot.lane.b32.xlu1 %v3534_v29, %s3157_s18  ;;  %v637_v10 = vmax.f32 %v601_v33, 0.0  ;;  %v561_v17 = vmul.f32 %v3236_v0, %v518_v31  ;;  %v603_v19 = vadd.f32 %v3247_v1, %v560_v43  ;;  %v562_v44 = vmul.f32 %v3236_v0, %v519_v49 }
  0x48   : > { %v3556_v59 = vsel %vm934_vm1, %v986_v61, %v988_v56  ;;  %v3559_v20 = vsel %vm934_vm1, %v985_v9, %v986_v61  ;;  %v638_v21 = vmax.f32 %v602_v63, 0.0  ;;  %v563_v55 = vmul.f32 %v3236_v0, %v520_v2 }
  0x49   : > { %5220 = vst [vmem:[#allocation13_spill] sm:$0xff] %v3556_v59  ;;  %1051 = vrot.lane.b32.xlu0 %v3524_v38, %s3157_s18  ;;  %v757_v30 = vrot.slane %v637_v10, 7  ;;  %v680_v33 = vrot.slane %v637_v10, 1  ;;  %v604_v31 = vadd.f32 %v3247_v1, %v561_v17  ;;  %v639_v52 = vmax.f32 %v603_v19, 0.0 }
  0x4a   : > { %v758_v43 = vrot.slane %v638_v21, 7  ;;  %v841_v29 = vrot.slane %v638_v21, 5  ;;  %v605_v49 = vadd.f32 %v3247_v1, %v562_v44  ;;  %v606_v56 = vadd.f32 %v3247_v1, %v563_v55 }
  0x4b   : > { %1057 = vrot.lane.b32.xlu1 %v3556_v59, %s3157_s18  ;;  %v3570_v63 = vsel %vm723_vm0, %v680_v33, %v757_v30  ;;  %v640_v9 = vmax.f32 %v604_v31, 0.0  ;;  %v760_v2 = vrot.slane %v639_v52, 7  ;;  %v681_v61 = vrot.slane %v639_v52, 1 }
  0x4c   : > { %5221 = vst [vmem:[#allocation14_spill] sm:$0xff] %v3570_v63  ;;  %v3573_v10 = vsel %vm723_vm0, %v757_v30, %v758_v43  ;;  %v3576_v21 = vsel %vm723_vm0, %v758_v43, %v841_v29  ;;  %v990_v17 = vrot.slane %v3570_v63, 1  ;;  %v641_v55 = vmax.f32 %v605_v49, 0.0  ;;  %v521_v29 = vld [vmem:[%s3242_s14 + $0xd0] sm:$0xff]  ;;  %v522_v43 = vld [vmem:[%s3242_s14 + $0xd8] sm:$0xff] }
  0x4d   : > { %5222 = vst [vmem:[#allocation15_spill] sm:$0xff] %v3573_v10  ;;  %5223 = vst [vmem:[#allocation16_spill] sm:$0xff] %v3576_v21  ;;  %1055 = vrot.lane.b32.xlu0 %v3559_v20, %s3157_s18  ;;  %v991_v19 = vrot.slane %v3573_v10, 1  ;;  %v993_v44 = vrot.slane %v3576_v21, 1  ;;  %v761_v33 = vrot.slane %v640_v9, 7  ;;  %v842_v31 = vrot.slane %v640_v9, 5 }
  0x4e   : > { %v3584_v52 = vsel %vm723_vm0, %v681_v61, %v760_v2  ;;  %v642_v30 = vmax.f32 %v606_v56, 0.0  ;;  %v763_v59 = vrot.slane %v641_v55, 7  ;;  %v682_v38 = vrot.slane %v641_v55, 1 }
  0x4f   : > { %5224 = vst [vmem:[#allocation17_spill] sm:$0xff] %v3584_v52  ;;  %v3589_v49 = vsel %vm934_vm1, %v991_v19, %v993_v44  ;;  %v3592_v63 = vsel %vm934_vm1, %v990_v17, %v991_v19  ;;  %v3595_v21 = vsel %vm723_vm0, %v760_v2, %v761_v33  ;;  %v3598_v9 = vsel %vm723_vm0, %v761_v33, %v842_v31  ;;  %v523_v31 = vld [vmem:[%s3242_s14 + $0xe0] sm:$0xff] }
  0x50   : > { %5225 = vst [vmem:[#allocation18_spill] sm:$0xff] %v3589_v49  ;;  %5226 = vst [vmem:[#allocation19_spill] sm:$0xff] %v3595_v21  ;;  %1061 = vrot.lane.b32.xlu1 %v3589_v49, %s3157_s18  ;;  %v996_v56 = vrot.slane %v3595_v21, 1  ;;  %v998_v61 = vrot.slane %v3598_v9, 1  ;;  %v995_v55 = vrot.slane %v3584_v52, 1  ;;  %v764_v44 = vrot.slane %v642_v30, 7 }
  0x51   : > { %5227 = vst [vmem:[#allocation20_spill] sm:$0xff] %v3598_v9  ;;  %1059 = vrot.lane.b32.xlu0 %v3592_v63, %s3157_s18  ;;  %v843_v17 = vrot.slane %v642_v30, 5  ;;  %v3608_v2 = vsel %vm723_vm0, %v682_v38, %v763_v59  ;;  %v564_v19 = vmul.f32 %v3236_v0, %v521_v29  ;;  %v565_v33 = vmul.f32 %v3236_v0, %v522_v43  ;;  %v524_v49 = vld [vmem:[%s3242_s14 + $0xe8] sm:$0xff] }
  0x52   : > { %5228 = vst [vmem:[#allocation21_spill] sm:$0xff] %v3608_v2  ;;  %v3615_v21 = vsel %vm934_vm1, %v996_v56, %v998_v61  ;;  %v3618_v9 = vsel %vm934_vm1, %v995_v55, %v996_v56  ;;  %v3621_v52 = vsel %vm723_vm0, %v763_v59, %v764_v44  ;;  %v1000_v30 = vrot.slane %v3608_v2, 1 }
  0x53   : > { %5229 = vst [vmem:[#allocation22_spill] sm:$0xff] %v3615_v21  ;;  %5230 = vst [vmem:[#allocation23_spill] sm:$0xff] %v3621_v52  ;;  %v3625_v38 = vsel %vm723_vm0, %v764_v44, %v843_v17  ;;  %v1001_v29 = vrot.slane %v3621_v52, 1  ;;  %v607_v43 = vadd.f32 %v3247_v1, %v564_v19  ;;  %v608_v10 = vadd.f32 %v3247_v1, %v565_v33 }
  0x54   : > { %5231 = vst [vmem:[#allocation24_spill] sm:$0xff] %v3625_v38  ;;  %1065 = vrot.lane.b32.xlu1 %v3615_v21, %s3157_s18  ;;  %v1003_v56 = vrot.slane %v3625_v38, 1  ;;  %v566_v61 = vmul.f32 %v3236_v0, %v523_v31  ;;  %v567_v59 = vmul.f32 %v3236_v0, %v524_v49 }
  0x55   : > { %1063 = vrot.lane.b32.xlu0 %v3618_v9, %s3157_s18  ;;  %v643_v55 = vmax.f32 %v607_v43, 0.0  ;;  %v644_v44 = vmax.f32 %v608_v10, 0.0  ;;  %v3641_v19 = vsel %vm934_vm1, %v1000_v30, %v1001_v29 }
  0x56   : > { %v3638_v17 = vsel %vm934_vm1, %v1001_v29, %v1003_v56  ;;  %5233 = vst [vmem:[#allocation26_spill] sm:$0xff] %v3641_v19  ;;  %v609_v33 = vadd.f32 %v3247_v1, %v566_v61  ;;  %v610_v52 = vadd.f32 %v3247_v1, %v567_v59 }
  0x57   : > { %5232 = vst [vmem:[#allocation25_spill] sm:$0xff] %v3638_v17  ;;  %v766_v38 = vrot.slane %v643_v55, 7  ;;  %v767_v2 = vrot.slane %v644_v44, 7  ;;  %v844_v31 = vrot.slane %v644_v44, 5  ;;  %v683_v21 = vrot.slane %v643_v55, 1 }
  0x58   : > { %1069 = vrot.lane.b32.xlu1 %v3638_v17, %s3157_s18  ;;  %v645_v0 = vmax.f32 %v609_v33, 0.0  ;;  %v646_v49 = vmax.f32 %v610_v52, 0.0 }
  0x59   : > { %1067 = vrot.lane.b32.xlu0 %v3641_v19, %s3157_s18  ;;  %v3650_v10 = vsel %vm723_vm0, %v766_v38, %v767_v2  ;;  %v3653_v30 = vsel %vm723_vm0, %v767_v2, %v844_v31  ;;  %v3656_v1 = vsel %vm723_vm0, %v683_v21, %v766_v38  ;;  %v1113_v21 = vrot.slane %v3412_v25, 2 }
  0x5a   : > { %5234 = vst [vmem:[#allocation27_spill] sm:$0xff] %v3650_v10  ;;  %5235 = vst [vmem:[#allocation28_spill] sm:$0xff] %v3653_v30  ;;  %v1006_v29 = vrot.slane %v3650_v10, 1  ;;  %v1008_v43 = vrot.slane %v3653_v30, 1  ;;  %v1005_v56 = vrot.slane %v3656_v1, 1  ;;  %v769_v61 = vrot.slane %v645_v0, 7 }
  0x5b   : > { %5236 = vst [vmem:[#allocation29_spill] sm:$0xff] %v3656_v1  ;;  %v770_v52 = vrot.slane %v646_v49, 7  ;;  %v845_v59 = vrot.slane %v646_v49, 5  ;;  %v684_v55 = vrot.slane %v645_v0, 1  ;;  %v1115_v0 = vrot.slane %v3415_v26, 2 }
  0x5c   : > { %v3662_v44 = vsel %vm934_vm1, %v1006_v29, %v1008_v43  ;;  %v3665_v33 = vsel %vm934_vm1, %v1005_v56, %v1006_v29  ;;  %v1112_v56 = vrot.slane %v3405_v15, 2 }
  0x5d   : > { %5237 = vst [vmem:[#allocation30_spill] sm:$0xff] %v3662_v44  ;;  %5238 = vst [vmem:[#allocation31_spill] sm:$0xff] %v3665_v33  ;;  %1073 = vrot.lane.b32.xlu1 %v3662_v44, %s3157_s18  ;;  %1071 = vrot.lane.b32.xlu0 %v3665_v33, %s3157_s18  ;;  %v3673_v2 = vsel %vm723_vm0, %v769_v61, %v770_v52  ;;  %v3676_v38 = vsel %vm723_vm0, %v770_v52, %v845_v59  ;;  %v1118_v52 = vrot.slane %v3282_v46, 2 }
  0x5e   : > { %5239 = vst [vmem:[#allocation32_spill] sm:$0xff] %v3673_v2  ;;  %5240 = vst [vmem:[#allocation33_spill] sm:$0xff] %v3676_v38  ;;  %v3679_v31 = vsel %vm723_vm0, %v684_v55, %v769_v61  ;;  %v1011_v49 = vrot.slane %v3673_v2, 1  ;;  %v1013_v29 = vrot.slane %v3676_v38, 1  ;;  %v1116_v26 = vsel %vm1111_vm2, %v1113_v21, %v1115_v0 }
  0x5f   : > { %5241 = vst [vmem:[#allocation34_spill] sm:$0xff] %v3679_v31  ;;  %v1010_v43 = vrot.slane %v3679_v31, 1  ;;  %v1114_v61 = vsel %vm1111_vm2, %v1112_v56, %v1113_v21  ;;  %v1120_v59 = vrot.slane %v3304_v57, 2  ;;  %v1117_v55 = vrot.slane %v3285_v47, 2  ;;  %v2152_v21 = vld [vmem:[%s5142_s3] sm:$0xff]  ;;  %v2153_v56 = vld [vmem:[%s5142_s3 + $0x8] sm:$0xff] }
  0x60   : > { %v3687_v30 = vsel %vm934_vm1, %v1011_v49, %v1013_v29  ;;  %v1123_v0 = vrot.slane %v3274_v40, 2  ;;  %v1135_v31 = vrot.slane %v3350_v24, 2 }
  0x61   : > { %5242 = vst [vmem:[#allocation35_spill] sm:$0xff] %v3687_v30  ;;  %v3690_v44 = vsel %vm934_vm1, %v1010_v43, %v1011_v49  ;;  %1077 = vrot.lane.b32.xlu1 %v3687_v30, %s3157_s18  ;;  %v1121_v49 = vsel %vm1111_vm2, %v1118_v52, %v1120_v59  ;;  %v1119_v29 = vsel %vm1111_vm2, %v1117_v55, %v1118_v52  ;;  %v1122_v43 = vrot.slane %v3277_v41, 2  ;;  %v2155_v52 = vld [vmem:[%s5142_s3 + $0x18] sm:$0xff]  ;;  %v2156_v55 = vld [vmem:[%s5142_s3 + $0x20] sm:$0xff] }
  0x62   : > { %5243 = vst [vmem:[#allocation36_spill] sm:$0xff] %v3690_v44  ;;  %1075 = vrot.lane.b32.xlu0 %v3690_v44, %s3157_s18 }
  0x63   : > { %v1124_v57 = vsel %vm1111_vm2, %v1122_v43, %v1123_v0  ;;  %v2157_v43 = vld [vmem:[%s5142_s3 + $0x28] sm:$0xff] }
  0x65   : > { %1194 = vrot.lane.b32.xlu1 %v1116_v26, %s3158_s22  ;;  %v3073_v26 = vpack.c.bf16 %v2153_v56, %v2152_v21  ;;  %v2158_v21 = vld [vmem:[%s5142_s3 + $0x30] sm:$0xff]  ;;  %v2159_v56 = vld [vmem:[%s5142_s3 + $0x38] sm:$0xff] }
  0x66   : > { %1192 = vrot.lane.b32.xlu0 %v1114_v61, %s3158_s22  ;;  %v2154_v61 = vld [vmem:[%s5142_s3 + $0x10] sm:$0xff] }
  0x67   : > { %3074 = vmatprep.subr.bf16.mxu0 %v3073_v26  ;;  %3089 = vmatprep.subr.bf16.mxu1 %v3073_v26  ;;  %v3077_v59 = vpack.c.bf16 %v2155_v52, %v2154_v61  ;;  %v1128_v61 = vrot.slane %v3291_v50, 2 }
  0x68   : > { %3076 = vmatpush3.bf16.msra.mxu0 %v3073_v26  ;;  %3094 = vmatpush3.bf16.msra.mxu1 %v3073_v26 }
  0x69   : > { %1198 = vrot.lane.b32.xlu1 %v1121_v49, %s3158_s22  ;;  %3078 = vmatprep.subr.bf16.mxu0 %v3077_v59 }
  0x6a   : > { %1196 = vrot.lane.b32.xlu0 %v1119_v29, %s3158_s22  ;;  %3090 = vmatprep.subr.bf16.mxu1 %v3077_v59 }
  0x6c   : > { %3080 = vmatpush3.bf16.msra.mxu0 %v3077_v59  ;;  %3095 = vmatpush3.bf16.msra.mxu1 %v3077_v59 }
  0x6d   : > { %1289 = vrot.lane.b32.xlu1 %v3285_v47, %s3159_s10 }
  0x6e   : > { %1200 = vrot.lane.b32.xlu0 %v1124_v57, %s3158_s22 }
  0x71   : > { %1391 = vrot.lane.b32.xlu1 %v3309_v58, %s3160_s16  ;;  %v3081_v58 = vpack.c.bf16 %v2157_v43, %v2156_v55 }
  0x72   : > { %1291 = vrot.lane.b32.xlu0 %v3282_v46, %s3159_s10 }
  0x73   : > { %3082 = vmatprep.subr.bf16.mxu0 %v3081_v58  ;;  %3091 = vmatprep.subr.bf16.mxu1 %v3081_v58 }
  0x74   : > { %3084 = vmatpush3.bf16.msra.mxu0 %v3081_v58  ;;  %3096 = vmatpush3.bf16.msra.mxu1 %v3081_v58 }
  0x75   : > { %1492 = vrot.lane.b32.xlu1 %v1119_v29, %s3161_s21  ;;  %v2160_v29 = vld [vmem:[%s5142_s3 + $0x40] sm:$0xff] }
  0x76   : > { %1393 = vrot.lane.b32.xlu0 %v3323_v4, %s3160_s16  ;;  %v3085_v4 = vpack.c.bf16 %v2159_v56, %v2158_v21  ;;  %v1130_v21 = vrot.slane %v3347_v23, 2 }
  0x78   : > { %3086 = vmatprep.subr.bf16.mxu0 %v3085_v4  ;;  %3092 = vmatprep.subr.bf16.mxu1 %v3085_v4 }
  0x79   : > { %1589 = vrot.lane.b32.xlu1 %v3277_v41, %s3162_s11  ;;  %3088 = vmatpush3.bf16.msra.mxu0 %v3085_v4 }
  0x7a   : > { %1494 = vrot.lane.b32.xlu0 %v1121_v49, %s3161_s21  ;;  %3097 = vmatpush3.bf16.msra.mxu1 %v3085_v4  ;;  %v1125_v49 = vrot.slane %v3326_v8, 2 }
  0x7b   : > { %3023 = vmatprep.subr.mxu0 %v2160_v29  ;;  %3093 = vmatprep.subr.mxu1 %v2160_v29 }
  0x7c   : > { %v1126_v26 = vsel %vm1111_vm2, %v1123_v0, %v1125_v49 }
  0x7d   : > { %1591 = vrot.lane.b32.xlu1 %v3274_v40, %s3162_s11  ;;  %3024 = vmatpush3.msra.mxu0 %v2160_v29 }
  0x7e   : > { %1293 = vrot.lane.b32.xlu0 %v3277_v41, %s3159_s10  ;;  %3098 = vmatpush3.msra.mxu1 %v2160_v29 }
  0x81   : > { %1295 = vrot.lane.b32.xlu1 %v3274_v40, %s3159_s10 }
  0x82   : > { %1691 = vrot.lane.b32.xlu0 %v3299_v54, %s3163_s15 }
  0x85   : > { %1693 = vrot.lane.b32.xlu1 %v3344_v22, %s3163_s15 }
  0x86   : > { %1395 = vrot.lane.b32.xlu0 %v3299_v54, %s3160_s16 }
  0x89   : > { %1397 = vrot.lane.b32.xlu1 %v3344_v22, %s3160_s16 }
  0x8a   : > { %1792 = vrot.lane.b32.xlu0 %v1124_v57, %s3164_s17 }
  0x8d   : > { %1794 = vrot.lane.b32.xlu1 %v1126_v26, %s3164_s17 }
  0x8e   : > { %1496 = vrot.lane.b32.xlu0 %v1124_v57, %s3161_s21  ;;  %v1127_v57 = vrot.slane %v3294_v51, 2 }
  0x90   : > { %v1129_v55 = vsel %vm1111_vm2, %v1127_v57, %v1128_v61 }
  0x91   : > { %1593 = vrot.lane.b32.xlu1 %v3294_v51, %s3162_s11 }
  0x92   : > { %1498 = vrot.lane.b32.xlu0 %v1126_v26, %s3161_s21  ;;  %v3772_v54 = vpop.permute.xlu0 %1023 }
  0x94   : > { %v3774_v8 = vpop.permute.xlu1 %1019 }
  0x95   : > { %1297 = vrot.lane.b32.xlu1 %v3294_v51, %s3159_s10 }
  0x96   : > { %1202 = vrot.lane.b32.xlu0 %v1126_v26, %s3158_s22  ;;  %v3779_v22 = vpop.permute.xlu0 %1027 }
  0x98   : > { %v3781_v0 = vpop.permute.xlu1 %1021 }
  0x99   : > { %1695 = vrot.lane.b32.xlu1 %v3318_v62, %s3163_s15 }
  0x9a   : > { %1595 = vrot.lane.b32.xlu0 %v3291_v50, %s3162_s11  ;;  %v3789_v52 = vpop.permute.xlu0 %1031 }
  0x9c   : > { %v3791_v59 = vpop.permute.xlu1 %1025 }
  0x9d   : > { %1399 = vrot.lane.b32.xlu1 %v3318_v62, %s3160_s16  ;;  %v1131_v62 = vsel %vm1111_vm2, %v1128_v61, %v1130_v21  ;;  %v1133_v21 = vrot.slane %v3333_v13, 2 }
  0x9e   : > { %1299 = vrot.lane.b32.xlu0 %v3291_v50, %s3159_s10 }
  0x9f   : > { %v3803_v58 = vpop.permute.xlu0 %1035 }
  0xa0   : > { %v3798_v43 = vpop.permute.xlu1 %1029 }
  0xa1   : > { %1796 = vrot.lane.b32.xlu1 %v1129_v55, %s3164_s17 }
  0xa2   : > { %1697 = vrot.lane.b32.xlu0 %v3377_v45, %s3163_s15 }
  0xa4   : > { %v3806_v56 = vpop.permute.xlu1 %1033 }
  0xa5   : > { %1500 = vrot.lane.b32.xlu1 %v1129_v55, %s3161_s21 }
  0xa6   : > { %1401 = vrot.lane.b32.xlu0 %v3377_v45, %s3160_s16 }
  0xa7   : > { %v3812_v4 = vpop.permute.xlu0 %1015 }
  0xa8   : > { %v3814_v29 = vpop.permute.xlu1 %1037  ;;  %v1889_v17 = vsel %vm1888_vm4, %v3405_v15, %v3812_v4 }
  0xa9   : > { %1204 = vrot.lane.b32.xlu1 %v1129_v55, %s3158_s22  ;;  %v1132_v55 = vrot.slane %v3336_v14, 2 }
  0xaa   : > { %1798 = vrot.lane.b32.xlu0 %v1131_v62, %s3164_s17 }
  0xab   : > { %v3818_v49 = vpop.permute.xlu0 %1017  ;;  %v1134_v30 = vsel %vm1111_vm2, %v1132_v55, %v1133_v21  ;;  %v1136_v55 = vsel %vm1111_vm2, %v1133_v21, %v1135_v31  ;;  %v1137_v21 = vrot.slane %v3370_v37, 2 }
  0xac   : > { %v3820_v23 = vpop.permute.xlu1 %1041  ;;  %v1890_v15 = vsel %vm1888_vm4, %v3412_v25, %v3818_v49 }
  0xad   : > { %5244 = vst [vmem:[#allocation37_spill] sm:$0xff] %v3820_v23  ;;  %1597 = vrot.lane.b32.xlu1 %v3336_v14, %s3162_s11 }
  0xae   : > { %1502 = vrot.lane.b32.xlu0 %v1131_v62, %s3161_s21 }
  0xaf   : > { %v3825_v45 = vpop.permute.xlu0 %1039 }
  0xb0   : > { %v3827_v26 = vpop.permute.xlu1 %1045 }
  0xb1   : > { %5245 = vst [vmem:[#allocation38_spill] sm:$0xff] %v3827_v26  ;;  %1301 = vrot.lane.b32.xlu1 %v3336_v14, %s3159_s10 }
  0xb2   : > { %1206 = vrot.lane.b32.xlu0 %v1131_v62, %s3158_s22 }
  0xb3   : > { %v3832_v57 = vpop.permute.xlu0 %1043 }
  0xb4   : > { %5246 = vst [vmem:[#allocation39_spill] sm:$0xff] %v3832_v57 }
  0xb5   : > { %1699 = vrot.lane.b32.xlu1 %v3355_v27, %s3163_s15  ;;  %v3838_v61 = vpop.permute.xlu1 %1049 }
  0xb6   : > { %1599 = vrot.lane.b32.xlu0 %v3333_v13, %s3162_s11  ;;  %5247 = vst [vmem:[#allocation40_spill] sm:$0xff] %v3838_v61 }
  0xb7   : > { %v3842_v38 = vpop.permute.xlu0 %1047 }
  0xb8   : > { %5248 = vst [vmem:[#allocation41_spill] sm:$0xff] %v3842_v38 }
  0xb9   : > { %1403 = vrot.lane.b32.xlu1 %v3355_v27, %s3160_s16  ;;  %v3848_v62 = vpop.permute.xlu1 %1053 }
  0xba   : > { %1303 = vrot.lane.b32.xlu0 %v3333_v13, %s3159_s10  ;;  %5249 = vst [vmem:[#allocation42_spill] sm:$0xff] %v3848_v62 }
  0xbb   : > { %v3851_v2 = vpop.permute.xlu0 %1051 }
  0xbc   : > { %5250 = vst [vmem:[#allocation43_spill] sm:$0xff] %v3851_v2 }
  0xbd   : > { %1800 = vrot.lane.b32.xlu1 %v1134_v30, %s3164_s17  ;;  %v3856_v44 = vpop.permute.xlu1 %1057 }
  0xbe   : > { %1701 = vrot.lane.b32.xlu0 %v3380_v48, %s3163_s15  ;;  %5251 = vst [vmem:[#allocation44_spill] sm:$0xff] %v3856_v44 }
  0xbf   : > { %v3859_v61 = vpop.permute.xlu0 %1055 }
  0xc0   : > { %5252 = vst [vmem:[#allocation45_spill] sm:$0xff] %v3859_v61 }
  0xc1   : > { %1504 = vrot.lane.b32.xlu1 %v1134_v30, %s3161_s21 }
  0xc2   : > { %1405 = vrot.lane.b32.xlu0 %v3380_v48, %s3160_s16  ;;  %v3864_v27 = vpop.permute.xlu1 %1061 }
  0xc3   : > { %5253 = vst [vmem:[#allocation46_spill] sm:$0xff] %v3864_v27  ;;  %v3867_v62 = vpop.permute.xlu0 %1059 }
  0xc4   : > { %5254 = vst [vmem:[#allocation47_spill] sm:$0xff] %v3867_v62 }
  0xc5   : > { %1208 = vrot.lane.b32.xlu1 %v1134_v30, %s3158_s22 }
  0xc6   : > { %1802 = vrot.lane.b32.xlu0 %v1136_v55, %s3164_s17  ;;  %v3871_v44 = vpop.permute.xlu1 %1065 }
  0xc7   : > { %5255 = vst [vmem:[#allocation48_spill] sm:$0xff] %v3871_v44  ;;  %v3873_v24 = vpop.permute.xlu0 %1063 }
  0xc8   : > { %5256 = vst [vmem:[#allocation49_spill] sm:$0xff] %v3873_v24  ;;  %v1140_v24 = vrot.slane %v3384_v53, 2 }
  0xc9   : > { %1601 = vrot.lane.b32.xlu1 %v3370_v37, %s3162_s11 }
  0xca   : > { %1506 = vrot.lane.b32.xlu0 %v1136_v55, %s3161_s21  ;;  %v3878_v48 = vpop.permute.xlu1 %1069 }
  0xcb   : > { %5257 = vst [vmem:[#allocation50_spill] sm:$0xff] %v3878_v48  ;;  %v3880_v27 = vpop.permute.xlu0 %1067  ;;  %v1138_v48 = vrot.slane %v3367_v36, 2 }
  0xcc   : > { %5258 = vst [vmem:[#allocation51_spill] sm:$0xff] %v3880_v27 }
  0xcd   : > { %1305 = vrot.lane.b32.xlu1 %v3370_v37, %s3159_s10 }
  0xce   : > { %1210 = vrot.lane.b32.xlu0 %v1136_v55, %s3158_s22  ;;  %v1139_v55 = vsel %vm1111_vm2, %v1137_v21, %v1138_v48 }
  0xcf   : > { %v3885_v30 = vpop.permute.xlu1 %1073  ;;  %v3887_v31 = vpop.permute.xlu0 %1071 }
  0xd0   : > { %5259 = vst [vmem:[#allocation52_spill] sm:$0xff] %v3885_v30  ;;  %5260 = vst [vmem:[#allocation53_spill] sm:$0xff] %v3887_v31 }
  0xd1   : > { %1703 = vrot.lane.b32.xlu1 %v3389_v60, %s3163_s15 }
  0xd2   : > { %1603 = vrot.lane.b32.xlu0 %v3367_v36, %s3162_s11 }
  0xd3   : > { %v3895_v27 = vpop.permute.xlu1 %1077 }
  0xd4   : > { %5261 = vst [vmem:[#allocation54_spill] sm:$0xff] %v3895_v27  ;;  %v3897_v44 = vpop.permute.xlu0 %1075 }
  0xd5   : > { %5262 = vst [vmem:[#allocation55_spill] sm:$0xff] %v3897_v44  ;;  %1407 = vrot.lane.b32.xlu1 %v3389_v60, %s3160_s16  ;;  %v1141_v60 = vsel %vm1111_vm2, %v1138_v48, %v1140_v24  ;;  %v1142_v48 = vrot.slane %v3420_v32, 2 }
  0xd6   : > { %1307 = vrot.lane.b32.xlu0 %v3367_v36, %s3159_s10 }
  0xd7   : > { %v1195_v30 = vpop.permute.xlu1 %1194 }
  0xd8   : > { %v1193_v31 = vpop.permute.xlu0 %1192 }
  0xd9   : > { %1804 = vrot.lane.b32.xlu1 %v1139_v55, %s3164_s17 }
  0xda   : > { %1705 = vrot.lane.b32.xlu0 %v3400_v7, %s3163_s15 }
  0xdb   : > { %v3908_v27 = vpop.permute.xlu1 %1198 }
  0xdc   : > { %v3910_v44 = vpop.permute.xlu0 %1196 }
  0xdd   : > { %1508 = vrot.lane.b32.xlu1 %v1139_v55, %s3161_s21 }
  0xde   : > { %1409 = vrot.lane.b32.xlu0 %v3400_v7, %s3160_s16 }
  0xdf   : > { %v1290_v21 = vpop.permute.xlu1 %1289 }
  0xe0   : > { %v3916_v62 = vpop.permute.xlu0 %1200 }
  0xe1   : > { %1212 = vrot.lane.b32.xlu1 %v1139_v55, %s3158_s22  ;;  %v1143_v55 = vrot.slane %v3423_v34, 2 }
  0xe2   : > { %1806 = vrot.lane.b32.xlu0 %v1141_v60, %s3164_s17 }
  0xe3   : > { %v1392_v61 = vpop.permute.xlu1 %1391 }
  0xe4   : > { %v1292_v53 = vpop.permute.xlu0 %1291 }
  0xe5   : > { %1605 = vrot.lane.b32.xlu1 %v3420_v32, %s3162_s11 }
  0xe6   : > { %1510 = vrot.lane.b32.xlu0 %v1141_v60, %s3161_s21 }
  0xe7   : > { %v1493_v2 = vpop.permute.xlu1 %1492 }
  0xe8   : > { %v1394_v38 = vpop.permute.xlu0 %1393 }
  0xe9   : > { %1309 = vrot.lane.b32.xlu1 %v3420_v32, %s3159_s10 }
  0xea   : > { %1214 = vrot.lane.b32.xlu0 %v1141_v60, %s3158_s22  ;;  %v1144_v60 = vsel %vm1111_vm2, %v1142_v48, %v1143_v55  ;;  %v1145_v48 = vrot.slane %v3426_v35, 2  ;;  %v1923_v35 = vsel %vm1921_vm3, %v1890_v15, %v1195_v30  ;;  %v1891_v15 = vsel %vm1888_vm4, %v3285_v47, %v3774_v8 }
  0xeb   : > { %v1590_v7 = vpop.permute.xlu1 %1589 }
  0xec   : > { %v1495_v24 = vpop.permute.xlu0 %1494 }
  0xed   : > { %1707 = vrot.lane.b32.xlu1 %v3443_v5, %s3163_s15 }
  0xee   : > { %1607 = vrot.lane.b32.xlu0 %v3423_v34, %s3162_s11 }
  0xef   : > { %v1592_v10 = vpop.permute.xlu1 %1591 }
  0xf0   : > { %v3932_v33 = vpop.permute.xlu0 %1293 }
  0xf1   : > { %1411 = vrot.lane.b32.xlu1 %v3443_v5, %s3160_s16  ;;  %v1922_v5 = vsel %vm1921_vm3, %v1889_v17, %v1193_v31  ;;  %v1146_v31 = vsel %vm1111_vm2, %v1143_v55, %v1145_v48  ;;  %v1147_v55 = vrot.slane %v3455_v16, 2 }
  0xf2   : > { %1311 = vrot.lane.b32.xlu0 %v3423_v34, %s3159_s10  ;;  %v1955_v57 = vsel %vm1954_vm5, %v1922_v5, %v1290_v21 }
  0xf3   : > { %v3939_v1 = vpop.permute.xlu1 %1295  ;;  %v1988_v23 = vsel %vm1987_vm6, %v1955_v57, %v1392_v61  ;;  %v1956_v57 = vsel %vm1954_vm5, %v1923_v35, %v1292_v53 }
  0xf4   : > { %v1692_v26 = vpop.permute.xlu0 %1691  ;;  %v2021_v4 = vsel %vm2020_vm7, %v1988_v23, %v1493_v2  ;;  %v1989_v2 = vsel %vm1987_vm6, %v1956_v57, %v1394_v38 }
  0xf5   : > { %1808 = vrot.lane.b32.xlu1 %v1144_v60, %s3164_s17  ;;  %v2054_v17 = vsel %vm2053_vm8, %v2021_v4, %v1590_v7  ;;  %v1924_v4 = vsel %vm1921_vm3, %v1891_v15, %v3910_v44  ;;  %v1150_v44 = vrot.slane %v3452_v12, 2  ;;  %v1893_v15 = vsel %vm1888_vm4, %v3277_v41, %v3772_v54 }
  0xf6   : > { %1709 = vrot.lane.b32.xlu0 %v3440_v3, %s3163_s15  ;;  %v2087_v61 = vsel %vm2086_vm9, %v2054_v17, %v1692_v26  ;;  %v1957_v17 = vsel %vm1954_vm5, %v1924_v4, %v3932_v33  ;;  %v1926_v4 = vsel %vm1921_vm3, %v1893_v15, %v3916_v62  ;;  %v5264_v62 = vld [vmem:[#allocation3_spill] sm:$0xff]  ;;  %v1895_v15 = vsel %vm1888_vm4, %v3294_v51, %v3779_v22  ;;  %v5268_v22 = vld [vmem:[#allocation9_spill] sm:$0xff] }
  0xf7   : > { %v1694_v19 = vpop.permute.xlu1 %1693 }
  0xf8   : > { %v1396_v34 = vpop.permute.xlu0 %1395 }
  0xf9   : > { %1512 = vrot.lane.b32.xlu1 %v1144_v60, %s3161_s21 }
  0xfa   : > { %1413 = vrot.lane.b32.xlu0 %v3440_v3, %s3160_s16  ;;  %v2022_v3 = vsel %vm2020_vm7, %v1989_v2, %v1495_v24 }
  0xfb   : > { %v1398_v21 = vpop.permute.xlu1 %1397  ;;  %v2055_v23 = vsel %vm2053_vm8, %v2022_v3, %v1592_v10 }
  0xfc   : > { %v1793_v25 = vpop.permute.xlu0 %1792  ;;  %v2088_v30 = vsel %vm2086_vm9, %v2055_v23, %v1694_v19 }
  0xfd   : > { %v2120_v49 = vsel %vm2119_vm10, %v2087_v61, %v1793_v25  ;;  %1216 = vrot.lane.b32.xlu1 %v1144_v60, %s3158_s22  ;;  %v1148_v60 = vrot.slane %v3449_v11, 2  ;;  %v1990_v61 = vsel %vm1987_vm6, %v1957_v17, %v1396_v34  ;;  %v1892_v34 = vsel %vm1888_vm4, %v3282_v46, %v3781_v0 }
  0xfe   : > { %1810 = vrot.lane.b32.xlu0 %v1146_v31, %s3164_s17  ;;  %3025 = vmatprep.mubr.msk.f32.mxu0 %vm2168_vm11, %v2120_v49  ;;  %v1925_v49 = vsel %vm1921_vm3, %v1892_v34, %v3908_v27 }
  0xff   : > { %v1795_v26 = vpop.permute.xlu1 %1794  ;;  %v1149_v35 = vsel %vm1111_vm2, %v1147_v55, %v1148_v60  ;;  %v1151_v12 = vsel %vm1111_vm2, %v1148_v60, %v1150_v44  ;;  %v1958_v3 = vsel %vm1954_vm5, %v1925_v49, %v3939_v1  ;;  %v1152_v55 = vrot.slane %v3487_v18, 2 }
 0x100   : > { %v1497_v53 = vpop.permute.xlu0 %1496  ;;  %v2121_v7 = vsel %vm2119_vm10, %v2088_v30, %v1795_v26  ;;  %v1991_v26 = vsel %vm1987_vm6, %v1958_v3, %v1398_v21  ;;  %v1153_v60 = vrot.slane %v3491_v28, 2  ;;  %v1155_v44 = vrot.slane %v5264_v62, 2 }
 0x101   : > { %1609 = vrot.lane.b32.xlu1 %v3455_v16, %s3162_s11  ;;  %3026 = vmatmul.mubr.msk.f32.vlgmr.msra.gmra.mrb[0].mxu0 %vm2168_vm11, %v2121_v7  ;;  %v2023_v47 = vsel %vm2020_vm7, %v1990_v61, %v1497_v53 }
 0x102   : > { %1514 = vrot.lane.b32.xlu0 %v1146_v31, %s3161_s21  ;;  %v1156_v34 = vsel %vm1111_vm2, %v1153_v60, %v1155_v44 }
 0x103   : > { %v1594_v38 = vpop.permute.xlu1 %1593 }
 0x104   : > { %v1499_v24 = vpop.permute.xlu0 %1498 }
 0x105   : > { %1313 = vrot.lane.b32.xlu1 %v3455_v16, %s3159_s10  ;;  %v2024_v46 = vsel %vm2020_vm7, %v1991_v26, %v1499_v24 }
 0x106   : > { %1218 = vrot.lane.b32.xlu0 %v1146_v31, %s3158_s22 }
 0x107   : > { %v3979_v10 = vpop.permute.xlu1 %1297 }
 0x108   : > { %v3981_v19 = vpop.permute.xlu0 %1202  ;;  %v1959_v17 = vsel %vm1954_vm5, %v1926_v4, %v3979_v10 }
 0x109   : > { %1711 = vrot.lane.b32.xlu1 %v3475_v42, %s3163_s15 }
 0x10a   : > { %1611 = vrot.lane.b32.xlu0 %v3449_v11, %s3162_s11 }
 0x10b   : > { %v1696_v5 = vpop.permute.xlu1 %1695 }
 0x10c   : > { %v1596_v48 = vpop.permute.xlu0 %1595 }
 0x10d   : > { %1415 = vrot.lane.b32.xlu1 %v3475_v42, %s3160_s16  ;;  %v2056_v42 = vsel %vm2053_vm8, %v2023_v47, %v1594_v38 }
 0x10e   : > { %1315 = vrot.lane.b32.xlu0 %v3449_v11, %s3159_s10  ;;  %v2089_v8 = vsel %vm2086_vm9, %v2056_v42, %v1696_v5 }
 0x10f   : > { %v1400_v31 = vpop.permute.xlu1 %1399 }
 0x110   : > { %v4001_v57 = vpop.permute.xlu0 %1299  ;;  %v1992_v42 = vsel %vm1987_vm6, %v1959_v17, %v1400_v31  ;;  %v1894_v31 = vsel %vm1888_vm4, %v3274_v40, %v3791_v59 }
 0x111   : > { %1812 = vrot.lane.b32.xlu1 %v1149_v35, %s3164_s17 }
 0x112   : > { %1713 = vrot.lane.b32.xlu0 %v3472_v39, %s3163_s15 }
 0x113   : > { %v1797_v25 = vpop.permute.xlu1 %1796 }
 0x114   : > { %v1698_v33 = vpop.permute.xlu0 %1697  ;;  %v2122_v2 = vsel %vm2119_vm10, %v2089_v8, %v1797_v25 }
 0x115   : > { %1516 = vrot.lane.b32.xlu1 %v1149_v35, %s3161_s21  ;;  %3028 = vmatprep.mubr.msk.f32.mxu0 %vm2168_vm11, %v2122_v2  ;;  %v1927_v2 = vsel %vm1921_vm3, %v1894_v31, %v3981_v19 }
 0x116   : > { %1417 = vrot.lane.b32.xlu0 %v3472_v39, %s3160_s16  ;;  %v2057_v39 = vsel %vm2053_vm8, %v2024_v46, %v1596_v48  ;;  %v1960_v49 = vsel %vm1954_vm5, %v1927_v2, %v4001_v57  ;;  %v5265_v57 = vld [vmem:[#allocation4_spill] sm:$0xff] }
 0x117   : > { %v1501_v23 = vpop.permute.xlu1 %1500  ;;  %v2090_v0 = vsel %vm2086_vm9, %v2057_v39, %v1698_v33 }
 0x118   : > { %v1402_v30 = vpop.permute.xlu0 %1401  ;;  %v2025_v41 = vsel %vm2020_vm7, %v1992_v42, %v1501_v23 }
 0x119   : > { %1220 = vrot.lane.b32.xlu1 %v1149_v35, %s3158_s22  ;;  %v1154_v35 = vsel %vm1111_vm2, %v1152_v55, %v1153_v60  ;;  %v1993_v23 = vsel %vm1987_vm6, %v1960_v49, %v1402_v30  ;;  %v1157_v55 = vrot.slane %v5265_v57, 2 }
 0x11a   : > { %1814 = vrot.lane.b32.xlu0 %v1151_v12, %s3164_s17 }
 0x11b   : > { %v4030_v27 = vpop.permute.xlu1 %1204 }
 0x11c   : > { %v1799_v53 = vpop.permute.xlu0 %1798  ;;  %v1928_v4 = vsel %vm1921_vm3, %v1895_v15, %v4030_v27  ;;  %v5269_v27 = vld [vmem:[#allocation7_spill] sm:$0xff] }
 0x11d   : > { %v2123_v7 = vsel %vm2119_vm10, %v2090_v0, %v1799_v53  ;;  %1613 = vrot.lane.b32.xlu1 %v3487_v18, %s3162_s11  ;;  %v1160_v62 = vrot.slane %v5269_v27, 2 }
 0x11e   : > { %1518 = vrot.lane.b32.xlu0 %v1151_v12, %s3161_s21  ;;  %3029 = vmatmul.mubr.msk.f32.gmra.mrb[2].mxu0 %vm2168_vm11, %v2123_v7 }
 0x11f   : > { %v1598_v1 = vpop.permute.xlu1 %1597 }
 0x120   : > { %v1503_v21 = vpop.permute.xlu0 %1502  ;;  %v2058_v54 = vsel %vm2053_vm8, %v2025_v41, %v1598_v1  ;;  %v5266_v1 = vld [vmem:[#allocation8_spill] sm:$0xff] }
 0x121   : > { %1317 = vrot.lane.b32.xlu1 %v3487_v18, %s3159_s10  ;;  %v2026_v40 = vsel %vm2020_vm7, %v1993_v23, %v1503_v21  ;;  %v5267_v21 = vld [vmem:[#allocation5_spill] sm:$0xff] }
 0x122   : > { %1222 = vrot.lane.b32.xlu0 %v1151_v12, %s3158_s22  ;;  %v1158_v60 = vrot.slane %v5267_v21, 2 }
 0x123   : > { %v4040_v38 = vpop.permute.xlu1 %1301 }
 0x124   : > { %v4042_v24 = vpop.permute.xlu0 %1206  ;;  %v1961_v17 = vsel %vm1954_vm5, %v1928_v4, %v4040_v38 }
 0x125   : > { %1715 = vrot.lane.b32.xlu1 %v3514_v6, %s3163_s15 }
 0x126   : > { %1615 = vrot.lane.b32.xlu0 %v3491_v28, %s3162_s11 }
 0x127   : > { %v1700_v5 = vpop.permute.xlu1 %1699 }
 0x128   : > { %v1600_v48 = vpop.permute.xlu0 %1599  ;;  %v2091_v8 = vsel %vm2086_vm9, %v2058_v54, %v1700_v5 }
 0x129   : > { %1419 = vrot.lane.b32.xlu1 %v3514_v6, %s3160_s16  ;;  %v5263_v6 = vld [vmem:[#allocation6_spill] sm:$0xff]  ;;  %v2059_v59 = vsel %vm2053_vm8, %v2026_v40, %v1600_v48 }
 0x12a   : > { %1319 = vrot.lane.b32.xlu0 %v3491_v28, %s3159_s10 }
 0x12b   : > { %v1404_v61 = vpop.permute.xlu1 %1403 }
 0x12c   : > { %v4062_v47 = vpop.permute.xlu0 %1303 }
 0x12d   : > { %1816 = vrot.lane.b32.xlu1 %v1154_v35, %s3164_s17 }
 0x12e   : > { %1717 = vrot.lane.b32.xlu0 %v5263_v6, %s3163_s15 }
 0x12f   : > { %v1801_v25 = vpop.permute.xlu1 %1800 }
 0x130   : > { %v1702_v10 = vpop.permute.xlu0 %1701  ;;  %v2124_v33 = vsel %vm2119_vm10, %v2091_v8, %v1801_v25 }
 0x131   : > { %1520 = vrot.lane.b32.xlu1 %v1154_v35, %s3161_s21  ;;  %3031 = vmatprep.mubr.msk.f32.mxu0 %vm2168_vm11, %v2124_v33  ;;  %v2092_v19 = vsel %vm2086_vm9, %v2059_v59, %v1702_v10  ;;  %v1161_v33 = vsel %vm1111_vm2, %v1158_v60, %v1160_v62 }
 0x132   : > { %1421 = vrot.lane.b32.xlu0 %v5263_v6, %s3160_s16  ;;  %v1994_v6 = vsel %vm1987_vm6, %v1961_v17, %v1404_v61  ;;  %v1896_v61 = vsel %vm1888_vm4, %v3291_v50, %v3798_v43 }
 0x133   : > { %v1505_v12 = vpop.permute.xlu1 %1504  ;;  %v1929_v10 = vsel %vm1921_vm3, %v1896_v61, %v4042_v24 }
 0x134   : > { %v1406_v3 = vpop.permute.xlu0 %1405  ;;  %v2027_v51 = vsel %vm2020_vm7, %v1994_v6, %v1505_v12  ;;  %v1962_v31 = vsel %vm1954_vm5, %v1929_v10, %v4062_v47  ;;  %v5270_v47 = vld [vmem:[#allocation12_spill] sm:$0xff] }
 0x135   : > { %1224 = vrot.lane.b32.xlu1 %v1154_v35, %s3158_s22  ;;  %v1159_v35 = vsel %vm1111_vm2, %v1157_v55, %v1158_v60  ;;  %v1995_v49 = vsel %vm1987_vm6, %v1962_v31, %v1406_v3  ;;  %v1897_v60 = vsel %vm1888_vm4, %v3336_v14, %v3789_v52 }
 0x136   : > { %1818 = vrot.lane.b32.xlu0 %v1156_v34, %s3164_s17 }
 0x137   : > { %v4091_v26 = vpop.permute.xlu1 %1208 }
 0x138   : > { %v1803_v46 = vpop.permute.xlu0 %1802 }
 0x139   : > { %v2125_v39 = vsel %vm2119_vm10, %v2092_v19, %v1803_v46  ;;  %1617 = vrot.lane.b32.xlu1 %v5265_v57, %s3162_s11 }
 0x13a   : > { %1522 = vrot.lane.b32.xlu0 %v1156_v34, %s3161_s21  ;;  %3032 = vmatmul.mubr.msk.f32.gmra.mrb[4].mxu0 %vm2168_vm11, %v2125_v39  ;;  %v5271_v39 = vld [vmem:[#allocation10_spill] sm:$0xff] }
 0x13b   : > { %v1602_v30 = vpop.permute.xlu1 %1601 }
 0x13c   : > { %v1507_v0 = vpop.permute.xlu0 %1506  ;;  %v2060_v54 = vsel %vm2053_vm8, %v2027_v51, %v1602_v30  ;;  %v1162_v30 = vrot.slane %v5270_v47, 2 }
 0x13d   : > { %1321 = vrot.lane.b32.xlu1 %v5265_v57, %s3159_s10  ;;  %v2028_v50 = vsel %vm2020_vm7, %v1995_v49, %v1507_v0  ;;  %v1163_v0 = vrot.slane %v5271_v39, 2 }
 0x13e   : > { %1226 = vrot.lane.b32.xlu0 %v1156_v34, %s3158_s22 }
 0x13f   : > { %v4101_v53 = vpop.permute.xlu1 %1305 }
 0x140   : > { %v4103_v7 = vpop.permute.xlu0 %1210 }
 0x141   : > { %1719 = vrot.lane.b32.xlu1 %v5266_v1, %s3163_s15 }
 0x142   : > { %1619 = vrot.lane.b32.xlu0 %v5267_v21, %s3162_s11 }
 0x143   : > { %v1704_v5 = vpop.permute.xlu1 %1703 }
 0x144   : > { %v1604_v48 = vpop.permute.xlu0 %1603  ;;  %v2093_v44 = vsel %vm2086_vm9, %v2060_v54, %v1704_v5  ;;  %v1930_v5 = vsel %vm1921_vm3, %v1897_v60, %v4091_v26  ;;  %v5273_v26 = vld [vmem:[#allocation11_spill] sm:$0xff] }
 0x145   : > { %1423 = vrot.lane.b32.xlu1 %v5266_v1, %s3160_s16  ;;  %v2061_v43 = vsel %vm2053_vm8, %v2028_v50, %v1604_v48  ;;  %v1164_v48 = vsel %vm1111_vm2, %v1162_v30, %v1163_v0  ;;  %v1963_v15 = vsel %vm1954_vm5, %v1930_v5, %v4101_v53  ;;  %v1165_v6 = vrot.slane %v5273_v26, 2  ;;  %v5275_v50 = vld [vmem:[#allocation15_spill] sm:$0xff] }
 0x146   : > { %1323 = vrot.lane.b32.xlu0 %v5267_v21, %s3159_s10 }
 0x147   : > { %v1408_v42 = vpop.permute.xlu1 %1407  ;;  %v1166_v62 = vsel %vm1111_vm2, %v1163_v0, %v1165_v6 }
 0x148   : > { %v4123_v41 = vpop.permute.xlu0 %1307  ;;  %v1996_v17 = vsel %vm1987_vm6, %v1963_v15, %v1408_v42  ;;  %v1898_v42 = vsel %vm1888_vm4, %v3333_v13, %v3806_v56 }
 0x149   : > { %1820 = vrot.lane.b32.xlu1 %v1159_v35, %s3164_s17  ;;  %v1931_v27 = vsel %vm1921_vm3, %v1898_v42, %v4103_v7 }
 0x14a   : > { %1721 = vrot.lane.b32.xlu0 %v5268_v22, %s3163_s15 }
 0x14b   : > { %v1805_v8 = vpop.permute.xlu1 %1804 }
 0x14c   : > { %v1706_v38 = vpop.permute.xlu0 %1705  ;;  %v2126_v25 = vsel %vm2119_vm10, %v2093_v44, %v1805_v8  ;;  %v1964_v44 = vsel %vm1954_vm5, %v1931_v27, %v4123_v41  ;;  %v5274_v41 = vld [vmem:[#allocation14_spill] sm:$0xff] }
 0x14d   : > { %1524 = vrot.lane.b32.xlu1 %v1159_v35, %s3161_s21  ;;  %3034 = vmatprep.mubr.msk.f32.mxu0 %vm2168_vm11, %v2126_v25  ;;  %v2094_v24 = vsel %vm2086_vm9, %v2061_v43, %v1706_v38  ;;  %v1167_v43 = vrot.slane %v5274_v41, 2 }
 0x14e   : > { %1425 = vrot.lane.b32.xlu0 %v5268_v22, %s3160_s16 }
 0x14f   : > { %v1509_v2 = vpop.permute.xlu1 %1508 }
 0x150   : > { %v1410_v34 = vpop.permute.xlu0 %1409  ;;  %v2029_v14 = vsel %vm2020_vm7, %v1996_v17, %v1509_v2 }
 0x151   : > { %1228 = vrot.lane.b32.xlu1 %v1159_v35, %s3158_s22  ;;  %v1997_v25 = vsel %vm1987_vm6, %v1964_v44, %v1410_v34 }
 0x152   : > { %1822 = vrot.lane.b32.xlu0 %v1161_v33, %s3164_s17 }
 0x153   : > { %v4152_v12 = vpop.permute.xlu1 %1212 }
 0x154   : > { %v1807_v23 = vpop.permute.xlu0 %1806 }
 0x155   : > { %v2127_v40 = vsel %vm2119_vm10, %v2094_v24, %v1807_v23  ;;  %1621 = vrot.lane.b32.xlu1 %v5270_v47, %s3162_s11  ;;  %v1168_v24 = vrot.slane %v5275_v50, 2 }
 0x156   : > { %1526 = vrot.lane.b32.xlu0 %v1161_v33, %s3161_s21  ;;  %3035 = vmatmul.mubr.msk.f32.gmra.mrb[6].mxu0 %vm2168_vm11, %v2127_v40 }
 0x157   : > { %v1606_v3 = vpop.permute.xlu1 %1605  ;;  %v1169_v30 = vsel %vm1111_vm2, %v1167_v43, %v1168_v24 }
 0x158   : > { %v1511_v59 = vpop.permute.xlu0 %1510  ;;  %v2062_v52 = vsel %vm2053_vm8, %v2029_v14, %v1606_v3  ;;  %v1899_v3 = vsel %vm1888_vm4, %v3370_v37, %v3803_v58 }
 0x159   : > { %1325 = vrot.lane.b32.xlu1 %v5270_v47, %s3159_s10  ;;  %v2030_v13 = vsel %vm2020_vm7, %v1997_v25, %v1511_v59  ;;  %v1932_v59 = vsel %vm1921_vm3, %v1899_v3, %v4152_v12  ;;  %v5277_v12 = vld [vmem:[#allocation16_spill] sm:$0xff] }
 0x15a   : > { %1230 = vrot.lane.b32.xlu0 %v1161_v33, %s3158_s22  ;;  %v1170_v5 = vrot.slane %v5277_v12, 2 }
 0x15b   : > { %v4162_v19 = vpop.permute.xlu1 %1309 }
 0x15c   : > { %v4164_v46 = vpop.permute.xlu0 %1214  ;;  %v1965_v0 = vsel %vm1954_vm5, %v1932_v59, %v4162_v19 }
 0x15d   : > { %1723 = vrot.lane.b32.xlu1 %v3559_v20, %s3163_s15 }
 0x15e   : > { %1623 = vrot.lane.b32.xlu0 %v5271_v39, %s3162_s11 }
 0x15f   : > { %v1708_v1 = vpop.permute.xlu1 %1707 }
 0x160   : > { %v1608_v55 = vpop.permute.xlu0 %1607  ;;  %v2095_v51 = vsel %vm2086_vm9, %v2062_v52, %v1708_v1 }
 0x161   : > { %1427 = vrot.lane.b32.xlu1 %v3559_v20, %s3160_s16  ;;  %v5272_v20 = vld [vmem:[#allocation13_spill] sm:$0xff]  ;;  %v2063_v56 = vsel %vm2053_vm8, %v2030_v13, %v1608_v55 }
 0x162   : > { %1327 = vrot.lane.b32.xlu0 %v5271_v39, %s3159_s10 }
 0x163   : > { %v1412_v4 = vpop.permute.xlu1 %1411 }
 0x164   : > { %v4184_v35 = vpop.permute.xlu0 %1311  ;;  %v1998_v60 = vsel %vm1987_vm6, %v1965_v0, %v1412_v4  ;;  %v1900_v4 = vsel %vm1888_vm4, %v3367_v36, %v3814_v29  ;;  %v5283_v0 = vld [vmem:[#allocation2_spill] sm:$0xff] }
 0x165   : > { %1824 = vrot.lane.b32.xlu1 %v1164_v48, %s3164_s17  ;;  %v1933_v14 = vsel %vm1921_vm3, %v1900_v4, %v4164_v46 }
 0x166   : > { %1725 = vrot.lane.b32.xlu0 %v5272_v20, %s3163_s15  ;;  %v1966_v52 = vsel %vm1954_vm5, %v1933_v14, %v4184_v35  ;;  %v5278_v35 = vld [vmem:[#allocation17_spill] sm:$0xff] }
 0x167   : > { %v1809_v22 = vpop.permute.xlu1 %1808 }
 0x168   : > { %v1710_v53 = vpop.permute.xlu0 %1709  ;;  %v2128_v54 = vsel %vm2119_vm10, %v2095_v51, %v1809_v22 }
 0x169   : > { %1528 = vrot.lane.b32.xlu1 %v1164_v48, %s3161_s21  ;;  %3037 = vmatprep.mubr.msk.f32.mxu0 %vm2168_vm11, %v2128_v54  ;;  %v2096_v7 = vsel %vm2086_vm9, %v2063_v56, %v1710_v53 }
 0x16a   : > { %1429 = vrot.lane.b32.xlu0 %v5272_v20, %s3160_s16  ;;  %v1171_v20 = vsel %vm1111_vm2, %v1168_v24, %v1170_v5 }
 0x16b   : > { %v1513_v8 = vpop.permute.xlu1 %1512 }
 0x16c   : > { %v1414_v38 = vpop.permute.xlu0 %1413  ;;  %v2031_v37 = vsel %vm2020_vm7, %v1998_v60, %v1513_v8  ;;  %v5279_v8 = vld [vmem:[#allocation19_spill] sm:$0xff] }
 0x16d   : > { %1232 = vrot.lane.b32.xlu1 %v1164_v48, %s3158_s22  ;;  %v1999_v51 = vsel %vm1987_vm6, %v1966_v52, %v1414_v38  ;;  %v1172_v38 = vrot.slane %v5278_v35, 2  ;;  %v1173_v25 = vrot.slane %v5279_v8, 2 }
 0x16e   : > { %1826 = vrot.lane.b32.xlu0 %v1166_v62, %s3164_s17 }
 0x16f   : > { %v4213_v61 = vpop.permute.xlu1 %1216 }
 0x170   : > { %v1811_v10 = vpop.permute.xlu0 %1810 }
 0x171   : > { %v2129_v33 = vsel %vm2119_vm10, %v2096_v7, %v1811_v10  ;;  %1625 = vrot.lane.b32.xlu1 %v5274_v41, %s3162_s11  ;;  %v1901_v7 = vsel %vm1888_vm4, %v3420_v32, %v3825_v45 }
 0x172   : > { %1530 = vrot.lane.b32.xlu0 %v1166_v62, %s3161_s21  ;;  %3038 = vmatmul.mubr.msk.f32.gmra.mrb[8].mxu0 %vm2168_vm11, %v2129_v33  ;;  %v1934_v10 = vsel %vm1921_vm3, %v1901_v7, %v4213_v61  ;;  %v1174_v33 = vsel %vm1111_vm2, %v1172_v38, %v1173_v25  ;;  %v5281_v61 = vld [vmem:[#allocation20_spill] sm:$0xff] }
 0x173   : > { %v1610_v31 = vpop.permute.xlu1 %1609 }
 0x174   : > { %v1515_v2 = vpop.permute.xlu0 %1514  ;;  %v2064_v58 = vsel %vm2053_vm8, %v2031_v37, %v1610_v31 }
 0x175   : > { %1329 = vrot.lane.b32.xlu1 %v5274_v41, %s3159_s10  ;;  %v2032_v36 = vsel %vm2020_vm7, %v1999_v51, %v1515_v2  ;;  %v5286_v51 = vld [vmem:[#allocation23_spill] sm:$0xff] }
 0x176   : > { %1234 = vrot.lane.b32.xlu0 %v1166_v62, %s3158_s22 }
 0x177   : > { %v4223_v34 = vpop.permute.xlu1 %1313 }
 0x178   : > { %v4225_v49 = vpop.permute.xlu0 %1218  ;;  %v1967_v31 = vsel %vm1954_vm5, %v1934_v10, %v4223_v34  ;;  %v5288_v10 = vld [vmem:[#allocation25_spill] sm:$0xff] }
 0x179   : > { %1727 = vrot.lane.b32.xlu1 %v3592_v63, %s3163_s15 }
 0x17a   : > { %1627 = vrot.lane.b32.xlu0 %v5275_v50, %s3162_s11 }
 0x17b   : > { %v1712_v23 = vpop.permute.xlu1 %1711 }
 0x17c   : > { %v1612_v40 = vpop.permute.xlu0 %1611  ;;  %v2097_v48 = vsel %vm2086_vm9, %v2064_v58, %v1712_v23  ;;  %v1175_v23 = vrot.slane %v5281_v61, 2 }
 0x17d   : > { %1431 = vrot.lane.b32.xlu1 %v3592_v63, %s3160_s16  ;;  %v5276_v63 = vld [vmem:[#allocation18_spill] sm:$0xff]  ;;  %v2065_v29 = vsel %vm2053_vm8, %v2032_v36, %v1612_v40 }
 0x17e   : > { %1331 = vrot.lane.b32.xlu0 %v5275_v50, %s3159_s10  ;;  %v1176_v37 = vsel %vm1111_vm2, %v1173_v25, %v1175_v23 }
 0x17f   : > { %v1416_v1 = vpop.permute.xlu1 %1415 }
 0x180   : > { %v4245_v55 = vpop.permute.xlu0 %1315  ;;  %v2000_v24 = vsel %vm1987_vm6, %v1967_v31, %v1416_v1 }
 0x181   : > { %1828 = vrot.lane.b32.xlu1 %v1169_v30, %s3164_s17 }
 0x182   : > { %1729 = vrot.lane.b32.xlu0 %v5276_v63, %s3163_s15 }
 0x183   : > { %v1813_v15 = vpop.permute.xlu1 %1812 }
 0x184   : > { %v1714_v19 = vpop.permute.xlu0 %1713  ;;  %v2130_v17 = vsel %vm2119_vm10, %v2097_v48, %v1813_v15 }
 0x185   : > { %1532 = vrot.lane.b32.xlu1 %v1169_v30, %s3161_s21  ;;  %3040 = vmatprep.mubr.msk.f32.mxu0 %vm2168_vm11, %v2130_v17  ;;  %v2098_v46 = vsel %vm2086_vm9, %v2065_v29, %v1714_v19  ;;  %v1178_v29 = vrot.slane %v5286_v51, 2 }
 0x186   : > { %1433 = vrot.lane.b32.xlu0 %v5276_v63, %s3160_s16 }
 0x187   : > { %v1517_v26 = vpop.permute.xlu1 %1516 }
 0x188   : > { %v1418_v6 = vpop.permute.xlu0 %1417  ;;  %v2033_v32 = vsel %vm2020_vm7, %v2000_v24, %v1517_v26 }
 0x189   : > { %1236 = vrot.lane.b32.xlu1 %v1169_v30, %s3158_s22  ;;  %v5282_v30 = vld [vmem:[#allocation37_spill] sm:$0xff] }
 0x18a   : > { %1830 = vrot.lane.b32.xlu0 %v1171_v20, %s3164_s17  ;;  %v1902_v1 = vsel %vm1888_vm4, %v5283_v0, %v5282_v30 }
 0x18b   : > { %v4274_v22 = vpop.permute.xlu1 %1220  ;;  %v1935_v60 = vsel %vm1921_vm3, %v1902_v1, %v4225_v49 }
 0x18c   : > { %v1815_v53 = vpop.permute.xlu0 %1814  ;;  %v1968_v63 = vsel %vm1954_vm5, %v1935_v60, %v4245_v55  ;;  %v5284_v55 = vld [vmem:[#allocation21_spill] sm:$0xff] }
 0x18d   : > { %v2131_v54 = vsel %vm2119_vm10, %v2098_v46, %v1815_v53  ;;  %1629 = vrot.lane.b32.xlu1 %v5278_v35, %s3162_s11  ;;  %v2001_v5 = vsel %vm1987_vm6, %v1968_v63, %v1418_v6  ;;  %v5285_v6 = vld [vmem:[#allocation26_spill] sm:$0xff]  ;;  %v1177_v36 = vrot.slane %v5284_v55, 2 }
 0x18e   : > { %1534 = vrot.lane.b32.xlu0 %v1171_v20, %s3161_s21  ;;  %3041 = vmatmul.mubr.msk.f32.gmra.mrb[10].mxu0 %vm2168_vm11, %v2131_v54  ;;  %v5287_v54 = vld [vmem:[#allocation39_spill] sm:$0xff] }
 0x18f   : > { %v1614_v42 = vpop.permute.xlu1 %1613  ;;  %v1179_v38 = vsel %vm1111_vm2, %v1177_v36, %v1178_v29 }
 0x190   : > { %v1519_v27 = vpop.permute.xlu0 %1518  ;;  %v2066_v45 = vsel %vm2053_vm8, %v2033_v32, %v1614_v42  ;;  %v1903_v42 = vsel %vm1888_vm4, %v3455_v16, %v5287_v54 }
 0x191   : > { %1333 = vrot.lane.b32.xlu1 %v5278_v35, %s3159_s10  ;;  %v2034_v48 = vsel %vm2020_vm7, %v2001_v5, %v1519_v27  ;;  %v1936_v27 = vsel %vm1921_vm3, %v1903_v42, %v4274_v22  ;;  %v5289_v22 = vld [vmem:[#allocation24_spill] sm:$0xff]  ;;  %v5292_v5 = vld [vmem:[#allocation31_spill] sm:$0xff] }
 0x192   : > { %1238 = vrot.lane.b32.xlu0 %v1171_v20, %s3158_s22  ;;  %v1180_v31 = vrot.slane %v5289_v22, 2 }
 0x193   : > { %v4284_v62 = vpop.permute.xlu1 %1317 }
 0x194   : > { %v4286_v44 = vpop.permute.xlu0 %1222  ;;  %v1969_v25 = vsel %vm1954_vm5, %v1936_v27, %v4284_v62  ;;  %v1181_v23 = vsel %vm1111_vm2, %v1178_v29, %v1180_v31 }
 0x195   : > { %1731 = vrot.lane.b32.xlu1 %v3618_v9, %s3163_s15 }
 0x196   : > { %1631 = vrot.lane.b32.xlu0 %v5279_v8, %s3162_s11 }
 0x197   : > { %v1716_v13 = vpop.permute.xlu1 %1715 }
 0x198   : > { %v1616_v56 = vpop.permute.xlu0 %1615  ;;  %v2099_v40 = vsel %vm2086_vm9, %v2066_v45, %v1716_v13  ;;  %v5290_v45 = vld [vmem:[#allocation38_spill] sm:$0xff] }
 0x199   : > { %1435 = vrot.lane.b32.xlu1 %v3618_v9, %s3160_s16  ;;  %v5280_v9 = vld [vmem:[#allocation22_spill] sm:$0xff]  ;;  %v2067_v15 = vsel %vm2053_vm8, %v2034_v48, %v1616_v56  ;;  %v5293_v48 = vld [vmem:[#allocation27_spill] sm:$0xff] }
 0x19a   : > { %1335 = vrot.lane.b32.xlu0 %v5279_v8, %s3159_s10 }
 0x19b   : > { %v1420_v2 = vpop.permute.xlu1 %1419 }
 0x19c   : > { %v4306_v43 = vpop.permute.xlu0 %1319  ;;  %v2002_v7 = vsel %vm1987_vm6, %v1969_v25, %v1420_v2  ;;  %v1904_v2 = vsel %vm1888_vm4, %v3449_v11, %v5290_v45 }
 0x19d   : > { %1832 = vrot.lane.b32.xlu1 %v1174_v33, %s3164_s17  ;;  %v1937_v61 = vsel %vm1921_vm3, %v1904_v2, %v4286_v44 }
 0x19e   : > { %1733 = vrot.lane.b32.xlu0 %v5280_v9, %s3163_s15 }
 0x19f   : > { %v1817_v3 = vpop.permute.xlu1 %1816 }
 0x1a0   : > { %v1718_v34 = vpop.permute.xlu0 %1717  ;;  %v2132_v59 = vsel %vm2119_vm10, %v2099_v40, %v1817_v3  ;;  %v1970_v40 = vsel %vm1954_vm5, %v1937_v61, %v4306_v43  ;;  %v5291_v43 = vld [vmem:[#allocation29_spill] sm:$0xff] }
 0x1a1   : > { %1536 = vrot.lane.b32.xlu1 %v1174_v33, %s3161_s21  ;;  %3043 = vmatprep.mubr.msk.f32.mxu0 %vm2168_vm11, %v2132_v59  ;;  %v2100_v49 = vsel %vm2086_vm9, %v2067_v15, %v1718_v34  ;;  %v1182_v15 = vrot.slane %v5291_v43, 2 }
 0x1a2   : > { %1437 = vrot.lane.b32.xlu0 %v5280_v9, %s3160_s16 }
 0x1a3   : > { %v1521_v58 = vpop.permute.xlu1 %1520 }
 0x1a4   : > { %v1422_v12 = vpop.permute.xlu0 %1421  ;;  %v2035_v16 = vsel %vm2020_vm7, %v2002_v7, %v1521_v58 }
 0x1a5   : > { %1240 = vrot.lane.b32.xlu1 %v1174_v33, %s3158_s22  ;;  %v2003_v59 = vsel %vm1987_vm6, %v1970_v40, %v1422_v12 }
 0x1a6   : > { %1834 = vrot.lane.b32.xlu0 %v1176_v37, %s3164_s17 }
 0x1a7   : > { %v4335_v19 = vpop.permute.xlu1 %1224 }
 0x1a8   : > { %v1819_v17 = vpop.permute.xlu0 %1818 }
 0x1a9   : > { %v2133_v4 = vsel %vm2119_vm10, %v2100_v49, %v1819_v17  ;;  %1633 = vrot.lane.b32.xlu1 %v5284_v55, %s3162_s11  ;;  %v1183_v49 = vrot.slane %v5293_v48, 2 }
 0x1aa   : > { %1538 = vrot.lane.b32.xlu0 %v1176_v37, %s3161_s21  ;;  %3044 = vmatmul.mubr.msk.f32.gmra.mrb[12].mxu0 %vm2168_vm11, %v2133_v4 }
 0x1ab   : > { %v1618_v14 = vpop.permute.xlu1 %1617  ;;  %v1184_v36 = vsel %vm1111_vm2, %v1182_v15, %v1183_v49 }
 0x1ac   : > { %v1523_v20 = vpop.permute.xlu0 %1522  ;;  %v2068_v33 = vsel %vm2053_vm8, %v2035_v16, %v1618_v14  ;;  %v5294_v14 = vld [vmem:[#allocation41_spill] sm:$0xff] }
 0x1ad   : > { %1337 = vrot.lane.b32.xlu1 %v5284_v55, %s3159_s10  ;;  %v2036_v11 = vsel %vm2020_vm7, %v2003_v59, %v1523_v20  ;;  %v1905_v20 = vsel %vm1888_vm4, %v3487_v18, %v5294_v14  ;;  %v4435_v18 = vld [vmem:[%s5143_s4] ss:$0 sm:$0xff] }
 0x1ae   : > { %1242 = vrot.lane.b32.xlu0 %v1176_v37, %s3158_s22 }
 0x1af   : > { %v4345_v52 = vpop.permute.xlu1 %1321 }
 0x1b0   : > { %v4347_v26 = vpop.permute.xlu0 %1226 }
 0x1b1   : > { %1735 = vrot.lane.b32.xlu1 %v5285_v6, %s3163_s15 }
 0x1b2   : > { %1635 = vrot.lane.b32.xlu0 %v5286_v51, %s3162_s11 }
 0x1b3   : > { %v1720_v46 = vpop.permute.xlu1 %1719 }
 0x1b4   : > { %v1620_v53 = vpop.permute.xlu0 %1619  ;;  %v2101_v24 = vsel %vm2086_vm9, %v2068_v33, %v1720_v46  ;;  %v5296_v33 = vld [vmem:[#allocation28_spill] sm:$0xff] }
 0x1b5   : > { %1439 = vrot.lane.b32.xlu1 %v5285_v6, %s3160_s16  ;;  %v2069_v30 = vsel %vm2053_vm8, %v2036_v11, %v1620_v53  ;;  %v1938_v6 = vsel %vm1921_vm3, %v1905_v20, %v4335_v19  ;;  %v1185_v22 = vrot.slane %v5296_v33, 2  ;;  %v5298_v11 = vld [vmem:[#allocation34_spill] sm:$0xff] }
 0x1b6   : > { %1339 = vrot.lane.b32.xlu0 %v5286_v51, %s3159_s10  ;;  %v1971_v29 = vsel %vm1954_vm5, %v1938_v6, %v4345_v52  ;;  %v5295_v52 = vld [vmem:[#allocation30_spill] sm:$0xff]  ;;  %v1187_v15 = vrot.slane %v5298_v11, 2 }
 0x1b7   : > { %v1424_v13 = vpop.permute.xlu1 %1423 }
 0x1b8   : > { %v4367_v56 = vpop.permute.xlu0 %1323  ;;  %v2004_v54 = vsel %vm1987_vm6, %v1971_v29, %v1424_v13 }
 0x1b9   : > { %1836 = vrot.lane.b32.xlu1 %v1179_v38, %s3164_s17 }
 0x1ba   : > { %1737 = vrot.lane.b32.xlu0 %v5288_v10, %s3163_s15 }
 0x1bb   : > { %v1821_v32 = vpop.permute.xlu1 %1820 }
 0x1bc   : > { %v1722_v62 = vpop.permute.xlu0 %1721  ;;  %v2134_v9 = vsel %vm2119_vm10, %v2101_v24, %v1821_v32  ;;  %v5297_v24 = vld [vmem:[#allocation40_spill] sm:$0xff] }
 0x1bd   : > { %1540 = vrot.lane.b32.xlu1 %v1179_v38, %s3161_s21  ;;  %3046 = vmatprep.mubr.msk.f32.mxu0 %vm2168_vm11, %v2134_v9  ;;  %v2102_v44 = vsel %vm2086_vm9, %v2069_v30, %v1722_v62  ;;  %v1906_v32 = vsel %vm1888_vm4, %v3491_v28, %v5297_v24  ;;  %v1186_v28 = vsel %vm1111_vm2, %v1183_v49, %v1185_v22 }
 0x1be   : > { %1441 = vrot.lane.b32.xlu0 %v5288_v10, %s3160_s16  ;;  %v1939_v62 = vsel %vm1921_vm3, %v1906_v32, %v4347_v26 }
 0x1bf   : > { %v1525_v3 = vpop.permute.xlu1 %1524  ;;  %v1972_v9 = vsel %vm1954_vm5, %v1939_v62, %v4367_v56 }
 0x1c0   : > { %v1426_v34 = vpop.permute.xlu0 %1425  ;;  %v2037_v42 = vsel %vm2020_vm7, %v2004_v54, %v1525_v3 }
 0x1c1   : > { %1244 = vrot.lane.b32.xlu1 %v1179_v38, %s3158_s22  ;;  %v2005_v61 = vsel %vm1987_vm6, %v1972_v9, %v1426_v34 }
 0x1c2   : > { %1838 = vrot.lane.b32.xlu0 %v1181_v23, %s3164_s17 }
 0x1c3   : > { %v4396_v0 = vpop.permute.xlu1 %1228 }
 0x1c4   : > { %v1823_v1 = vpop.permute.xlu0 %1822 }
 0x1c5   : > { %v2135_v60 = vsel %vm2119_vm10, %v2102_v44, %v1823_v1  ;;  %1637 = vrot.lane.b32.xlu1 %v5291_v43, %s3162_s11 }
 0x1c6   : > { %1542 = vrot.lane.b32.xlu0 %v1181_v23, %s3161_s21  ;;  %3047 = vmatmul.mubr.msk.f32.gmra.mrb[14].mxu0 %vm2168_vm11, %v2135_v60  ;;  %v525_v60 = vld [vmem:[%s3242_s14 + $0xf0] sm:$0xff] }
 0x1c7   : > { %v1622_v37 = vpop.permute.xlu1 %1621 }
 0x1c8   : > { %v1527_v63 = vpop.permute.xlu0 %1526  ;;  %v2070_v27 = vsel %vm2053_vm8, %v2037_v42, %v1622_v37  ;;  %v526_v37 = vld [vmem:[%s3242_s14 + $0xf8] sm:$0xff] }
 0x1c9   : > { %1341 = vrot.lane.b32.xlu1 %v5291_v43, %s3159_s10 }
 0x1ca   : > { %1246 = vrot.lane.b32.xlu0 %v1181_v23, %s3158_s22  ;;  %v2038_v23 = vsel %vm2020_vm7, %v2005_v61, %v1527_v63  ;;  %v5299_v63 = vld [vmem:[#allocation36_spill] sm:$0xff] }
 0x1cb   : > { %v4406_v58 = vpop.permute.xlu1 %1325 }
 0x1cc   : > { %v4408_v12 = vpop.permute.xlu0 %1230 }
 0x1cd   : > { %1739 = vrot.lane.b32.xlu1 %v5292_v5, %s3163_s15 }
 0x1ce   : > { %1639 = vrot.lane.b32.xlu0 %v5293_v48, %s3162_s11 }
 0x1cf   : > { %v1724_v17 = vpop.permute.xlu1 %1723 }
 0x1d0   : > { %v1624_v4 = vpop.permute.xlu0 %1623  ;;  %v2103_v13 = vsel %vm2086_vm9, %v2070_v27, %v1724_v17  ;;  %v4509_v17 = vld [vmem:[%s5144_s5] ss:$0 sm:$0xff] }
 0x1d1   : > { %1443 = vrot.lane.b32.xlu1 %v5292_v5, %s3160_s16  ;;  %v2071_v26 = vsel %vm2053_vm8, %v2038_v23, %v1624_v4  ;;  %v5300_v5 = vld [vmem:[#allocation32_spill] sm:$0xff]  ;;  %v568_v4 = vmul.f32 %v4509_v17, %v525_v60  ;;  %v569_v6 = vmul.f32 %v4509_v17, %v526_v37 }
 0x1d2   : > { %1343 = vrot.lane.b32.xlu0 %v5293_v48, %s3159_s10  ;;  %v1188_v49 = vrot.slane %v5300_v5, 2 }
 0x1d3   : > { %v4428_v46 = vpop.permute.xlu1 %1427 }
 0x1d4   : > { %v4430_v53 = vpop.permute.xlu0 %1327  ;;  %v3027_v19 = vpop.f32.mrb[0].mxu0  ;;  %v1189_v42 = vsel %vm1111_vm2, %v1187_v15, %v1188_v49 }
 0x1d5   : > { %1840 = vrot.lane.b32.xlu1 %v1184_v36, %s3164_s17  ;;  %v4450_v38 = vadd.f32 %v3027_v19, %v4435_v18  ;;  %v2331_v25 = vpop.f32.mrb[1].mxu0  ;;  %v4526_v19 = vld [vmem:[%s5145_s6] ss:$0 sm:$0xff] }
 0x1d6   : > { %1741 = vrot.lane.b32.xlu0 %v5295_v52, %s3163_s15  ;;  %v4454_v7 = vadd.f32 %v4435_v18, %v2331_v25 }
 0x1d7   : > { %v1825_v16 = vpop.permute.xlu1 %1824  ;;  %2694 = vst.msk [vmem:[%s4443_s24 + $0x8] sm:$0xff] %vm1888_vm4, %v4450_v38 }
 0x1d8   : > { %v1726_v10 = vpop.permute.xlu0 %1725  ;;  %v2136_v31 = vsel %vm2119_vm10, %v2103_v13, %v1825_v16  ;;  %2693 = vst.msk [vmem:[%s4443_s24] sm:$0xff] %vm1888_vm4, %v4454_v7 }
 0x1d9   : > { %1544 = vrot.lane.b32.xlu1 %v1184_v36, %s3161_s21  ;;  %3049 = vmatprep.mubr.msk.f32.mxu1 %vm2168_vm11, %v2136_v31  ;;  %v2104_v40 = vsel %vm2086_vm9, %v2071_v26, %v1726_v10  ;;  %v5302_v31 = vld [vmem:[#allocation35_spill] sm:$0xff]  ;;  %v5304_v26 = vld [vmem:[#allocation42_spill] sm:$0xff] }
 0x1da   : > { %1445 = vrot.lane.b32.xlu0 %v5295_v52, %s3160_s16  ;;  %v611_v52 = vadd.f32 %v4526_v19, %v568_v4 }
 0x1db   : > { %v1529_v45 = vpop.permute.xlu1 %1528 }
 0x1dc   : > { %v4475_v2 = vpop.permute.xlu0 %1429  ;;  %v647_v24 = vmax.f32 %v611_v52, 0.0  ;;  %v527_v52 = vld [vmem:[%s470_s9] sm:$0xff] }
 0x1dd   : > { %1248 = vrot.lane.b32.xlu1 %v1184_v36, %s3158_s22  ;;  %v5301_v36 = vld [vmem:[#allocation43_spill] sm:$0xff] }
 0x1de   : > { %1842 = vrot.lane.b32.xlu0 %v1186_v28, %s3164_s17  ;;  %v1907_v29 = vsel %vm1888_vm4, %v5265_v57, %v5301_v36 }
 0x1df   : > { %v4484_v56 = vpop.permute.xlu1 %1232  ;;  %v1940_v54 = vsel %vm1921_vm3, %v1907_v29, %v4396_v0  ;;  %v612_v0 = vadd.f32 %v4526_v19, %v569_v6 }
 0x1e0   : > { %v1827_v3 = vpop.permute.xlu0 %1826  ;;  %v1973_v57 = vsel %vm1954_vm5, %v1940_v54, %v4406_v58 }
 0x1e1   : > { %v2137_v59 = vsel %vm2119_vm10, %v2104_v40, %v1827_v3  ;;  %1641 = vrot.lane.b32.xlu1 %v5298_v11, %s3162_s11  ;;  %v2006_v13 = vsel %vm1987_vm6, %v1973_v57, %v4428_v46  ;;  %v648_v61 = vmax.f32 %v612_v0, 0.0  ;;  %v1908_v40 = vsel %vm1888_vm4, %v5267_v21, %v5304_v26  ;;  %v528_v0 = vld [vmem:[%s470_s9 + $0x8] sm:$0xff] }
 0x1e2   : > { %3050 = vmatmul.mubr.msk.f32.vlgmr.msra.gmra.mrb[0].mxu1 %vm2168_vm11, %v2137_v59  ;;  %1546 = vrot.lane.b32.xlu0 %v1186_v28, %s3161_s21  ;;  %v2039_v16 = vsel %vm2020_vm7, %v2006_v13, %v1529_v45  ;;  %v5303_v45 = vld [vmem:[#allocation33_spill] sm:$0xff]  ;;  %v1941_v3 = vsel %vm1921_vm3, %v1908_v40, %v4408_v12  ;;  %v685_v59 = vrot.slane %v647_v24, 1 }
 0x1e3   : > { %v1626_v34 = vpop.permute.xlu1 %1625  ;;  %v1974_v60 = vsel %vm1954_vm5, %v1941_v3, %v4430_v53  ;;  %v773_v15 = vrot.slane %v648_v61, 7  ;;  %v846_v57 = vrot.slane %v648_v61, 5 }
 0x1e4   : > { %v1531_v30 = vpop.permute.xlu0 %1530  ;;  %v2072_v33 = vsel %vm2053_vm8, %v2039_v16, %v1626_v34  ;;  %v772_v34 = vrot.slane %v647_v24, 7  ;;  %v2007_v4 = vsel %vm1987_vm6, %v1974_v60, %v4475_v2  ;;  %v570_v16 = vmul.f32 %v4509_v17, %v527_v52 }
 0x1e5   : > { %1345 = vrot.lane.b32.xlu1 %v5298_v11, %s3159_s10 }
 0x1e6   : > { %1250 = vrot.lane.b32.xlu0 %v1186_v28, %s3158_s22  ;;  %v1190_v28 = vrot.slane %v5303_v45, 2  ;;  %v882_v53 = vsel %vm723_vm0, %v685_v59, %v772_v34  ;;  %v4584_v29 = vsel %vm723_vm0, %v772_v34, %v773_v15 }
 0x1e7   : > { %v4494_v44 = vpop.permute.xlu1 %1329  ;;  %v1487_v24 = vrot.slane %v882_v53, 2 }
 0x1e8   : > { %v4496_v1 = vpop.permute.xlu0 %1234 }
 0x1e9   : > { %1743 = vrot.lane.b32.xlu1 %v5299_v63, %s3163_s15 }
 0x1ea   : > { %1643 = vrot.lane.b32.xlu0 %v5300_v5, %s3162_s11 }
 0x1eb   : > { %v1728_v14 = vpop.permute.xlu1 %1727 }
 0x1ec   : > { %v1628_v20 = vpop.permute.xlu0 %1627  ;;  %v2105_v32 = vsel %vm2086_vm9, %v2072_v33, %v1728_v14  ;;  %v2040_v14 = vsel %vm2020_vm7, %v2007_v4, %v1531_v30  ;;  %v1386_v30 = vrot.slane %v882_v53, 1 }
 0x1ed   : > { %1447 = vrot.lane.b32.xlu1 %v5299_v63, %s3160_s16  ;;  %v1191_v63 = vsel %vm1111_vm2, %v1188_v49, %v1190_v28  ;;  %v2073_v12 = vsel %vm2053_vm8, %v2040_v14, %v1628_v20  ;;  %v1387_v20 = vrot.slane %v4584_v29, 1 }
 0x1ee   : > { %1347 = vrot.lane.b32.xlu0 %v5300_v5, %s3159_s10 }
 0x1ef   : > { %v4531_v27 = vpop.permute.xlu1 %1431  ;;  %v1388_v13 = vsel %vm934_vm1, %v1386_v30, %v1387_v20 }
 0x1f0   : > { %v4533_v25 = vpop.permute.xlu0 %1331 }
 0x1f1   : > { %v3030_v10 = vpop.f32.mrb[2].mxu0  ;;  %1844 = vrot.lane.b32.xlu1 %v1189_v42, %s3164_s17 }
 0x1f2   : > { %v4542_v58 = vadd.f32 %v3030_v10, %v4435_v18  ;;  %v2341_v22 = vpop.f32.mrb[3].mxu0  ;;  %1745 = vrot.lane.b32.xlu0 %v5302_v31, %s3163_s15 }
 0x1f3   : > { %v4548_v46 = vadd.f32 %v4435_v18, %v2341_v22  ;;  %v1829_v62 = vpop.permute.xlu1 %1828  ;;  %v571_v22 = vmul.f32 %v4509_v17, %v528_v0 }
 0x1f4   : > { %v1730_v9 = vpop.permute.xlu0 %1729  ;;  %2696 = vst.msk [vmem:[%s4443_s24 + $0x18] sm:$0xff] %vm1888_vm4, %v4542_v58  ;;  %v2138_v23 = vsel %vm2119_vm10, %v2105_v32, %v1829_v62  ;;  %v1488_v32 = vrot.slane %v4584_v29, 2  ;;  %v613_v62 = vadd.f32 %v4526_v19, %v570_v16 }
 0x1f5   : > { %2695 = vst.msk [vmem:[%s4443_s24 + $0x10] sm:$0xff] %vm1888_vm4, %v4548_v46  ;;  %1548 = vrot.lane.b32.xlu1 %v1189_v42, %s3161_s21  ;;  %3052 = vmatprep.mubr.msk.f32.mxu1 %vm2168_vm11, %v2138_v23  ;;  %v2106_v6 = vsel %vm2086_vm9, %v2073_v12, %v1730_v9  ;;  %v614_v61 = vadd.f32 %v4526_v19, %v571_v22  ;;  %v5305_v23 = vld [vmem:[#allocation45_spill] sm:$0xff] }
 0x1f6   : > { %1449 = vrot.lane.b32.xlu0 %v5302_v31, %s3160_s16  ;;  %v900_v31 = vsel %vm723_vm0, %v773_v15, %v846_v57  ;;  %v1909_v17 = vsel %vm1888_vm4, %v5270_v47, %v5305_v23  ;;  %v1489_v40 = vsel %vm1111_vm2, %v1487_v24, %v1488_v32  ;;  %v649_v3 = vmax.f32 %v613_v62, 0.0 }
 0x1f7   : > { %v1533_v21 = vpop.permute.xlu1 %1532  ;;  %v1389_v28 = vrot.slane %v900_v31, 1  ;;  %v1942_v26 = vsel %vm1921_vm3, %v1909_v17, %v4484_v56  ;;  %v650_v60 = vmax.f32 %v614_v61, 0.0  ;;  %v1490_v12 = vrot.slane %v900_v31, 2 }
 0x1f8   : > { %v4569_v37 = vpop.permute.xlu0 %1433  ;;  %v1975_v59 = vsel %vm1954_vm5, %v1942_v26, %v4494_v44 }
 0x1f9   : > { %1252 = vrot.lane.b32.xlu1 %v1189_v42, %s3158_s22  ;;  %v1390_v47 = vsel %vm934_vm1, %v1387_v20, %v1389_v28  ;;  %v686_v20 = vrot.slane %v649_v3, 1  ;;  %v1491_v0 = vsel %vm1111_vm2, %v1488_v32, %v1490_v12  ;;  %v5307_v12 = vld [vmem:[#allocation47_spill] sm:$0xff] }
 0x1fa   : > { %1846 = vrot.lane.b32.xlu0 %v1191_v63, %s3164_s17 }
 0x1fb   : > { %v4581_v36 = vpop.permute.xlu1 %1236 }
 0x1fc   : > { %v1831_v49 = vpop.permute.xlu0 %1830 }
 0x1fd   : > { %v2139_v2 = vsel %vm2119_vm10, %v2106_v6, %v1831_v49  ;;  %1645 = vrot.lane.b32.xlu1 %v882_v53, %s3162_s11 }
 0x1fe   : > { %3053 = vmatmul.mubr.msk.f32.gmra.mrb[2].mxu1 %vm2168_vm11, %v2139_v2  ;;  %1550 = vrot.lane.b32.xlu0 %v1191_v63, %s3161_s21  ;;  %v847_v2 = vrot.slane %v650_v60, 5 }
 0x1ff   : > { %v1630_v54 = vpop.permute.xlu1 %1629 }
 0x200   : > { %v4594_v42 = vpop.permute.xlu0 %1534 }
 0x201   : > { %1349 = vrot.lane.b32.xlu1 %v882_v53, %s3159_s10  ;;  %v775_v53 = vrot.slane %v649_v3, 7 }
 0x202   : > { %1254 = vrot.lane.b32.xlu0 %v1191_v63, %s3158_s22  ;;  %v2008_v63 = vsel %vm1987_vm6, %v1975_v59, %v4531_v27  ;;  %s2920_s22 = sshll.u32 %s5322_s27, 1 }
 0x203   : > { %v4600_v10 = vpop.permute.xlu1 %1333  ;;  %v2041_v56 = vsel %vm2020_vm7, %v2008_v63, %v1533_v21  ;;  %v883_v62 = vsel %vm723_vm0, %v686_v20, %v775_v53 }
 0x204   : > { %v4602_v33 = vpop.permute.xlu0 %1238  ;;  %v2074_v4 = vsel %vm2053_vm8, %v2041_v56, %v1630_v54  ;;  %v5306_v54 = vld [vmem:[#allocation44_spill] sm:$0xff]  ;;  %v1686_v17 = vrot.slane %v883_v62, 1 }
 0x205   : > { %1747 = vrot.lane.b32.xlu1 %v1388_v13, %s3163_s15  ;;  %v1910_v52 = vsel %vm1888_vm4, %v5271_v39, %v5306_v54 }
 0x206   : > { %1647 = vrot.lane.b32.xlu0 %v4584_v29, %s3162_s11  ;;  %v1943_v57 = vsel %vm1921_vm3, %v1910_v52, %v4496_v1 }
 0x207   : > { %v1732_v9 = vpop.permute.xlu1 %1731 }
 0x208   : > { %v1632_v45 = vpop.permute.xlu0 %1631  ;;  %v2107_v6 = vsel %vm2086_vm9, %v2074_v4, %v1732_v9 }
 0x209   : > { %1451 = vrot.lane.b32.xlu1 %v1388_v13, %s3160_s16  ;;  %v1976_v13 = vsel %vm1954_vm5, %v1943_v57, %v4533_v25 }
 0x20a   : > { %1351 = vrot.lane.b32.xlu0 %v4584_v29, %s3159_s10  ;;  %v776_v29 = vrot.slane %v650_v60, 7  ;;  %v2009_v24 = vsel %vm1987_vm6, %v1976_v13, %v4569_v37  ;;  %v5308_v13 = vld [vmem:[#allocation46_spill] sm:$0xff] }
 0x20b   : > { %v4623_v34 = vpop.permute.xlu1 %1435  ;;  %v2042_v1 = vsel %vm2020_vm7, %v2009_v24, %v4594_v42 }
 0x20c   : > { %v4625_v19 = vpop.permute.xlu0 %1335  ;;  %v777_v39 = vsel %vm723_vm0, %v775_v53, %v776_v29  ;;  %v901_v31 = vsel %vm723_vm0, %v776_v29, %v847_v2  ;;  %v2075_v32 = vsel %vm2053_vm8, %v2042_v1, %v1632_v45  ;;  %v1911_v53 = vsel %vm1888_vm4, %v5274_v41, %v5307_v12 }
 0x20d   : > { %v3033_v15 = vpop.f32.mrb[4].mxu0  ;;  %1848 = vrot.lane.b32.xlu1 %v1489_v40, %s3164_s17  ;;  %v1687_v25 = vrot.slane %v777_v39, 1  ;;  %v1689_v9 = vrot.slane %v901_v31, 1  ;;  %v1788_v42 = vrot.slane %v777_v39, 2  ;;  %v1790_v26 = vrot.slane %v901_v31, 2 }
 0x20e   : > { %v4634_v44 = vadd.f32 %v3033_v15, %v4435_v18  ;;  %v2351_v14 = vpop.f32.mrb[5].mxu0  ;;  %1749 = vrot.lane.b32.xlu0 %v1390_v47, %s3163_s15 }
 0x20f   : > { %v4639_v27 = vadd.f32 %v4435_v18, %v2351_v14  ;;  %v1833_v21 = vpop.permute.xlu1 %1832  ;;  %v1690_v45 = vsel %vm934_vm1, %v1687_v25, %v1689_v9  ;;  %v1791_v60 = vsel %vm1111_vm2, %v1788_v42, %v1790_v26  ;;  %v5309_v26 = vld [vmem:[#allocation49_spill] sm:$0xff] }
 0x210   : > { %v1734_v49 = vpop.permute.xlu0 %1733  ;;  %2698 = vst.msk [vmem:[%s4443_s24 + $0x28] sm:$0xff] %vm1888_vm4, %v4634_v44  ;;  %v2140_v30 = vsel %vm2119_vm10, %v2107_v6, %v1833_v21  ;;  %v1944_v6 = vsel %vm1921_vm3, %v1911_v53, %v4581_v36 }
 0x211   : > { %2697 = vst.msk [vmem:[%s4443_s24 + $0x20] sm:$0xff] %vm1888_vm4, %v4639_v27  ;;  %1552 = vrot.lane.b32.xlu1 %v1489_v40, %s3161_s21  ;;  %3055 = vmatprep.mubr.msk.f32.mxu1 %vm2168_vm11, %v2140_v30  ;;  %v2108_v28 = vsel %vm2086_vm9, %v2075_v32, %v1734_v49  ;;  %v1787_v40 = vrot.slane %v883_v62, 2  ;;  %v1977_v21 = vsel %vm1954_vm5, %v1944_v6, %v4600_v10 }
 0x212   : > { %1453 = vrot.lane.b32.xlu0 %v1390_v47, %s3160_s16  ;;  %v1688_v47 = vsel %vm934_vm1, %v1686_v17, %v1687_v25  ;;  %v2010_v2 = vsel %vm1987_vm6, %v1977_v21, %v4623_v34 }
 0x213   : > { %v1537_v16 = vpop.permute.xlu1 %1536  ;;  %v1789_v15 = vsel %vm1111_vm2, %v1787_v40, %v1788_v42 }
 0x214   : > { %v1438_v22 = vpop.permute.xlu0 %1437  ;;  %v2043_v30 = vsel %vm2020_vm7, %v2010_v2, %v1537_v16  ;;  %v1912_v16 = vsel %vm1888_vm4, %v5275_v50, %v5308_v13 }
 0x215   : > { %1554 = vrot.lane.b32.xlu1 %v1491_v0, %s3161_s21  ;;  %s492_s21 = scalar_lea.vmem %s5147_s8, %s2920_s22 }
 0x216   : > { %1850 = vrot.lane.b32.xlu0 %v1491_v0, %s3164_s17 }
 0x217   : > { %v4670_v61 = vpop.permute.xlu1 %1240 }
 0x218   : > { %v1835_v23 = vpop.permute.xlu0 %1834 }
 0x219   : > { %v2141_v37 = vsel %vm2119_vm10, %v2108_v28, %v1835_v23  ;;  %1651 = vrot.lane.b32.xlu1 %v777_v39, %s3162_s11  ;;  %v1945_v39 = vsel %vm1921_vm3, %v1912_v16, %v4602_v33 }
 0x21a   : > { %3056 = vmatmul.mubr.msk.f32.gmra.mrb[4].mxu1 %vm2168_vm11, %v2141_v37  ;;  %1649 = vrot.lane.b32.xlu0 %v883_v62, %s3162_s11  ;;  %v1978_v31 = vsel %vm1954_vm5, %v1945_v39, %v4625_v19 }
 0x21b   : > { %v1634_v3 = vpop.permute.xlu1 %1633  ;;  %v2011_v1 = vsel %vm1987_vm6, %v1978_v31, %v1438_v22  ;;  %v1913_v22 = vsel %vm1888_vm4, %v5278_v35, %v5309_v26 }
 0x21c   : > { %v1539_v59 = vpop.permute.xlu0 %1538  ;;  %v2076_v54 = vsel %vm2053_vm8, %v2043_v30, %v1634_v3  ;;  %v1946_v40 = vsel %vm1921_vm3, %v1913_v22, %v4670_v61 }
 0x21d   : > { %1753 = vrot.lane.b32.xlu1 %v1690_v45, %s3163_s15  ;;  %v2044_v32 = vsel %vm2020_vm7, %v2011_v1, %v1539_v59 }
 0x21e   : > { %1751 = vrot.lane.b32.xlu0 %v1688_v47, %s3163_s15 }
 0x21f   : > { %v1338_v63 = vpop.permute.xlu1 %1337 }
 0x220   : > { %v4681_v56 = vpop.permute.xlu0 %1242  ;;  %v1979_v3 = vsel %vm1954_vm5, %v1946_v40, %v1338_v63 }
 0x221   : > { %1854 = vrot.lane.b32.xlu1 %v1791_v60, %s3164_s17 }
 0x222   : > { %1852 = vrot.lane.b32.xlu0 %v1789_v15, %s3164_s17 }
 0x223   : > { %v1736_v4 = vpop.permute.xlu1 %1735 }
 0x224   : > { %v1636_v14 = vpop.permute.xlu0 %1635  ;;  %v2109_v36 = vsel %vm2086_vm9, %v2076_v54, %v1736_v4 }
 0x225   : > { %v2077_v25 = vsel %vm2053_vm8, %v2044_v32, %v1636_v14 }
 0x227   : > { %v1440_v49 = vpop.permute.xlu1 %1439 }
 0x228   : > { %v1340_v29 = vpop.permute.xlu0 %1339  ;;  %v2012_v60 = vsel %vm1987_vm6, %v1979_v3, %v1440_v49  ;;  %v5310_v49 = vld [vmem:[#allocation48_spill] sm:$0xff] }
 0x229   : > { %v3036_v20 = vpop.f32.mrb[6].mxu0  ;;  %v1914_v2 = vsel %vm1888_vm4, %v5279_v8, %v5310_v49 }
 0x22a   : > { %v4698_v52 = vadd.f32 %v3036_v20, %v4435_v18  ;;  %v2361_v41 = vpop.f32.mrb[7].mxu0  ;;  %v1947_v30 = vsel %vm1921_vm3, %v1914_v2, %v4681_v56 }
 0x22b   : > { %v4702_v57 = vadd.f32 %v4435_v18, %v2361_v41  ;;  %v1837_v10 = vpop.permute.xlu1 %1836  ;;  %v1980_v54 = vsel %vm1954_vm5, %v1947_v30, %v1340_v29 }
 0x22c   : > { %v1738_v0 = vpop.permute.xlu0 %1737  ;;  %2700 = vst.msk [vmem:[%s4443_s24 + $0x38] sm:$0xff] %vm1888_vm4, %v4698_v52  ;;  %v2142_v34 = vsel %vm2119_vm10, %v2109_v36, %v1837_v10 }
 0x22d   : > { %2699 = vst.msk [vmem:[%s4443_s24 + $0x30] sm:$0xff] %vm1888_vm4, %v4702_v57  ;;  %3058 = vmatprep.mubr.msk.f32.mxu1 %vm2168_vm11, %v2142_v34  ;;  %v2110_v50 = vsel %vm2086_vm9, %v2077_v25, %v1738_v0 }
 0x22f   : > { %v1541_v24 = vpop.permute.xlu1 %1540 }
 0x230   : > { %v1442_v62 = vpop.permute.xlu0 %1441  ;;  %v2045_v15 = vsel %vm2020_vm7, %v2012_v60, %v1541_v24 }
 0x231   : > { %v2013_v36 = vsel %vm1987_vm6, %v1980_v54, %v1442_v62  ;;  %v5311_v62 = vld [vmem:[#allocation51_spill] sm:$0xff] }
 0x232   : > { %v1915_v32 = vsel %vm1888_vm4, %v5284_v55, %v5311_v62 }
 0x233   : > { %v1245_v9 = vpop.permute.xlu1 %1244 }
 0x234   : > { %v1839_v28 = vpop.permute.xlu0 %1838  ;;  %v1948_v25 = vsel %vm1921_vm3, %v1915_v32, %v1245_v9 }
 0x235   : > { %v2143_v23 = vsel %vm2119_vm10, %v2110_v50, %v1839_v28 }
 0x236   : > { %3059 = vmatmul.mubr.msk.f32.gmra.mrb[6].mxu1 %vm2168_vm11, %v2143_v23 }
 0x237   : > { %v1638_v33 = vpop.permute.xlu1 %1637 }
 0x238   : > { %v1543_v17 = vpop.permute.xlu0 %1542  ;;  %v2078_v14 = vsel %vm2053_vm8, %v2045_v15, %v1638_v33 }
 0x239   : > { %v2046_v10 = vsel %vm2020_vm7, %v2013_v36, %v1543_v17 }
 0x23b   : > { %v1342_v37 = vpop.permute.xlu1 %1341 }
 0x23c   : > { %v1247_v19 = vpop.permute.xlu0 %1246  ;;  %v1981_v50 = vsel %vm1954_vm5, %v1948_v25, %v1342_v37 }
 0x23f   : > { %v1740_v42 = vpop.permute.xlu1 %1739 }
 0x240   : > { %v1640_v45 = vpop.permute.xlu0 %1639  ;;  %v2111_v35 = vsel %vm2086_vm9, %v2078_v14, %v1740_v42 }
 0x241   : > { %v2079_v0 = vsel %vm2053_vm8, %v2046_v10, %v1640_v45 }
 0x243   : > { %v1444_v59 = vpop.permute.xlu1 %1443 }
 0x244   : > { %v1344_v47 = vpop.permute.xlu0 %1343  ;;  %v2014_v23 = vsel %vm1987_vm6, %v1981_v50, %v1444_v59  ;;  %v5312_v59 = vld [vmem:[#allocation50_spill] sm:$0xff] }
 0x245   : > { %v3039_v4 = vpop.f32.mrb[8].mxu0  ;;  %v1916_v60 = vsel %vm1888_vm4, %v5286_v51, %v5312_v59 }
 0x246   : > { %v4735_v12 = vadd.f32 %v3039_v4, %v4435_v18  ;;  %v2371_v53 = vpop.f32.mrb[9].mxu0  ;;  %v1949_v15 = vsel %vm1921_vm3, %v1916_v60, %v1247_v19 }
 0x247   : > { %v4739_v61 = vadd.f32 %v4435_v18, %v2371_v53  ;;  %v1841_v6 = vpop.permute.xlu1 %1840  ;;  %v1982_v14 = vsel %vm1954_vm5, %v1949_v15, %v1344_v47 }
 0x248   : > { %v1742_v63 = vpop.permute.xlu0 %1741  ;;  %2702 = vst.msk [vmem:[%s4443_s24 + $0x48] sm:$0xff] %vm1888_vm4, %v4735_v12  ;;  %v2144_v21 = vsel %vm2119_vm10, %v2111_v35, %v1841_v6 }
 0x249   : > { %2701 = vst.msk [vmem:[%s4443_s24 + $0x40] sm:$0xff] %vm1888_vm4, %v4739_v61  ;;  %3061 = vmatprep.mubr.msk.f32.mxu1 %vm2168_vm11, %v2144_v21  ;;  %v2112_v13 = vsel %vm2086_vm9, %v2079_v0, %v1742_v63 }
 0x24b   : > { %v1545_v20 = vpop.permute.xlu1 %1544 }
 0x24c   : > { %v1446_v41 = vpop.permute.xlu0 %1445  ;;  %v2047_v17 = vsel %vm2020_vm7, %v2014_v23, %v1545_v20 }
 0x24d   : > { %v2015_v35 = vsel %vm1987_vm6, %v1982_v14, %v1446_v41  ;;  %v5313_v41 = vld [vmem:[#allocation53_spill] sm:$0xff]  ;;  %v5316_v14 = vld [vmem:[#allocation55_spill] sm:$0xff] }
 0x24e   : > { %v1917_v10 = vsel %vm1888_vm4, %v5291_v43, %v5313_v41 }
 0x24f   : > { %v1249_v34 = vpop.permute.xlu1 %1248 }
 0x250   : > { %v1843_v16 = vpop.permute.xlu0 %1842  ;;  %v1950_v0 = vsel %vm1921_vm3, %v1917_v10, %v1249_v34 }
 0x251   : > { %v2145_v39 = vsel %vm2119_vm10, %v2112_v13, %v1843_v16 }
 0x252   : > { %3062 = vmatmul.mubr.msk.f32.gmra.mrb[8].mxu1 %vm2168_vm11, %v2145_v39 }
 0x253   : > { %v1642_v8 = vpop.permute.xlu1 %1641 }
 0x254   : > { %v1547_v56 = vpop.permute.xlu0 %1546  ;;  %v2080_v45 = vsel %vm2053_vm8, %v2047_v17, %v1642_v8 }
 0x255   : > { %v2048_v6 = vsel %vm2020_vm7, %v2015_v35, %v1547_v56 }
 0x257   : > { %v1346_v31 = vpop.permute.xlu1 %1345 }
 0x258   : > { %v1251_v24 = vpop.permute.xlu0 %1250  ;;  %v1983_v13 = vsel %vm1954_vm5, %v1950_v0, %v1346_v31 }
 0x25b   : > { %v1744_v29 = vpop.permute.xlu1 %1743 }
 0x25c   : > { %v1644_v1 = vpop.permute.xlu0 %1643  ;;  %v2113_v55 = vsel %vm2086_vm9, %v2080_v45, %v1744_v29 }
 0x25d   : > { %v2081_v63 = vsel %vm2053_vm8, %v2048_v6, %v1644_v1 }
 0x25f   : > { %v1448_v28 = vpop.permute.xlu1 %1447 }
 0x260   : > { %v1348_v33 = vpop.permute.xlu0 %1347  ;;  %v2016_v39 = vsel %vm1987_vm6, %v1983_v13, %v1448_v28  ;;  %v5314_v28 = vld [vmem:[#allocation52_spill] sm:$0xff] }
 0x261   : > { %v3042_v42 = vpop.f32.mrb[10].mxu0  ;;  %v1918_v23 = vsel %vm1888_vm4, %v5293_v48, %v5314_v28 }
 0x262   : > { %v4770_v26 = vadd.f32 %v3042_v42, %v4435_v18  ;;  %v2381_v22 = vpop.f32.mrb[11].mxu0  ;;  %v1951_v17 = vsel %vm1921_vm3, %v1918_v23, %v1251_v24 }
 0x263   : > { %v4774_v9 = vadd.f32 %v4435_v18, %v2381_v22  ;;  %v1845_v40 = vpop.permute.xlu1 %1844  ;;  %v1984_v45 = vsel %vm1954_vm5, %v1951_v17, %v1348_v33 }
 0x264   : > { %2704 = vst.msk [vmem:[%s4443_s24 + $0x58] sm:$0xff] %vm1888_vm4, %v4770_v26  ;;  %v2146_v37 = vsel %vm2119_vm10, %v2113_v55, %v1845_v40  ;;  %v1746_v3 = vpop.permute.xlu0 %1745 }
 0x265   : > { %2703 = vst.msk [vmem:[%s4443_s24 + $0x50] sm:$0xff] %vm1888_vm4, %v4774_v9  ;;  %3064 = vmatprep.mubr.msk.f32.mxu1 %vm2168_vm11, %v2146_v37  ;;  %v2114_v49 = vsel %vm2086_vm9, %v2081_v63, %v1746_v3 }
 0x267   : > { %v1549_v4 = vpop.permute.xlu1 %1548 }
 0x268   : > { %v1450_v53 = vpop.permute.xlu0 %1449  ;;  %v2049_v56 = vsel %vm2020_vm7, %v2016_v39, %v1549_v4  ;;  %v5315_v4 = vld [vmem:[#allocation54_spill] sm:$0xff] }
 0x269   : > { %v2017_v55 = vsel %vm1987_vm6, %v1984_v45, %v1450_v53  ;;  %v1920_v33 = vsel %vm1888_vm4, %v5300_v5, %v5315_v4  ;;  %v1919_v53 = vsel %vm1888_vm4, %v5298_v11, %v5316_v14  ;;  %v2499_v14 = vsel %vm1888_vm4, %v4634_v44, 0.0 }
 0x26b   : > { %v1253_v21 = vpop.permute.xlu1 %1252 }
 0x26c   : > { %v1847_v2 = vpop.permute.xlu0 %1846  ;;  %v1952_v6 = vsel %vm1921_vm3, %v1919_v53, %v1253_v21  ;;  %v2501_v53 = vsel %vm1888_vm4, %v4702_v57, 0.0 }
 0x26d   : > { %v2147_v30 = vsel %vm2119_vm10, %v2114_v49, %v1847_v2 }
 0x26e   : > { %3065 = vmatmul.mubr.msk.f32.gmra.mrb[10].mxu1 %vm2168_vm11, %v2147_v30 }
 0x26f   : > { %v1646_v51 = vpop.permute.xlu1 %1645 }
 0x270   : > { %v1551_v19 = vpop.permute.xlu0 %1550  ;;  %v2082_v1 = vsel %vm2053_vm8, %v2049_v56, %v1646_v51 }
 0x271   : > { %v2050_v40 = vsel %vm2020_vm7, %v2017_v55, %v1551_v19 }
 0x273   : > { %v1350_v20 = vpop.permute.xlu1 %1349 }
 0x274   : > { %v1255_v54 = vpop.permute.xlu0 %1254  ;;  %v1985_v2 = vsel %vm1954_vm5, %v1952_v6, %v1350_v20 }
 0x275   : > { %v1953_v35 = vsel %vm1921_vm3, %v1920_v33, %v1255_v54 }
 0x277   : > { %v1748_v47 = vpop.permute.xlu1 %1747 }
 0x278   : > { %v1648_v36 = vpop.permute.xlu0 %1647  ;;  %v2115_v43 = vsel %vm2086_vm9, %v2082_v1, %v1748_v47 }
 0x279   : > { %v2083_v37 = vsel %vm2053_vm8, %v2050_v40, %v1648_v36 }
 0x27b   : > { %v1452_v16 = vpop.permute.xlu1 %1451 }
 0x27c   : > { %v1352_v8 = vpop.permute.xlu0 %1351  ;;  %v2018_v19 = vsel %vm1987_vm6, %v1985_v2, %v1452_v16 }
 0x27d   : > { %v3045_v29 = vpop.f32.mrb[12].mxu0  ;;  %v1986_v63 = vsel %vm1954_vm5, %v1953_v35, %v1352_v8 }
 0x27e   : > { %v4804_v62 = vadd.f32 %v3045_v29, %v4435_v18  ;;  %v2391_v32 = vpop.f32.mrb[13].mxu0 }
 0x27f   : > { %v4808_v34 = vadd.f32 %v4435_v18, %v2391_v32  ;;  %v1849_v25 = vpop.permute.xlu1 %1848 }
 0x280   : > { %2706 = vst.msk [vmem:[%s4443_s24 + $0x68] sm:$0xff] %vm1888_vm4, %v4804_v62  ;;  %v2148_v31 = vsel %vm2119_vm10, %v2115_v43, %v1849_v25  ;;  %v1750_v50 = vpop.permute.xlu0 %1749 }
 0x281   : > { %2705 = vst.msk [vmem:[%s4443_s24 + $0x60] sm:$0xff] %vm1888_vm4, %v4808_v34  ;;  %3067 = vmatprep.mubr.msk.f32.mxu1 %vm2168_vm11, %v2148_v31  ;;  %v2116_v59 = vsel %vm2086_vm9, %v2083_v37, %v1750_v50  ;;  %v2491_v37 = vsel %vm1888_vm4, %v4450_v38, 0.0 }
 0x283   : > { %v1553_v42 = vpop.permute.xlu1 %1552 }
 0x284   : > { %v1454_v22 = vpop.permute.xlu0 %1453  ;;  %v2051_v47 = vsel %vm2020_vm7, %v2018_v19, %v1553_v42 }
 0x285   : > { %v2019_v30 = vsel %vm1987_vm6, %v1986_v63, %v1454_v22  ;;  %v2503_v63 = vsel %vm1888_vm4, %v4698_v52, 0.0 }
 0x287   : > { %v1555_v3 = vpop.permute.xlu1 %1554 }
 0x288   : > { %v1851_v60 = vpop.permute.xlu0 %1850  ;;  %v2052_v5 = vsel %vm2020_vm7, %v2019_v30, %v1555_v3  ;;  %v2490_v3 = vsel %vm1888_vm4, %v4454_v7, 0.0 }
 0x289   : > { %v2149_v15 = vsel %vm2119_vm10, %v2116_v59, %v1851_v60  ;;  %v2493_v59 = vsel %vm1888_vm4, %v4548_v46, 0.0  ;;  %v2492_v60 = vadd.f32 %v2491_v37, %v2490_v3 }
 0x28a   : > { %3068 = vmatmul.mubr.msk.f32.gmra.mrb[12].mxu1 %vm2168_vm11, %v2149_v15 }
 0x28b   : > { %v1652_v48 = vpop.permute.xlu1 %1651  ;;  %v2494_v15 = vadd.f32 %v2493_v59, %v2492_v60 }
 0x28c   : > { %v1650_v24 = vpop.permute.xlu0 %1649  ;;  %v2085_v11 = vsel %vm2053_vm8, %v2052_v5, %v1652_v48  ;;  %v2495_v48 = vsel %vm1888_vm4, %v4542_v58, 0.0 }
 0x28d   : > { %v2084_v21 = vsel %vm2053_vm8, %v2051_v47, %v1650_v24  ;;  %v2497_v24 = vsel %vm1888_vm4, %v4639_v27, 0.0  ;;  %v2496_v4 = vadd.f32 %v2495_v48, %v2494_v15 }
 0x28f   : > { %v1754_v49 = vpop.permute.xlu1 %1753  ;;  %v2498_v33 = vadd.f32 %v2497_v24, %v2496_v4 }
 0x290   : > { %v1752_v51 = vpop.permute.xlu0 %1751  ;;  %v2118_v54 = vsel %vm2086_vm9, %v2085_v11, %v1754_v49  ;;  %v2505_v49 = vsel %vm1888_vm4, %v4739_v61, 0.0  ;;  %v2507_v11 = vsel %vm1888_vm4, %v4735_v12, 0.0 }
 0x291   : > { %v2117_v20 = vsel %vm2086_vm9, %v2084_v21, %v1752_v51  ;;  %v2500_v35 = vadd.f32 %v2499_v14, %v2498_v33  ;;  %v2509_v21 = vsel %vm1888_vm4, %v4774_v9, 0.0 }
 0x293   : > { %v1855_v36 = vpop.permute.xlu1 %1854  ;;  %v2502_v6 = vadd.f32 %v2501_v53, %v2500_v35 }
 0x294   : > { %v2151_v41 = vsel %vm2119_vm10, %v2118_v54, %v1855_v36  ;;  %v1853_v10 = vpop.permute.xlu0 %1852 }
 0x295   : > { %v2150_v0 = vsel %vm2119_vm10, %v2117_v20, %v1853_v10  ;;  %v2504_v2 = vadd.f32 %v2503_v63, %v2502_v6  ;;  %v2511_v20 = vsel %vm1888_vm4, %v4770_v26, 0.0 }
 0x296   : > { %3070 = vmatprep.mubr.msk.f32.mxu1 %vm2168_vm11, %v2150_v0 }
 0x297   : > { %3071 = vmatmul.mubr.msk.f32.gmra.mrb[14].mxu1 %vm2168_vm11, %v2151_v41  ;;  %v2506_v51 = vadd.f32 %v2505_v49, %v2504_v2  ;;  %v2513_v41 = vsel %vm1888_vm4, %v4808_v34, 0.0 }
 0x299   : > { %v3048_v13 = vpop.f32.mrb[14].mxu0  ;;  %v2508_v54 = vadd.f32 %v2507_v11, %v2506_v51 }
 0x29a   : > { %v4852_v16 = vadd.f32 %v3048_v13, %v4435_v18  ;;  %v2401_v39 = vpop.f32.mrb[15].mxu0  ;;  %v2515_v13 = vsel %vm1888_vm4, %v4804_v62, 0.0 }
 0x29b   : > { %v4855_v8 = vadd.f32 %v4435_v18, %v2401_v39  ;;  %v2510_v36 = vadd.f32 %v2509_v21, %v2508_v54 }
 0x29c   : > { %2708 = vst.msk [vmem:[%s4443_s24 + $0x78] sm:$0xff] %vm1888_vm4, %v4852_v16 }
 0x29d   : > { %2707 = vst.msk [vmem:[%s4443_s24 + $0x70] sm:$0xff] %vm1888_vm4, %v4855_v8  ;;  %v2512_v10 = vadd.f32 %v2511_v20, %v2510_v36  ;;  %v2517_v39 = vsel %vm1888_vm4, %v4855_v8, 0.0 }
 0x29f   : > { %v2514_v0 = vadd.f32 %v2513_v41, %v2512_v10 }
 0x2b5   : > { %v3051_v56 = vpop.f32.mrb[0].mxu1 }
 0x2b6   : > { %v4864_v29 = vadd.f32 %v3051_v56, %v4435_v18  ;;  %v2411_v1 = vpop.f32.mrb[1].mxu1  ;;  %v2516_v56 = vadd.f32 %v2515_v13, %v2514_v0 }
 0x2b7   : > { %v4867_v32 = vadd.f32 %v4435_v18, %v2411_v1 }
 0x2b8   : > { %2710 = vst.msk [vmem:[%s4443_s24 + $0x88] sm:$0xff] %vm1888_vm4, %v4864_v29  ;;  %v2518_v1 = vadd.f32 %v2517_v39, %v2516_v56 }
 0x2b9   : > { %2709 = vst.msk [vmem:[%s4443_s24 + $0x80] sm:$0xff] %vm1888_vm4, %v4867_v32 }
 0x2d1   : > { %v3054_v43 = vpop.f32.mrb[2].mxu1 }
 0x2d2   : > { %v4876_v25 = vadd.f32 %v3054_v43, %v4435_v18  ;;  %v2421_v31 = vpop.f32.mrb[3].mxu1  ;;  %v2519_v43 = vsel %vm1888_vm4, %v4852_v16, 0.0 }
 0x2d3   : > { %v4879_v50 = vadd.f32 %v4435_v18, %v2421_v31  ;;  %v2521_v31 = vsel %vm1888_vm4, %v4867_v32, 0.0 }
 0x2d4   : > { %2712 = vst.msk [vmem:[%s4443_s24 + $0x98] sm:$0xff] %vm1888_vm4, %v4876_v25  ;;  %v2527_v24 = vsel %vm1888_vm4, %v4876_v25, 0.0 }
 0x2d5   : > { %2711 = vst.msk [vmem:[%s4443_s24 + $0x90] sm:$0xff] %vm1888_vm4, %v4879_v50 }
 0x2ed   : > { %v3057_v28 = vpop.f32.mrb[4].mxu1 }
 0x2ee   : > { %v4888_v23 = vadd.f32 %v3057_v28, %v4435_v18  ;;  %v2431_v17 = vpop.f32.mrb[5].mxu1  ;;  %v2520_v28 = vadd.f32 %v2519_v43, %v2518_v1 }
 0x2ef   : > { %v4891_v42 = vadd.f32 %v4435_v18, %v2431_v17 }
 0x2f0   : > { %2714 = vst.msk [vmem:[%s4443_s24 + $0xa8] sm:$0xff] %vm1888_vm4, %v4888_v23  ;;  %v2522_v17 = vadd.f32 %v2521_v31, %v2520_v28  ;;  %v2531_v53 = vsel %vm1888_vm4, %v4888_v23, 0.0 }
 0x2f1   : > { %2713 = vst.msk [vmem:[%s4443_s24 + $0xa0] sm:$0xff] %vm1888_vm4, %v4891_v42  ;;  %v2529_v4 = vsel %vm1888_vm4, %v4891_v42, 0.0 }
 0x309   : > { %v3060_v45 = vpop.f32.mrb[6].mxu1 }
 0x30a   : > { %v4900_v22 = vadd.f32 %v3060_v45, %v4435_v18  ;;  %v2441_v55 = vpop.f32.mrb[7].mxu1  ;;  %v2523_v45 = vsel %vm1888_vm4, %v4864_v29, 0.0 }
 0x30b   : > { %v4903_v40 = vadd.f32 %v4435_v18, %v2441_v55  ;;  %v2525_v55 = vsel %vm1888_vm4, %v4879_v50, 0.0  ;;  %v2524_v3 = vadd.f32 %v2523_v45, %v2522_v17 }
 0x30c   : > { %2716 = vst.msk [vmem:[%s4443_s24 + $0xb8] sm:$0xff] %vm1888_vm4, %v4900_v22  ;;  %v2535_v49 = vsel %vm1888_vm4, %v4900_v22, 0.0 }
 0x30d   : > { %2715 = vst.msk [vmem:[%s4443_s24 + $0xb0] sm:$0xff] %vm1888_vm4, %v4903_v40  ;;  %v2526_v48 = vadd.f32 %v2525_v55, %v2524_v3  ;;  %v2533_v35 = vsel %vm1888_vm4, %v4903_v40, 0.0 }
 0x30f   : > { %v2528_v33 = vadd.f32 %v2527_v24, %v2526_v48 }
 0x311   : > { %v2530_v14 = vadd.f32 %v2529_v4, %v2528_v33 }
 0x313   : > { %v2532_v6 = vadd.f32 %v2531_v53, %v2530_v14 }
 0x315   : > { %v2534_v63 = vadd.f32 %v2533_v35, %v2532_v6 }
 0x325   : > { %v3063_v30 = vpop.f32.mrb[8].mxu1 }
 0x326   : > { %v4930_v19 = vadd.f32 %v3063_v30, %v4435_v18  ;;  %v2451_v5 = vpop.f32.mrb[9].mxu1  ;;  %v2536_v30 = vadd.f32 %v2535_v49, %v2534_v63 }
 0x327   : > { %v4933_v47 = vadd.f32 %v4435_v18, %v2451_v5 }
 0x328   : > { %2718 = vst.msk [vmem:[%s4443_s24 + $0xc8] sm:$0xff] %vm1888_vm4, %v4930_v19  ;;  %v2539_v5 = vsel %vm1888_vm4, %v4930_v19, 0.0 }
 0x329   : > { %2717 = vst.msk [vmem:[%s4443_s24 + $0xc0] sm:$0xff] %vm1888_vm4, %v4933_v47  ;;  %v2537_v2 = vsel %vm1888_vm4, %v4933_v47, 0.0 }
 0x32a   : > { %v2538_v51 = vadd.f32 %v2537_v2, %v2536_v30 }
 0x32c   : > { %v2540_v21 = vadd.f32 %v2539_v5, %v2538_v51 }
 0x341   : > { %v3066_v37 = vpop.f32.mrb[10].mxu1 }
 0x342   : > { %v4962_v59 = vadd.f32 %v3066_v37, %v4435_v18  ;;  %v2461_v60 = vpop.f32.mrb[11].mxu1 }
 0x343   : > { %v4965_v15 = vadd.f32 %v4435_v18, %v2461_v60 }
 0x344   : > { %2720 = vst.msk [vmem:[%s4443_s24 + $0xd8] sm:$0xff] %vm1888_vm4, %v4962_v59  ;;  %v2543_v10 = vsel %vm1888_vm4, %v4962_v59, 0.0 }
 0x345   : > { %2719 = vst.msk [vmem:[%s4443_s24 + $0xd0] sm:$0xff] %vm1888_vm4, %v4965_v15  ;;  %v2541_v11 = vsel %vm1888_vm4, %v4965_v15, 0.0 }
 0x346   : > { %v2542_v54 = vadd.f32 %v2541_v11, %v2540_v21 }
 0x348   : > { %v2544_v13 = vadd.f32 %v2543_v10, %v2542_v54 }
 0x35d   : > { %v3069_v36 = vpop.f32.mrb[12].mxu1 }
 0x35e   : > { %v4990_v20 = vadd.f32 %v3069_v36, %v4435_v18  ;;  %v2471_v41 = vpop.f32.mrb[13].mxu1 }
 0x35f   : > { %v4995_v0 = vadd.f32 %v4435_v18, %v2471_v41 }
 0x360   : > { %2722 = vst.msk [vmem:[%s4443_s24 + $0xe8] sm:$0xff] %vm1888_vm4, %v4990_v20  ;;  %v2547_v1 = vsel %vm1888_vm4, %v4990_v20, 0.0 }
 0x361   : > { %v2545_v39 = vsel %vm1888_vm4, %v4995_v0, 0.0  ;;  %2721 = vst.msk [vmem:[%s4443_s24 + $0xe0] sm:$0xff] %vm1888_vm4, %v4995_v0 }
 0x362   : > { %v2546_v56 = vadd.f32 %v2545_v39, %v2544_v13 }
 0x364   : > { %v2548_v43 = vadd.f32 %v2547_v1, %v2546_v56 }
 0x36a   : > { %v3072_v31 = vpop.f32.mrb[14].mxu1 }
 0x36b   : > { %v5008_v28 = vadd.f32 %v3072_v31, %v4435_v18  ;;  %v2481_v17 = vpop.f32.mrb[15].mxu1 }
 0x36c   : > { %v5011_v45 = vadd.f32 %v4435_v18, %v2481_v17 }
 0x36d   : > { %2724 = vst.msk [vmem:[%s4443_s24 + $0xf8] sm:$0xff] %vm1888_vm4, %v5008_v28  ;;  %v2551_v3 = vsel %vm1888_vm4, %v5008_v28, 0.0 }
 0x36e   : > { %v2549_v55 = vsel %vm1888_vm4, %v5011_v45, 0.0  ;;  %2723 = vst.msk [vmem:[%s4443_s24 + $0xf0] sm:$0xff] %vm1888_vm4, %v5011_v45 }
 0x36f   : > { %v2550_v37 = vadd.f32 %v2549_v55, %v2548_v43 }
 0x371   : > { %v2552_v60 = vadd.f32 %v2551_v3, %v2550_v37 }
 0x373   : > { %v2553_v48 = vrot.slane %v2552_v60, 4 }
 0x375   : > { %v2554_v24 = vadd.f32 %v2553_v48, %v2552_v60 }
 0x377   : > { %v2555_v4 = vrot.slane %v2554_v24, 2 }
 0x379   : > { %v2556_v33 = vadd.f32 %v2555_v4, %v2554_v24 }
 0x37b   : > { %v2557_v18 = vrot.slane %v2556_v33, 1 }
 0x37d   : > { %v5023_v14 = vadd.f32 %v2557_v18, %v2556_v33 }
 0x37f   : > { %v5026_v53 = vmul.f32 0.00390625, %v5023_v14 }
 0x381   : > { %v2560_v35 = vsub.f32 %v4454_v7, %v5026_v53  ;;  %v2561_v6 = vsub.f32 %v4450_v38, %v5026_v53  ;;  %v2562_v63 = vsub.f32 %v4548_v46, %v5026_v53  ;;  %v2563_v49 = vsub.f32 %v4542_v58, %v5026_v53 }
 0x382   : > { %v2564_v51 = vsub.f32 %v4639_v27, %v5026_v53  ;;  %v2565_v11 = vsub.f32 %v4634_v44, %v5026_v53  ;;  %v2566_v46 = vsub.f32 %v4702_v57, %v5026_v53  ;;  %v2567_v27 = vsub.f32 %v4698_v52, %v5026_v53 }
 0x383   : > { %v2592_v2 = vmul.f32 %v2560_v35, %v2560_v35  ;;  %v2593_v30 = vmul.f32 %v2561_v6, %v2561_v6  ;;  %v2594_v5 = vmul.f32 %v2562_v63, %v2562_v63  ;;  %v2595_v21 = vmul.f32 %v2563_v49, %v2563_v49 }
 0x384   : > { %v2596_v36 = vmul.f32 %v2564_v51, %v2564_v51  ;;  %v2597_v10 = vmul.f32 %v2565_v11, %v2565_v11  ;;  %v2568_v39 = vsub.f32 %v4739_v61, %v5026_v53  ;;  %v2598_v56 = vmul.f32 %v2566_v46, %v2566_v46 }
 0x385   : > { %v2624_v7 = vsel %vm1888_vm4, %v2592_v2, 0.0  ;;  %v2625_v38 = vsel %vm1888_vm4, %v2593_v30, 0.0  ;;  %v2627_v58 = vsel %vm1888_vm4, %v2594_v5, 0.0  ;;  %v2629_v13 = vsel %vm1888_vm4, %v2595_v21, 0.0 }
 0x386   : > { %v2626_v54 = vadd.f32 %v2625_v38, %v2624_v7  ;;  %v2631_v1 = vsel %vm1888_vm4, %v2596_v36, 0.0  ;;  %v2569_v57 = vsub.f32 %v4735_v12, %v5026_v53  ;;  %v2599_v31 = vmul.f32 %v2567_v27, %v2567_v27 }
 0x387   : > { %v2633_v17 = vsel %vm1888_vm4, %v2597_v10, 0.0  ;;  %v2570_v52 = vsub.f32 %v4774_v9, %v5026_v53  ;;  %v2600_v37 = vmul.f32 %v2568_v39, %v2568_v39  ;;  %v2635_v3 = vsel %vm1888_vm4, %v2598_v56, 0.0 }
 0x388   : > { %v2628_v41 = vadd.f32 %v2627_v58, %v2626_v54  ;;  %v2571_v61 = vsub.f32 %v4770_v26, %v5026_v53  ;;  %v2601_v48 = vmul.f32 %v2569_v57, %v2569_v57  ;;  %v2637_v24 = vsel %vm1888_vm4, %v2599_v31, 0.0 }
 0x389   : > { %v2572_v12 = vsub.f32 %v4808_v34, %v5026_v53  ;;  %v2602_v33 = vmul.f32 %v2570_v52, %v2570_v52  ;;  %v2639_v18 = vsel %vm1888_vm4, %v2600_v37, 0.0  ;;  %v2573_v9 = vsub.f32 %v4804_v62, %v5026_v53 }
 0x38a   : > { %v2630_v44 = vadd.f32 %v2629_v13, %v2628_v41  ;;  %v2603_v6 = vmul.f32 %v2571_v61, %v2571_v61  ;;  %v2641_v63 = vsel %vm1888_vm4, %v2601_v48, 0.0  ;;  %v2574_v26 = vsub.f32 %v4855_v8, %v5026_v53 }
 0x38b   : > { %v2604_v2 = vmul.f32 %v2572_v12, %v2572_v12  ;;  %v2643_v30 = vsel %vm1888_vm4, %v2602_v33, 0.0  ;;  %v2575_v34 = vsub.f32 %v4852_v16, %v5026_v53  ;;  %v2605_v5 = vmul.f32 %v2573_v9, %v2573_v9 }
 0x38c   : > { %v2632_v43 = vadd.f32 %v2631_v1, %v2630_v44  ;;  %v2645_v11 = vsel %vm1888_vm4, %v2603_v6, 0.0  ;;  %v2576_v62 = vsub.f32 %v4867_v32, %v5026_v53  ;;  %v2606_v7 = vmul.f32 %v2574_v26, %v2574_v26 }
 0x38d   : > { %v2647_v38 = vsel %vm1888_vm4, %v2604_v2, 0.0  ;;  %v2577_v8 = vsub.f32 %v4864_v29, %v5026_v53  ;;  %v2607_v46 = vmul.f32 %v2575_v34, %v2575_v34  ;;  %v2649_v36 = vsel %vm1888_vm4, %v2605_v5, 0.0 }
 0x38e   : > { %v2634_v55 = vadd.f32 %v2633_v17, %v2632_v43  ;;  %v2578_v16 = vsub.f32 %v4879_v50, %v5026_v53  ;;  %v2608_v41 = vmul.f32 %v2576_v62, %v2576_v62  ;;  %v2651_v27 = vsel %vm1888_vm4, %v2606_v7, 0.0 }
 0x38f   : > { %v2579_v32 = vsub.f32 %v4876_v25, %v5026_v53  ;;  %v2609_v13 = vmul.f32 %v2577_v8, %v2577_v8  ;;  %v2653_v44 = vsel %vm1888_vm4, %v2607_v46, 0.0  ;;  %v2580_v29 = vsub.f32 %v4891_v42, %v5026_v53 }
 0x390   : > { %v2636_v60 = vadd.f32 %v2635_v3, %v2634_v55  ;;  %v2610_v56 = vmul.f32 %v2578_v16, %v2578_v16  ;;  %v2655_v1 = vsel %vm1888_vm4, %v2608_v41, 0.0  ;;  %v2581_v50 = vsub.f32 %v4888_v23, %v5026_v53 }
 0x391   : > { %v2611_v57 = vmul.f32 %v2579_v32, %v2579_v32  ;;  %v2657_v31 = vsel %vm1888_vm4, %v2609_v13, 0.0  ;;  %v2582_v25 = vsub.f32 %v4903_v40, %v5026_v53  ;;  %v2612_v55 = vmul.f32 %v2580_v29, %v2580_v29 }
 0x392   : > { %v2638_v4 = vadd.f32 %v2637_v24, %v2636_v60  ;;  %v2659_v52 = vsel %vm1888_vm4, %v2610_v56, 0.0  ;;  %v2583_v42 = vsub.f32 %v4900_v22, %v5026_v53  ;;  %v2613_v3 = vmul.f32 %v2581_v50, %v2581_v50 }
 0x393   : > { %v2661_v60 = vsel %vm1888_vm4, %v2611_v57, 0.0  ;;  %v2584_v23 = vsub.f32 %v4933_v47, %v5026_v53  ;;  %v2614_v48 = vmul.f32 %v2582_v25, %v2582_v25  ;;  %v2663_v24 = vsel %vm1888_vm4, %v2612_v55, 0.0 }
 0x394   : > { %v2640_v35 = vadd.f32 %v2639_v18, %v2638_v4  ;;  %v2585_v40 = vsub.f32 %v4930_v19, %v5026_v53  ;;  %v2615_v12 = vmul.f32 %v2583_v42, %v2583_v42  ;;  %v2665_v33 = vsel %vm1888_vm4, %v2613_v3, 0.0 }
 0x395   : > { %v2586_v22 = vsub.f32 %v4965_v15, %v5026_v53  ;;  %v2667_v9 = vsel %vm1888_vm4, %v2614_v48, 0.0  ;;  %v2587_v47 = vsub.f32 %v4962_v59, %v5026_v53  ;;  %v2588_v19 = vsub.f32 %v4995_v0, %v5026_v53 }
 0x396   : > { %v2642_v49 = vadd.f32 %v2641_v63, %v2640_v35  ;;  %v2616_v35 = vmul.f32 %v2584_v23, %v2584_v23  ;;  %v2617_v63 = vmul.f32 %v2585_v40, %v2585_v40  ;;  %v2589_v15 = vsub.f32 %v4990_v20, %v5026_v53 }
 0x397   : > { %v2618_v2 = vmul.f32 %v2586_v22, %v2586_v22  ;;  %v2619_v34 = vmul.f32 %v2587_v47, %v2587_v47  ;;  %v2590_v59 = vsub.f32 %v5011_v45, %v5026_v53  ;;  %v2591_v0 = vsub.f32 %v5008_v28, %v5026_v53 }
 0x398   : > { %v2644_v51 = vadd.f32 %v2643_v30, %v2642_v49  ;;  %v2669_v49 = vsel %vm1888_vm4, %v2615_v12, 0.0  ;;  %v2671_v30 = vsel %vm1888_vm4, %v2616_v35, 0.0  ;;  %v2673_v5 = vsel %vm1888_vm4, %v2617_v63, 0.0 }
 0x399   : > { %v2675_v62 = vsel %vm1888_vm4, %v2618_v2, 0.0  ;;  %v2622_v20 = vmul.f32 %v2590_v59, %v2590_v59 }
 0x39a   : > { %v2646_v21 = vadd.f32 %v2645_v11, %v2644_v51 }
 0x39b   : > { %v2683_v41 = vsel %vm1888_vm4, %v2622_v20, 0.0 }
 0x39c   : > { %v2648_v54 = vadd.f32 %v2647_v38, %v2646_v21  ;;  %v2620_v21 = vmul.f32 %v2588_v19, %v2588_v19  ;;  %v2621_v38 = vmul.f32 %v2589_v15, %v2589_v15 }
 0x39e   : > { %v2650_v58 = vadd.f32 %v2649_v36, %v2648_v54  ;;  %v2677_v54 = vsel %vm1888_vm4, %v2619_v34, 0.0  ;;  %v2679_v46 = vsel %vm1888_vm4, %v2620_v21, 0.0  ;;  %v2681_v16 = vsel %vm1888_vm4, %v2621_v38, 0.0 }
 0x3a0   : > { %v2652_v10 = vadd.f32 %v2651_v27, %v2650_v58  ;;  %v2623_v58 = vmul.f32 %v2591_v0, %v2591_v0 }
 0x3a2   : > { %v2654_v39 = vadd.f32 %v2653_v44, %v2652_v10  ;;  %v2685_v10 = vsel %vm1888_vm4, %v2623_v58, 0.0 }
 0x3a4   : > { %v2656_v43 = vadd.f32 %v2655_v1, %v2654_v39 }
 0x3a6   : > { %v2658_v17 = vadd.f32 %v2657_v31, %v2656_v43 }
 0x3a8   : > { %v2660_v37 = vadd.f32 %v2659_v52, %v2658_v17 }
 0x3aa   : > { %v2662_v61 = vadd.f32 %v2661_v60, %v2660_v37 }
 0x3ac   : > { %v2664_v4 = vadd.f32 %v2663_v24, %v2662_v61 }
 0x3ae   : > { %v2666_v18 = vadd.f32 %v2665_v33, %v2664_v4 }
 0x3b0   : > { %v2668_v6 = vadd.f32 %v2667_v9, %v2666_v18 }
 0x3b2   : > { %v2670_v26 = vadd.f32 %v2669_v49, %v2668_v6 }
 0x3b4   : > { %v2672_v51 = vadd.f32 %v2671_v30, %v2670_v26 }
 0x3b6   : > { %v2674_v11 = vadd.f32 %v2673_v5, %v2672_v51 }
 0x3b8   : > { %v2676_v7 = vadd.f32 %v2675_v62, %v2674_v11 }
 0x3ba   : > { %v2678_v8 = vadd.f32 %v2677_v54, %v2676_v7 }
 0x3bc   : > { %v2680_v36 = vadd.f32 %v2679_v46, %v2678_v8 }
 0x3be   : > { %v2682_v45 = vadd.f32 %v2681_v16, %v2680_v36 }
 0x3c0   : > { %v2684_v27 = vadd.f32 %v2683_v41, %v2682_v45 }
 0x3c2   : > { %v2686_v32 = vadd.f32 %v2685_v10, %v2684_v27 }
 0x3c4   : > { %v2687_v28 = vrot.slane %v2686_v32, 4 }
 0x3c6   : > { %v2688_v53 = vadd.f32 %v2687_v28, %v2686_v32 }
 0x3c8   : > { %v2689_v13 = vrot.slane %v2688_v53, 2 }
 0x3ca   : > { %v2690_v44 = vadd.f32 %v2689_v13, %v2688_v53 }
 0x3cc   : > { %v2691_v39 = vrot.slane %v2690_v44, 1 }
 0x3ce   : > { %v2692_v29 = vadd.f32 %v2691_v39, %v2690_v44 }
 0x3d0   : > { %v2725_v56 = vsel %vm723_vm0, %v5023_v14, %v2692_v29 }
 0x3d1   : > { %2727 = vst.msk [vmem:[%s492_s21] sm:$0x3] %vm2726_vm12, %v2725_v56 }
 0x3d2 PF: > { %s19_s29 = sadd.s32 1, %s3155_s29   ;;  %s5317_s27 = smov %s3151_s28 }
 0x3d3   : > { %p16_p5 = scmp.ge.s32.totalorder %s19_s29, 4   ;;  %s5318_s28 = smov %s5320_s30 }
 0x3d5   :  { %18 = sbr.rel (!%p16_p5) target bundleno = 2 (0x2), region = 96 }

</bundles_post_ra>
